<compile_context>
chip_gen: v7x
topology: tpu7x:2x2x1
jax: 0.10.0
libtpu: 0.0.40
codegen_flags: <defaults>
</compile_context>

<pallas_src>
import jax
import jax.numpy as jnp
from jax.experimental import pallas as pl
from jax.experimental.pallas import tpu as pltpu


def _round_up(x, m):
    return (x + m - 1) // m * m


def _vmem_budget_bytes():
    """~85% of per-core VMEM (v7x 64 MiB -> ~54 MiB, v5e/v6e 128 MiB -> ~109 MiB),
    leaving headroom for Mosaic internal scratch."""
    try:
        cap = int(pltpu.get_tpu_info().vmem_capacity_bytes)
    except Exception:
        cap = 64 * 1024 * 1024            # conservative v7x floor
    cap = min(max(cap, 32 * 1024 * 1024), 128 * 1024 * 1024)
    return int(cap * 0.85)


def _pick_row_tile(Ho, Wo_pad, K, Cp, fixed_bytes, budget_bytes, force_split):
    """Largest output-row tile whose per-step VMEM (bf16 im2col scratch +
    double-buffered f32 output tile) fits next to the resident blocks."""
    per_row = Wo_pad * (K * 2 + 2 * Cp * 4)
    avail = max(budget_bytes - fixed_bytes, per_row)
    th = max(1, min(Ho, avail // per_row))
    if force_split and Ho >= 2:
        # Guarantee >= 2 grid units so both v7x TensorCores get work; on
        # v5e/v6e (1 TC) this costs at most one extra ~0.35us grid step.
        th = min(th, -(-Ho // 2))
    return int(th)


def _upblock_kernel(par_ref, w_ref, b_ref, out_ref, col_ref):
    """One (batch element, output-row-tile) grid step.

    par_ref: (1, 2, 2, Hh_pad, Wh_pad, Cin_pad)  bf16 parity (space-to-depth)
             layout of the zero-padded, channel-concatenated input:
             par[0, a, b, i, j, c] == x_padded[2*i + a, 2*j + b, c]
    w_ref  : (9*Cin_pad, Cp) bf16  im2col weight, K index = (kh*3+kw)*Cin_pad + c
    b_ref  : (1, Cp) f32           bias, zero padded to Cp lanes
    out_ref: (1, TH, Wo_pad, Cp) f32  relu(conv + bias), padded extents
    col_ref: (TH, Wo_pad, 9*Cin_pad) bf16 VMEM im2col scratch (fully rewritten
             every step -> no zero-init needed)
    """
    TH, Wo_pad, K = col_ref.shape
    Cin_pad = K // 9
    t = pl.program_id(1)
    row0 = t * TH                                  # first output row of this tile

    # im2col assembly: one contiguous, lane-dense slice copy per tap.
    # Parity trick: tap (kh, kw) of the stride-2 conv reads
    #   x_padded[2*i + kh, 2*j + kw] == par[kh%2, kw%2, i + kh//2, j + kw//2],
    # a contiguous (TH, Wo_pad, Cin_pad) window; the store target starts at a
    # static multiple of 128 lanes and is a full Cin_pad (multiple of 128) wide.
    for kh in range(3):
        for kw in range(3):
            tap = kh * 3 + kw
            patch = par_ref[0, kh % 2, kw % 2,
                            pl.ds(row0 + kh // 2, TH),
                            kw // 2:kw // 2 + Wo_pad, :]
            col_ref[:, :, tap * Cin_pad:(tap + 1) * Cin_pad] = patch

    # Single fused bf16 MXU matmul with K = 9*Cin_pad, f32 accumulation.
    a = col_ref[...].reshape(TH * Wo_pad, K)       # aligned merge (Wo_pad % 8 == 0)
    z = jnp.dot(a, w_ref[...], preferred_element_type=jnp.float32)
    z = jnp.maximum(z + b_ref[...], 0.0)           # bias + ReLU in f32
    out_ref[0] = z.reshape(out_ref.shape[1:]).astype(out_ref.dtype)  # dense stores


def _parity_concat(x1, x2, Hh_pad, Wh_pad, Cin_pad):
    """Fused bf16-cast + conv-pad + parity (space-to-depth) transpose, with the
    channels of both inputs folded onto the last axis and zero-padded to Cin_pad.
    Returns (N, 2, 2, Hh_pad, Wh_pad, Cin_pad)."""
    def one(x):
        n, c, h, w = x.shape
        xp = jnp.pad(x.astype(jnp.bfloat16),
                     ((0, 0), (0, 0),
                      (1, 2 * Hh_pad - h - 1), (1, 2 * Wh_pad - w - 1)))
        return xp.reshape(n, c, Hh_pad, 2, Wh_pad, 2).transpose(0, 3, 5, 2, 4, 1)

    p = jnp.concatenate([one(x1), one(x2)], axis=-1)
    cin = p.shape[-1]
    return jnp.pad(p, ((0, 0),) * 5 + ((0, Cin_pad - cin),))


def _run_pallas(par, w_all, b_pad, *, N, T, TH, Wo_pad, Hh_pad, Wh_pad,
                Cin_pad, Cp, K, vmem_limit, single_buffer_consts):
    const_kw = {"pipeline_mode": pl.Buffered(1)} if single_buffer_consts else {}
    Ho_pad = T * TH
    flops = 2 * N * Ho_pad * Wo_pad * K * Cp
    bytes_accessed = (par.size * 2 + w_all.size * 2 + b_pad.size * 4
                      + N * Ho_pad * Wo_pad * Cp * 4)
    return pl.pallas_call(
        _upblock_kernel,
        out_shape=jax.ShapeDtypeStruct((N, Ho_pad, Wo_pad, Cp), jnp.float32),
        grid_spec=pltpu.PrefetchScalarGridSpec(
            num_scalar_prefetch=0,
            grid=(N, T),
            in_specs=[
                pl.BlockSpec((1, 2, 2, Hh_pad, Wh_pad, Cin_pad),
                             lambda n, t: (n, 0, 0, 0, 0, 0)),
                pl.BlockSpec((K, Cp), lambda n, t: (0, 0), **const_kw),
                pl.BlockSpec((1, Cp), lambda n, t: (0, 0), **const_kw),
            ],
            out_specs=pl.BlockSpec((1, TH, Wo_pad, Cp), lambda n, t: (n, t, 0, 0)),
            scratch_shapes=[pltpu.VMEM((TH, Wo_pad, K), jnp.bfloat16)],
        ),
        compiler_params=pltpu.CompilerParams(
            dimension_semantics=("parallel", "parallel"),
            vmem_limit_bytes=int(vmem_limit)),
        cost_estimate=pl.CostEstimate(flops=int(flops), transcendentals=0,
                                      bytes_accessed=int(bytes_accessed)),
    )(par, w_all, b_pad)


def upblock_forward(x1, x2, weight, bias):
    """x1: (N, C1, H, W), x2: (N, C2, H, W) NCHW.  weight: (Cout, C1+C2, 3, 3) OIHW.
    Returns (N, Cout, 2*Ho, 2*Wo) NCHW == relu(upsample2(conv(cat([x1,x2],1))))."""
    N, C1, H, W = x1.shape
    C2 = x2.shape[1]
    Cout = weight.shape[0]
    Cin = C1 + C2
    Ho = (H + 2 - 3) // 2 + 1
    Wo = (W + 2 - 3) // 2 + 1

    Cin_pad = _round_up(Cin, 128)      # lane-aligned per-tap im2col slot width
    Cp = _round_up(Cout, 128)          # lane-dense output channels
    K = 9 * Cin_pad
    Wo_pad = _round_up(Wo, 8)          # keeps in-kernel reshapes sublane-aligned
    Wh_pad = Wo_pad + 1

    # Tile policy from the real VMEM budget (inputs double-buffered, weights
    # single-buffered, col scratch + double-buffered f32 output tile per row).
    budget = _vmem_budget_bytes()
    in_bytes = 2 * (2 * 2 * (Ho + 1) * Wh_pad * Cin_pad * 2)
    fixed = in_bytes + K * Cp * 2 + Cp * 4
    TH = _pick_row_tile(Ho, Wo_pad, K, Cp, fixed, budget, force_split=(N == 1))
    T = -(-Ho // TH)                   # cdiv: no TH=1 cliff for awkward Ho
    Ho_pad = T * TH
    Hh_pad = Ho_pad + 1

    # Inputs: one fused bf16 cast + pad + parity transpose + channel fold.
    par = _parity_concat(x1, x2, Hh_pad, Wh_pad, Cin_pad)

    # Weight: OIHW -> (kh, kw, cin, cout), cin/cout zero-padded, flattened so
    # K index = (kh*3 + kw)*Cin_pad + c (matches the kernel's tap fill order).
    w = jnp.transpose(weight, (2, 3, 1, 0))
    w = jnp.pad(w, ((0, 0), (0, 0), (0, Cin_pad - Cin), (0, Cp - Cout)))
    w_all = w.reshape(K, Cp).astype(jnp.bfloat16)
    b_pad = jnp.pad(bias, (0, Cp - Cout)).astype(jnp.float32).reshape(1, Cp)

    kwargs = dict(N=N, T=T, TH=TH, Wo_pad=Wo_pad, Hh_pad=Hh_pad, Wh_pad=Wh_pad,
                  Cin_pad=Cin_pad, Cp=Cp, K=K, vmem_limit=budget)
    try:
        out = jax.block_until_ready(
            _run_pallas(par, w_all, b_pad, single_buffer_consts=True, **kwargs))
    except Exception:
        # pl.Buffered(1) unsupported on this jax version -> default 2x buffering.
        out = _run_pallas(par, w_all, b_pad, single_buffer_consts=False, **kwargs)

    # Epilogue (single fused pass): drop padding, nearest x2, -> NCHW.
    # (ReLU commutes with nearest replication, so relu-before-upsample is exact.)
    y = jnp.transpose(out[:, :Ho, :Wo, :Cout], (0, 3, 1, 2))
    y = jnp.broadcast_to(y[:, :, :, None, :, None], (N, Cout, Ho, 2, Wo, 2))
    return y.reshape(N, Cout, 2 * Ho, 2 * Wo)


def upblock_reference(x1, x2, weight, bias):
    """Pure-JAX f32 reference (NCHW, mirrors the PyTorch forward)."""
    x = jnp.concatenate([x1, x2], axis=1)
    y = jax.lax.conv_general_dilated(
        x, weight, window_strides=(2, 2), padding=((1, 1), (1, 1)),
        dimension_numbers=("NCHW", "OIHW", "NCHW"))
    y = y + bias[None, :, None, None]
    y = jnp.repeat(jnp.repeat(y, 2, axis=2), 2, axis=3)         # nearest x2
    return jnp.maximum(y, 0.0)


if __name__ == "__main__":
    N, C1, C2, Cout, H, W = 2, 4, 4, 8, 16, 16
    key = jax.random.PRNGKey(0)
    k1, k2, k3, k4 = jax.random.split(key, 4)
    x1 = jax.random.normal(k1, (N, C1, H, W), jnp.float32)
    x2 = jax.random.normal(k2, (N, C2, H, W), jnp.float32)
    weight = jax.random.normal(k3, (Cout, C1 + C2, 3, 3), jnp.float32) * 0.1
    bias = jax.random.normal(k4, (Cout,), jnp.float32) * 0.1

    out = jax.block_until_ready(upblock_forward(x1, x2, weight, bias))
    ref = upblock_reference(x1, x2, weight, bias)
    assert out.shape == ref.shape == (N, Cout, H, W)
    # bf16 activations/weights with f32 accumulation vs the f32 reference.
    assert jnp.allclose(out, ref, rtol=5e-2, atol=5e-2), \
        float(jnp.max(jnp.abs(out - ref)))
    print("KERNEL_OK")
</pallas_src>

<mosaic_0001>
module attributes {stable_mosaic.version = 11 : i64} {
  func.func @_upblock_kernel(%arg0: i32, %arg1: i32, %arg2: memref<1x2x2x9x9x128xbf16, #tpu.memory_space<vmem>>, %arg3: memref<1152x128xbf16, #tpu.memory_space<vmem>>, %arg4: memref<1x128xf32, #tpu.memory_space<vmem>>, %arg5: memref<1x8x8x128xf32, #tpu.memory_space<vmem>>, %arg6: memref<8x8x1152xbf16, #tpu.memory_space<vmem>>) attributes {dimension_semantics = [#tpu.dimension_semantics<parallel>, #tpu.dimension_semantics<parallel>], iteration_bounds = array<i64: 2, 1>, scalar_prefetch = 0 : i64, scratch_operands = 1 : i64, tpu.core_type = #tpu.core_type<tc>, window_params = [{transform_indices = @transform_0, window_bounds = array<i64: 1, 2, 2, 9, 9, 128>}, {pipeline_mode = #tpu.pipeline_mode<synchronous>, transform_indices = @transform_1, window_bounds = array<i64: 1152, 128>}, {pipeline_mode = #tpu.pipeline_mode<synchronous>, transform_indices = @transform_2, window_bounds = array<i64: 1, 128>}, {transform_indices = @transform_3, window_bounds = array<i64: 1, 8, 8, 128>}]} {
    %c8_i32 = arith.constant 8 : i32
    %0 = arith.muli %arg1, %c8_i32 : i32
    %c0_i32 = arith.constant 0 : i32
    %1 = arith.addi %0, %c0_i32 : i32
    %c0 = arith.constant 0 : index
    %c0_0 = arith.constant 0 : index
    %c0_1 = arith.constant 0 : index
    %2 = arith.index_cast %1 : i32 to index
    %c0_2 = arith.constant 0 : index
    %c0_3 = arith.constant 0 : index
    %3 = vector.load %arg2[%c0, %c0_0, %c0_1, %2, %c0_2, %c0_3] : memref<1x2x2x9x9x128xbf16, #tpu.memory_space<vmem>>, vector<1x1x1x8x8x128xbf16>
    %4 = vector.shape_cast %3 : vector<1x1x1x8x8x128xbf16> to vector<8x8x128xbf16>
    %c0_4 = arith.constant 0 : index
    %c0_5 = arith.constant 0 : index
    %c0_6 = arith.constant 0 : index
    %5 = vector.load %arg6[%c0_4, %c0_5, %c0_6] : memref<8x8x1152xbf16, #tpu.memory_space<vmem>>, vector<8x8x128xbf16>
    tpu.vector_store %arg6[%c0_4, %c0_5, %c0_6], %4 {strides = array<i32>} : memref<8x8x1152xbf16, #tpu.memory_space<vmem>>, vector<8x8x128xbf16>,
    %c0_i32_7 = arith.constant 0 : i32
    %6 = arith.addi %0, %c0_i32_7 : i32
    %c0_8 = arith.constant 0 : index
    %c0_9 = arith.constant 0 : index
    %c1 = arith.constant 1 : index
    %7 = arith.index_cast %6 : i32 to index
    %c0_10 = arith.constant 0 : index
    %c0_11 = arith.constant 0 : index
    %8 = vector.load %arg2[%c0_8, %c0_9, %c1, %7, %c0_10, %c0_11] : memref<1x2x2x9x9x128xbf16, #tpu.memory_space<vmem>>, vector<1x1x1x8x8x128xbf16>
    %9 = vector.shape_cast %8 : vector<1x1x1x8x8x128xbf16> to vector<8x8x128xbf16>
    %c0_12 = arith.constant 0 : index
    %c0_13 = arith.constant 0 : index
    %c128 = arith.constant 128 : index
    %10 = vector.load %arg6[%c0_12, %c0_13, %c128] : memref<8x8x1152xbf16, #tpu.memory_space<vmem>>, vector<8x8x128xbf16>
    tpu.vector_store %arg6[%c0_12, %c0_13, %c128], %9 {strides = array<i32>} : memref<8x8x1152xbf16, #tpu.memory_space<vmem>>, vector<8x8x128xbf16>,
    %c0_i32_14 = arith.constant 0 : i32
    %11 = arith.addi %0, %c0_i32_14 : i32
    %c0_15 = arith.constant 0 : index
    %c0_16 = arith.constant 0 : index
    %c0_17 = arith.constant 0 : index
    %12 = arith.index_cast %11 : i32 to index
    %c1_18 = arith.constant 1 : index
    %c0_19 = arith.constant 0 : index
    %13 = vector.load %arg2[%c0_15, %c0_16, %c0_17, %12, %c1_18, %c0_19] : memref<1x2x2x9x9x128xbf16, #tpu.memory_space<vmem>>, vector<1x1x1x8x8x128xbf16>
    %14 = vector.shape_cast %13 : vector<1x1x1x8x8x128xbf16> to vector<8x8x128xbf16>
    %c0_20 = arith.constant 0 : index
    %c0_21 = arith.constant 0 : index
    %c256 = arith.constant 256 : index
    %15 = vector.load %arg6[%c0_20, %c0_21, %c256] : memref<8x8x1152xbf16, #tpu.memory_space<vmem>>, vector<8x8x128xbf16>
    tpu.vector_store %arg6[%c0_20, %c0_21, %c256], %14 {strides = array<i32>} : memref<8x8x1152xbf16, #tpu.memory_space<vmem>>, vector<8x8x128xbf16>,
    %c0_i32_22 = arith.constant 0 : i32
    %16 = arith.addi %0, %c0_i32_22 : i32
    %c0_23 = arith.constant 0 : index
    %c1_24 = arith.constant 1 : index
    %c0_25 = arith.constant 0 : index
    %17 = arith.index_cast %16 : i32 to index
    %c0_26 = arith.constant 0 : index
    %c0_27 = arith.constant 0 : index
    %18 = vector.load %arg2[%c0_23, %c1_24, %c0_25, %17, %c0_26, %c0_27] : memref<1x2x2x9x9x128xbf16, #tpu.memory_space<vmem>>, vector<1x1x1x8x8x128xbf16>
    %19 = vector.shape_cast %18 : vector<1x1x1x8x8x128xbf16> to vector<8x8x128xbf16>
    %c0_28 = arith.constant 0 : index
    %c0_29 = arith.constant 0 : index
    %c384 = arith.constant 384 : index
    %20 = vector.load %arg6[%c0_28, %c0_29, %c384] : memref<8x8x1152xbf16, #tpu.memory_space<vmem>>, vector<8x8x128xbf16>
    tpu.vector_store %arg6[%c0_28, %c0_29, %c384], %19 {strides = array<i32>} : memref<8x8x1152xbf16, #tpu.memory_space<vmem>>, vector<8x8x128xbf16>,
    %c0_i32_30 = arith.constant 0 : i32
    %21 = arith.addi %0, %c0_i32_30 : i32
    %c0_31 = arith.constant 0 : index
    %c1_32 = arith.constant 1 : index
    %c1_33 = arith.constant 1 : index
    %22 = arith.index_cast %21 : i32 to index
    %c0_34 = arith.constant 0 : index
    %c0_35 = arith.constant 0 : index
    %23 = vector.load %arg2[%c0_31, %c1_32, %c1_33, %22, %c0_34, %c0_35] : memref<1x2x2x9x9x128xbf16, #tpu.memory_space<vmem>>, vector<1x1x1x8x8x128xbf16>
    %24 = vector.shape_cast %23 : vector<1x1x1x8x8x128xbf16> to vector<8x8x128xbf16>
    %c0_36 = arith.constant 0 : index
    %c0_37 = arith.constant 0 : index
    %c512 = arith.constant 512 : index
    %25 = vector.load %arg6[%c0_36, %c0_37, %c512] : memref<8x8x1152xbf16, #tpu.memory_space<vmem>>, vector<8x8x128xbf16>
    tpu.vector_store %arg6[%c0_36, %c0_37, %c512], %24 {strides = array<i32>} : memref<8x8x1152xbf16, #tpu.memory_space<vmem>>, vector<8x8x128xbf16>,
    %c0_i32_38 = arith.constant 0 : i32
    %26 = arith.addi %0, %c0_i32_38 : i32
    %c0_39 = arith.constant 0 : index
    %c1_40 = arith.constant 1 : index
    %c0_41 = arith.constant 0 : index
    %27 = arith.index_cast %26 : i32 to index
    %c1_42 = arith.constant 1 : index
    %c0_43 = arith.constant 0 : index
    %28 = vector.load %arg2[%c0_39, %c1_40, %c0_41, %27, %c1_42, %c0_43] : memref<1x2x2x9x9x128xbf16, #tpu.memory_space<vmem>>, vector<1x1x1x8x8x128xbf16>
    %29 = vector.shape_cast %28 : vector<1x1x1x8x8x128xbf16> to vector<8x8x128xbf16>
    %c0_44 = arith.constant 0 : index
    %c0_45 = arith.constant 0 : index
    %c640 = arith.constant 640 : index
    %30 = vector.load %arg6[%c0_44, %c0_45, %c640] : memref<8x8x1152xbf16, #tpu.memory_space<vmem>>, vector<8x8x128xbf16>
    tpu.vector_store %arg6[%c0_44, %c0_45, %c640], %29 {strides = array<i32>} : memref<8x8x1152xbf16, #tpu.memory_space<vmem>>, vector<8x8x128xbf16>,
    %c1_i32 = arith.constant 1 : i32
    %31 = arith.addi %0, %c1_i32 : i32
    %c0_46 = arith.constant 0 : index
    %c0_47 = arith.constant 0 : index
    %c0_48 = arith.constant 0 : index
    %32 = arith.index_cast %31 : i32 to index
    %c0_49 = arith.constant 0 : index
    %c0_50 = arith.constant 0 : index
    %33 = vector.load %arg2[%c0_46, %c0_47, %c0_48, %32, %c0_49, %c0_50] : memref<1x2x2x9x9x128xbf16, #tpu.memory_space<vmem>>, vector<1x1x1x8x8x128xbf16>
    %34 = vector.shape_cast %33 : vector<1x1x1x8x8x128xbf16> to vector<8x8x128xbf16>
    %c0_51 = arith.constant 0 : index
    %c0_52 = arith.constant 0 : index
    %c768 = arith.constant 768 : index
    %35 = vector.load %arg6[%c0_51, %c0_52, %c768] : memref<8x8x1152xbf16, #tpu.memory_space<vmem>>, vector<8x8x128xbf16>
    tpu.vector_store %arg6[%c0_51, %c0_52, %c768], %34 {strides = array<i32>} : memref<8x8x1152xbf16, #tpu.memory_space<vmem>>, vector<8x8x128xbf16>,
    %c1_i32_53 = arith.constant 1 : i32
    %36 = arith.addi %0, %c1_i32_53 : i32
    %c0_54 = arith.constant 0 : index
    %c0_55 = arith.constant 0 : index
    %c1_56 = arith.constant 1 : index
    %37 = arith.index_cast %36 : i32 to index
    %c0_57 = arith.constant 0 : index
    %c0_58 = arith.constant 0 : index
    %38 = vector.load %arg2[%c0_54, %c0_55, %c1_56, %37, %c0_57, %c0_58] : memref<1x2x2x9x9x128xbf16, #tpu.memory_space<vmem>>, vector<1x1x1x8x8x128xbf16>
    %39 = vector.shape_cast %38 : vector<1x1x1x8x8x128xbf16> to vector<8x8x128xbf16>
    %c0_59 = arith.constant 0 : index
    %c0_60 = arith.constant 0 : index
    %c896 = arith.constant 896 : index
    %40 = vector.load %arg6[%c0_59, %c0_60, %c896] : memref<8x8x1152xbf16, #tpu.memory_space<vmem>>, vector<8x8x128xbf16>
    tpu.vector_store %arg6[%c0_59, %c0_60, %c896], %39 {strides = array<i32>} : memref<8x8x1152xbf16, #tpu.memory_space<vmem>>, vector<8x8x128xbf16>,
    %c1_i32_61 = arith.constant 1 : i32
    %41 = arith.addi %0, %c1_i32_61 : i32
    %c0_62 = arith.constant 0 : index
    %c0_63 = arith.constant 0 : index
    %c0_64 = arith.constant 0 : index
    %42 = arith.index_cast %41 : i32 to index
    %c1_65 = arith.constant 1 : index
    %c0_66 = arith.constant 0 : index
    %43 = vector.load %arg2[%c0_62, %c0_63, %c0_64, %42, %c1_65, %c0_66] : memref<1x2x2x9x9x128xbf16, #tpu.memory_space<vmem>>, vector<1x1x1x8x8x128xbf16>
    %44 = vector.shape_cast %43 : vector<1x1x1x8x8x128xbf16> to vector<8x8x128xbf16>
    %c0_67 = arith.constant 0 : index
    %c0_68 = arith.constant 0 : index
    %c1024 = arith.constant 1024 : index
    %45 = vector.load %arg6[%c0_67, %c0_68, %c1024] : memref<8x8x1152xbf16, #tpu.memory_space<vmem>>, vector<8x8x128xbf16>
    tpu.vector_store %arg6[%c0_67, %c0_68, %c1024], %44 {strides = array<i32>} : memref<8x8x1152xbf16, #tpu.memory_space<vmem>>, vector<8x8x128xbf16>,
    %c0_69 = arith.constant 0 : index
    %c0_70 = arith.constant 0 : index
    %c0_71 = arith.constant 0 : index
    %46 = vector.load %arg6[%c0_69, %c0_70, %c0_71] : memref<8x8x1152xbf16, #tpu.memory_space<vmem>>, vector<8x8x1152xbf16>
    %47 = vector.shape_cast %46 : vector<8x8x1152xbf16> to vector<64x1152xbf16>
    %c0_72 = arith.constant 0 : index
    %c0_73 = arith.constant 0 : index
    %48 = vector.load %arg3[%c0_72, %c0_73] : memref<1152x128xbf16, #tpu.memory_space<vmem>>, vector<1152x128xbf16>
    %cst = arith.constant dense<0.000000e+00> : vector<64x128xf32>
    %49 = tpu.matmul %47, %48, %cst {dimension_numbers = #tpu.dot_dimension_numbers<[1], [0], [0], [1], [0, 0, 1, 1], [], []>} : vector<64x1152xbf16>, vector<1152x128xbf16>, vector<64x128xf32> -> vector<64x128xf32>
    %c0_74 = arith.constant 0 : index
    %c0_75 = arith.constant 0 : index
    %50 = vector.load %arg4[%c0_74, %c0_75] : memref<1x128xf32, #tpu.memory_space<vmem>>, vector<1x128xf32>
    %51 = vector.broadcast %50 : vector<1x128xf32> to vector<64x128xf32>
    %52 = arith.addf %49, %51 : vector<64x128xf32>
    %cst_76 = arith.constant 0.000000e+00 : f32
    %53 = vector.broadcast %cst_76 : f32 to vector<64x128xf32>
    %54 = arith.maximumf %52, %53 : vector<64x128xf32>
    %55 = vector.shape_cast %54 : vector<64x128xf32> to vector<8x8x128xf32>
    %c0_77 = arith.constant 0 : index
    %c0_78 = arith.constant 0 : index
    %c0_79 = arith.constant 0 : index
    %c0_80 = arith.constant 0 : index
    %56 = vector.load %arg5[%c0_77, %c0_78, %c0_79, %c0_80] : memref<1x8x8x128xf32, #tpu.memory_space<vmem>>, vector<1x8x8x128xf32>
    %57 = vector.shape_cast %56 : vector<1x8x8x128xf32> to vector<8x8x128xf32>
    %58 = vector.shape_cast %55 : vector<8x8x128xf32> to vector<1x8x8x128xf32>
    tpu.vector_store %arg5[%c0_77, %c0_78, %c0_79, %c0_80], %58 {strides = array<i32>} : memref<1x8x8x128xf32, #tpu.memory_space<vmem>>, vector<1x8x8x128xf32>,
    return
  }
  func.func @transform_0(%arg0: i32, %arg1: i32) -> (i32, i32, i32, i32, i32, i32) {
    %c0_i32 = arith.constant 0 : i32
    %c0_i32_0 = arith.constant 0 : i32
    %c0_i32_1 = arith.constant 0 : i32
    %c0_i32_2 = arith.constant 0 : i32
    %c0_i32_3 = arith.constant 0 : i32
    %c0_i32_4 = arith.constant 0 : i32
    return %arg0, %c0_i32, %c0_i32_0, %c0_i32_1, %c0_i32_2, %c0_i32_3 : i32, i32, i32, i32, i32, i32
  }
  func.func @transform_1(%arg0: i32, %arg1: i32) -> (i32, i32) {
    %c0_i32 = arith.constant 0 : i32
    %c0_i32_0 = arith.constant 0 : i32
    %c0_i32_1 = arith.constant 0 : i32
    return %c0_i32, %c0_i32_0 : i32, i32
  }
  func.func @transform_2(%arg0: i32, %arg1: i32) -> (i32, i32) {
    %c0_i32 = arith.constant 0 : i32
    %c0_i32_0 = arith.constant 0 : i32
    %c0_i32_1 = arith.constant 0 : i32
    return %c0_i32, %c0_i32_0 : i32, i32
  }
  func.func @transform_3(%arg0: i32, %arg1: i32) -> (i32, i32, i32, i32) {
    %c0_i32 = arith.constant 0 : i32
    %c0_i32_0 = arith.constant 0 : i32
    %c0_i32_1 = arith.constant 0 : i32
    return %arg0, %arg1, %c0_i32, %c0_i32_0 : i32, i32, i32, i32
  }
}

module attributes {stable_mosaic.version = 11 : i64} {
  func.func @_upblock_kernel(%arg0: i32, %arg1: i32, %arg2: memref<1x2x2x9x9x128xbf16, #tpu.memory_space<vmem>>, %arg3: memref<1152x128xbf16, #tpu.memory_space<vmem>>, %arg4: memref<1x128xf32, #tpu.memory_space<vmem>>, %arg5: memref<1x8x8x128xf32, #tpu.memory_space<vmem>>, %arg6: memref<8x8x1152xbf16, #tpu.memory_space<vmem>>) attributes {dimension_semantics = [#tpu.dimension_semantics<parallel>, #tpu.dimension_semantics<parallel>], iteration_bounds = array<i64: 2, 1>, scalar_prefetch = 0 : i64, scratch_operands = 1 : i64, tpu.core_type = #tpu.core_type<tc>, window_params = [{transform_indices = @transform_0, window_bounds = array<i64: 1, 2, 2, 9, 9, 128>}, {pipeline_mode = #tpu.pipeline_mode<synchronous>, transform_indices = @transform_1, window_bounds = array<i64: 1152, 128>}, {pipeline_mode = #tpu.pipeline_mode<synchronous>, transform_indices = @transform_2, window_bounds = array<i64: 1, 128>}, {transform_indices = @transform_3, window_bounds = array<i64: 1, 8, 8, 128>}]} {
    %c8_i32 = arith.constant 8 : i32
    %0 = arith.muli %arg1, %c8_i32 : i32
    %c0_i32 = arith.constant 0 : i32
    %1 = arith.addi %0, %c0_i32 : i32
    %c0 = arith.constant 0 : index
    %c0_0 = arith.constant 0 : index
    %c0_1 = arith.constant 0 : index
    %2 = arith.index_cast %1 : i32 to index
    %c0_2 = arith.constant 0 : index
    %c0_3 = arith.constant 0 : index
    %3 = vector.load %arg2[%c0, %c0_0, %c0_1, %2, %c0_2, %c0_3] : memref<1x2x2x9x9x128xbf16, #tpu.memory_space<vmem>>, vector<1x1x1x8x8x128xbf16>
    %4 = vector.shape_cast %3 : vector<1x1x1x8x8x128xbf16> to vector<8x8x128xbf16>
    %c0_4 = arith.constant 0 : index
    %c0_5 = arith.constant 0 : index
    %c0_6 = arith.constant 0 : index
    %5 = vector.load %arg6[%c0_4, %c0_5, %c0_6] : memref<8x8x1152xbf16, #tpu.memory_space<vmem>>, vector<8x8x128xbf16>
    tpu.vector_store %arg6[%c0_4, %c0_5, %c0_6], %4 {strides = array<i32>} : memref<8x8x1152xbf16, #tpu.memory_space<vmem>>, vector<8x8x128xbf16>,
    %c0_i32_7 = arith.constant 0 : i32
    %6 = arith.addi %0, %c0_i32_7 : i32
    %c0_8 = arith.constant 0 : index
    %c0_9 = arith.constant 0 : index
    %c1 = arith.constant 1 : index
    %7 = arith.index_cast %6 : i32 to index
    %c0_10 = arith.constant 0 : index
    %c0_11 = arith.constant 0 : index
    %8 = vector.load %arg2[%c0_8, %c0_9, %c1, %7, %c0_10, %c0_11] : memref<1x2x2x9x9x128xbf16, #tpu.memory_space<vmem>>, vector<1x1x1x8x8x128xbf16>
    %9 = vector.shape_cast %8 : vector<1x1x1x8x8x128xbf16> to vector<8x8x128xbf16>
    %c0_12 = arith.constant 0 : index
    %c0_13 = arith.constant 0 : index
    %c128 = arith.constant 128 : index
    %10 = vector.load %arg6[%c0_12, %c0_13, %c128] : memref<8x8x1152xbf16, #tpu.memory_space<vmem>>, vector<8x8x128xbf16>
    tpu.vector_store %arg6[%c0_12, %c0_13, %c128], %9 {strides = array<i32>} : memref<8x8x1152xbf16, #tpu.memory_space<vmem>>, vector<8x8x128xbf16>,
    %c0_i32_14 = arith.constant 0 : i32
    %11 = arith.addi %0, %c0_i32_14 : i32
    %c0_15 = arith.constant 0 : index
    %c0_16 = arith.constant 0 : index
    %c0_17 = arith.constant 0 : index
    %12 = arith.index_cast %11 : i32 to index
    %c1_18 = arith.constant 1 : index
    %c0_19 = arith.constant 0 : index
    %13 = vector.load %arg2[%c0_15, %c0_16, %c0_17, %12, %c1_18, %c0_19] : memref<1x2x2x9x9x128xbf16, #tpu.memory_space<vmem>>, vector<1x1x1x8x8x128xbf16>
    %14 = vector.shape_cast %13 : vector<1x1x1x8x8x128xbf16> to vector<8x8x128xbf16>
    %c0_20 = arith.constant 0 : index
    %c0_21 = arith.constant 0 : index
    %c256 = arith.constant 256 : index
    %15 = vector.load %arg6[%c0_20, %c0_21, %c256] : memref<8x8x1152xbf16, #tpu.memory_space<vmem>>, vector<8x8x128xbf16>
    tpu.vector_store %arg6[%c0_20, %c0_21, %c256], %14 {strides = array<i32>} : memref<8x8x1152xbf16, #tpu.memory_space<vmem>>, vector<8x8x128xbf16>,
    %c0_i32_22 = arith.constant 0 : i32
    %16 = arith.addi %0, %c0_i32_22 : i32
    %c0_23 = arith.constant 0 : index
    %c1_24 = arith.constant 1 : index
    %c0_25 = arith.constant 0 : index
    %17 = arith.index_cast %16 : i32 to index
    %c0_26 = arith.constant 0 : index
    %c0_27 = arith.constant 0 : index
    %18 = vector.load %arg2[%c0_23, %c1_24, %c0_25, %17, %c0_26, %c0_27] : memref<1x2x2x9x9x128xbf16, #tpu.memory_space<vmem>>, vector<1x1x1x8x8x128xbf16>
    %19 = vector.shape_cast %18 : vector<1x1x1x8x8x128xbf16> to vector<8x8x128xbf16>
    %c0_28 = arith.constant 0 : index
    %c0_29 = arith.constant 0 : index
    %c384 = arith.constant 384 : index
    %20 = vector.load %arg6[%c0_28, %c0_29, %c384] : memref<8x8x1152xbf16, #tpu.memory_space<vmem>>, vector<8x8x128xbf16>
    tpu.vector_store %arg6[%c0_28, %c0_29, %c384], %19 {strides = array<i32>} : memref<8x8x1152xbf16, #tpu.memory_space<vmem>>, vector<8x8x128xbf16>,
    %c0_i32_30 = arith.constant 0 : i32
    %21 = arith.addi %0, %c0_i32_30 : i32
    %c0_31 = arith.constant 0 : index
    %c1_32 = arith.constant 1 : index
    %c1_33 = arith.constant 1 : index
    %22 = arith.index_cast %21 : i32 to index
    %c0_34 = arith.constant 0 : index
    %c0_35 = arith.constant 0 : index
    %23 = vector.load %arg2[%c0_31, %c1_32, %c1_33, %22, %c0_34, %c0_35] : memref<1x2x2x9x9x128xbf16, #tpu.memory_space<vmem>>, vector<1x1x1x8x8x128xbf16>
    %24 = vector.shape_cast %23 : vector<1x1x1x8x8x128xbf16> to vector<8x8x128xbf16>
    %c0_36 = arith.constant 0 : index
    %c0_37 = arith.constant 0 : index
    %c512 = arith.constant 512 : index
    %25 = vector.load %arg6[%c0_36, %c0_37, %c512] : memref<8x8x1152xbf16, #tpu.memory_space<vmem>>, vector<8x8x128xbf16>
    tpu.vector_store %arg6[%c0_36, %c0_37, %c512], %24 {strides = array<i32>} : memref<8x8x1152xbf16, #tpu.memory_space<vmem>>, vector<8x8x128xbf16>,
    %c0_i32_38 = arith.constant 0 : i32
    %26 = arith.addi %0, %c0_i32_38 : i32
    %c0_39 = arith.constant 0 : index
    %c1_40 = arith.constant 1 : index
    %c0_41 = arith.constant 0 : index
    %27 = arith.index_cast %26 : i32 to index
    %c1_42 = arith.constant 1 : index
    %c0_43 = arith.constant 0 : index
    %28 = vector.load %arg2[%c0_39, %c1_40, %c0_41, %27, %c1_42, %c0_43] : memref<1x2x2x9x9x128xbf16, #tpu.memory_space<vmem>>, vector<1x1x1x8x8x128xbf16>
    %29 = vector.shape_cast %28 : vector<1x1x1x8x8x128xbf16> to vector<8x8x128xbf16>
    %c0_44 = arith.constant 0 : index
    %c0_45 = arith.constant 0 : index
    %c640 = arith.constant 640 : index
    %30 = vector.load %arg6[%c0_44, %c0_45, %c640] : memref<8x8x1152xbf16, #tpu.memory_space<vmem>>, vector<8x8x128xbf16>
    tpu.vector_store %arg6[%c0_44, %c0_45, %c640], %29 {strides = array<i32>} : memref<8x8x1152xbf16, #tpu.memory_space<vmem>>, vector<8x8x128xbf16>,
    %c1_i32 = arith.constant 1 : i32
    %31 = arith.addi %0, %c1_i32 : i32
    %c0_46 = arith.constant 0 : index
    %c0_47 = arith.constant 0 : index
    %c0_48 = arith.constant 0 : index
    %32 = arith.index_cast %31 : i32 to index
    %c0_49 = arith.constant 0 : index
    %c0_50 = arith.constant 0 : index
    %33 = vector.load %arg2[%c0_46, %c0_47, %c0_48, %32, %c0_49, %c0_50] : memref<1x2x2x9x9x128xbf16, #tpu.memory_space<vmem>>, vector<1x1x1x8x8x128xbf16>
    %34 = vector.shape_cast %33 : vector<1x1x1x8x8x128xbf16> to vector<8x8x128xbf16>
    %c0_51 = arith.constant 0 : index
    %c0_52 = arith.constant 0 : index
    %c768 = arith.constant 768 : index
    %35 = vector.load %arg6[%c0_51, %c0_52, %c768] : memref<8x8x1152xbf16, #tpu.memory_space<vmem>>, vector<8x8x128xbf16>
    tpu.vector_store %arg6[%c0_51, %c0_52, %c768], %34 {strides = array<i32>} : memref<8x8x1152xbf16, #tpu.memory_space<vmem>>, vector<8x8x128xbf16>,
    %c1_i32_53 = arith.constant 1 : i32
    %36 = arith.addi %0, %c1_i32_53 : i32
    %c0_54 = arith.constant 0 : index
    %c0_55 = arith.constant 0 : index
    %c1_56 = arith.constant 1 : index
    %37 = arith.index_cast %36 : i32 to index
    %c0_57 = arith.constant 0 : index
    %c0_58 = arith.constant 0 : index
    %38 = vector.load %arg2[%c0_54, %c0_55, %c1_56, %37, %c0_57, %c0_58] : memref<1x2x2x9x9x128xbf16, #tpu.memory_space<vmem>>, vector<1x1x1x8x8x128xbf16>
    %39 = vector.shape_cast %38 : vector<1x1x1x8x8x128xbf16> to vector<8x8x128xbf16>
    %c0_59 = arith.constant 0 : index
    %c0_60 = arith.constant 0 : index
    %c896 = arith.constant 896 : index
    %40 = vector.load %arg6[%c0_59, %c0_60, %c896] : memref<8x8x1152xbf16, #tpu.memory_space<vmem>>, vector<8x8x128xbf16>
    tpu.vector_store %arg6[%c0_59, %c0_60, %c896], %39 {strides = array<i32>} : memref<8x8x1152xbf16, #tpu.memory_space<vmem>>, vector<8x8x128xbf16>,
    %c1_i32_61 = arith.constant 1 : i32
    %41 = arith.addi %0, %c1_i32_61 : i32
    %c0_62 = arith.constant 0 : index
    %c0_63 = arith.constant 0 : index
    %c0_64 = arith.constant 0 : index
    %42 = arith.index_cast %41 : i32 to index
    %c1_65 = arith.constant 1 : index
    %c0_66 = arith.constant 0 : index
    %43 = vector.load %arg2[%c0_62, %c0_63, %c0_64, %42, %c1_65, %c0_66] : memref<1x2x2x9x9x128xbf16, #tpu.memory_space<vmem>>, vector<1x1x1x8x8x128xbf16>
    %44 = vector.shape_cast %43 : vector<1x1x1x8x8x128xbf16> to vector<8x8x128xbf16>
    %c0_67 = arith.constant 0 : index
    %c0_68 = arith.constant 0 : index
    %c1024 = arith.constant 1024 : index
    %45 = vector.load %arg6[%c0_67, %c0_68, %c1024] : memref<8x8x1152xbf16, #tpu.memory_space<vmem>>, vector<8x8x128xbf16>
    tpu.vector_store %arg6[%c0_67, %c0_68, %c1024], %44 {strides = array<i32>} : memref<8x8x1152xbf16, #tpu.memory_space<vmem>>, vector<8x8x128xbf16>,
    %c0_69 = arith.constant 0 : index
    %c0_70 = arith.constant 0 : index
    %c0_71 = arith.constant 0 : index
    %46 = vector.load %arg6[%c0_69, %c0_70, %c0_71] : memref<8x8x1152xbf16, #tpu.memory_space<vmem>>, vector<8x8x1152xbf16>
    %47 = vector.shape_cast %46 : vector<8x8x1152xbf16> to vector<64x1152xbf16>
    %c0_72 = arith.constant 0 : index
    %c0_73 = arith.constant 0 : index
    %48 = vector.load %arg3[%c0_72, %c0_73] : memref<1152x128xbf16, #tpu.memory_space<vmem>>, vector<1152x128xbf16>
    %cst = arith.constant dense<0.000000e+00> : vector<64x128xf32>
    %49 = tpu.matmul %47, %48, %cst {dimension_numbers = #tpu.dot_dimension_numbers<[1], [0], [0], [1], [0, 0, 1, 1], [], []>} : vector<64x1152xbf16>, vector<1152x128xbf16>, vector<64x128xf32> -> vector<64x128xf32>
    %c0_74 = arith.constant 0 : index
    %c0_75 = arith.constant 0 : index
    %50 = vector.load %arg4[%c0_74, %c0_75] : memref<1x128xf32, #tpu.memory_space<vmem>>, vector<1x128xf32>
    %51 = vector.broadcast %50 : vector<1x128xf32> to vector<64x128xf32>
    %52 = arith.addf %49, %51 : vector<64x128xf32>
    %cst_76 = arith.constant 0.000000e+00 : f32
    %53 = vector.broadcast %cst_76 : f32 to vector<64x128xf32>
    %54 = arith.maximumf %52, %53 : vector<64x128xf32>
    %55 = vector.shape_cast %54 : vector<64x128xf32> to vector<8x8x128xf32>
    %c0_77 = arith.constant 0 : index
    %c0_78 = arith.constant 0 : index
    %c0_79 = arith.constant 0 : index
    %c0_80 = arith.constant 0 : index
    %56 = vector.load %arg5[%c0_77, %c0_78, %c0_79, %c0_80] : memref<1x8x8x128xf32, #tpu.memory_space<vmem>>, vector<1x8x8x128xf32>
    %57 = vector.shape_cast %56 : vector<1x8x8x128xf32> to vector<8x8x128xf32>
    %58 = vector.shape_cast %55 : vector<8x8x128xf32> to vector<1x8x8x128xf32>
    tpu.vector_store %arg5[%c0_77, %c0_78, %c0_79, %c0_80], %58 {strides = array<i32>} : memref<1x8x8x128xf32, #tpu.memory_space<vmem>>, vector<1x8x8x128xf32>,
    return
  }
  func.func @transform_0(%arg0: i32, %arg1: i32) -> (i32, i32, i32, i32, i32, i32) {
    %c0_i32 = arith.constant 0 : i32
    %c0_i32_0 = arith.constant 0 : i32
    %c0_i32_1 = arith.constant 0 : i32
    %c0_i32_2 = arith.constant 0 : i32
    %c0_i32_3 = arith.constant 0 : i32
    %c0_i32_4 = arith.constant 0 : i32
    return %arg0, %c0_i32, %c0_i32_0, %c0_i32_1, %c0_i32_2, %c0_i32_3 : i32, i32, i32, i32, i32, i32
  }
  func.func @transform_1(%arg0: i32, %arg1: i32) -> (i32, i32) {
    %c0_i32 = arith.constant 0 : i32
    %c0_i32_0 = arith.constant 0 : i32
    %c0_i32_1 = arith.constant 0 : i32
    return %c0_i32, %c0_i32_0 : i32, i32
  }
  func.func @transform_2(%arg0: i32, %arg1: i32) -> (i32, i32) {
    %c0_i32 = arith.constant 0 : i32
    %c0_i32_0 = arith.constant 0 : i32
    %c0_i32_1 = arith.constant 0 : i32
    return %c0_i32, %c0_i32_0 : i32, i32
  }
  func.func @transform_3(%arg0: i32, %arg1: i32) -> (i32, i32, i32, i32) {
    %c0_i32 = arith.constant 0 : i32
    %c0_i32_0 = arith.constant 0 : i32
    %c0_i32_1 = arith.constant 0 : i32
    return %arg0, %arg1, %c0_i32, %c0_i32_0 : i32, i32, i32, i32
  }
}

</mosaic_0001>

<bundles_post_ra>
// kernel: tpu_custom_call.1
= control target key start
LH: loop header
LB: loop body
LE: loop exit
PB: predicated region body
PF: predicated region fallthrough
CT: control target
= control target key end

     0   :  { %8 = vsyncpa [#allocation4], 0  ;;  %s3225_s0 = inlined_call_operand.vmem [shape: bf16[2,2,2,9,9,128], index: 0, kind: input, shape index: {}]   ;;  %s3226_s1 = inlined_call_operand.vmem [shape: bf16[1152,128], index: 1, kind: input, shape index: {}]   ;;  %s3227_s2 = inlined_call_operand.vmem [shape: f32[1,128], index: 2, kind: input, shape index: {}]   ;;  %s3228_s3 = inlined_call_operand.hbm [shape: f32[2,8,8,128], index: 3, kind: output, shape index: {}]  }
   0x1   :  { %10 = vsyncpa [#allocation4 + $0x1], 0  ;;  %s2681_s12 = smov 0   ;;  %s2683_s13 = smov 0  }
   0x2   :  { %s2685_s14 = smov 0   ;;  %s2687_s15 = smov 0  }
   0x3   :  { %s2689_s16 = smov 0   ;;  %s2691_s17 = smov 0  }
   0x4 LB: > { %s1996_s18 = sadd.s32 4294967295, %s2656_s17   ;;  %s1997_s19 = sadd.s32 4294967294, %s2656_s17   ;;  %s2656_s17 = sphi %s2691_s17, %s16_s17   ;;  %s2652_s16 = sphi %s2689_s16, %s3237_s16   ;;  %s2648_s15 = sphi %s2687_s15, %s3236_s15   ;;  %s2644_s14 = sphi %s2685_s14, %s3235_s14   ;;  %s2640_s13 = sphi %s2683_s13, %s3234_s13   ;;  %s2636_s12 = sphi %s2681_s12, %s3233_s12  }
   0x5   : > { %s28_s20 = sadd.s32 1, %s2652_s16  ;;  %s105_s21 = sadd.s32 1, %s2644_s14 }
   0x6   : > { %p30_p0 = scmp.ge.s32.totalorder %s28_s20, 2  ;;  %p115_p1 = scmp.ne.s32.totalorder %s2644_s14, %s2640_s13 }
   0x7   : > { %p116_p2 = scmp.eq.s32.totalorder %s1996_s18, 1  ;;  %p121_p3 = scmp.ne.s32.totalorder %s2640_s13, %s2636_s12 }
   0x8   : > { %s3239_s20 = smov (%p30_p0, %s28_s20), 0  ;;  %p122_p5 = scmp.eq.s32.totalorder %s1997_s19, 1 }
   0x9   : > { %p2721_p4 = por %p116_p2, %p115_p1  ;;  %s100_s23 = ssub.s32 %s2652_s16, %s3239_s20 }
   0xa   : > { %p2000_p6 = scmp.ge.s32.totalorder %s2656_s17, 1  ;;  %p103_p7 = scmp.eq.s32.totalorder %s100_s23, 0 }
   0xb   : > { %p2728_p8 = por %p122_p5, %p121_p3  ;;  %p154_p9 = scmp.lt.s32.totalorder %s2656_s17, 3 }
   0xc   : > { %s2734_s25 = scalar_select %p103_p7, %s2644_s14, %s105_s21  }
   0xd   : > { %p155_p10 = pnand %p2000_p6, %p154_p9 }
   0xe   : > { %v2460_v0 = vld [vmem:[%s3226_s1 + $0x40] sm:$0xff] (!%p155_p10)   ;;  %v2464_v4 = vld [vmem:[%s3226_s1 + $0x48] sm:$0xff] (!%p155_p10)   ;;  %v2468_v8 = vld [vmem:[%s3226_s1 + $0x50] sm:$0xff] (!%p155_p10)   ;;  %p178_p11 = scmp.lt.s32.totalorder (!%p155_p10), %s2648_s15, 1  ;;  %vm240_vm0 = vsmask.f32 (!%p155_p10), 3328 }
   0xf   : > { %158 = sbr.rel (%p155_p10) target bundleno = 379 (0x17b), region = 32  ;;  %v2461_v1 = vld [vmem:[%s3226_s1 + $0xc0] sm:$0xff] (!%p155_p10)   ;;  %2190 = vmatprep.subr.bf16.mxu0 (!%p155_p10), %v2460_v0  ;;  %v2465_v5 = vld [vmem:[%s3226_s1 + $0xc8] sm:$0xff] (!%p155_p10)   ;;  %v2469_v9 = vld [vmem:[%s3226_s1 + $0xd0] sm:$0xff] (!%p155_p10)   ;;  %vm241_vm1 = vsmask.f32 (!%p155_p10), 7440 }
  0x10   : > { %v2462_v2 = vld [vmem:[%s3226_s1] sm:$0xff] (!%p155_p10)   ;;  %2230 = vmatprep.subr.bf16.mxu1 (!%p155_p10), %v2461_v1  ;;  %v2466_v6 = vld [vmem:[%s3226_s1 + $0x8] sm:$0xff] (!%p155_p10)   ;;  %v2470_v10 = vld [vmem:[%s3226_s1 + $0x10] sm:$0xff] (!%p155_p10)   ;;  %s175_s28 = sand.u32 (!%p155_p10), 1, %s2640_s13   ;;  %s2189_s4 = sshll.u32 (!%p155_p10), %s2648_s15, 10 }
  0x11   : > { %v2463_v3 = vld [vmem:[%s3226_s1 + $0x80] sm:$0xff] (!%p155_p10)   ;;  %2191 = vmatpush3.bf16.msra.mxu0 (!%p155_p10), %v2462_v2  ;;  %v2467_v7 = vld [vmem:[%s3226_s1 + $0x88] sm:$0xff] (!%p155_p10)   ;;  %v2471_v11 = vld [vmem:[%s3226_s1 + $0x90] sm:$0xff] (!%p155_p10)   ;;  %s2001_s29 = sshll.u32 (!%p155_p10), %s175_s28, 6  ;;  %s3173_s8 = scalar_lea.hbm (!%p155_p10), %s3228_s3, %s2189_s4 }
  0x12   : > { %2231 = vmatpush3.bf16.msra.mxu1 (!%p155_p10), %v2463_v3  ;;  %2192 = vmatprep.subr.bf16.mxu0 (!%p155_p10), %v2464_v4  ;;  %v2472_v12 = vld [vmem:[%s3226_s1 + $0x58] sm:$0xff] (!%p155_p10)   ;;  %v2476_v16 = vld [vmem:[%s3226_s1 + $0x60] sm:$0xff] (!%p155_p10)   ;;  %v2480_v20 = vld [vmem:[%s3226_s1 + $0x68] sm:$0xff] (!%p155_p10)   ;;  %s2658_s10 = smov (!%p155_p10), [#allocation3]  }
  0x13   : > { %2232 = vmatprep.subr.bf16.mxu1 (!%p155_p10), %v2465_v5  ;;  %v2473_v13 = vld [vmem:[%s3226_s1 + $0xd8] sm:$0xff] (!%p155_p10)   ;;  %v2477_v17 = vld [vmem:[%s3226_s1 + $0xe0] sm:$0xff] (!%p155_p10)   ;;  %v2481_v21 = vld [vmem:[%s3226_s1 + $0xe8] sm:$0xff] (!%p155_p10)   ;;  %s2582_s18 = sshll.u32 (!%p155_p10), %s2658_s10, 4  ;;  %s2583_s18 = int_to_ptr.vmem [resolvable:$false] %s2582_s18 }
  0x14   : > { %v2474_v14 = vld [vmem:[%s3226_s1 + $0x18] sm:$0xff] (!%p155_p10)   ;;  %v2478_v18 = vld [vmem:[%s3226_s1 + $0x20] sm:$0xff] (!%p155_p10)   ;;  %v2482_v22 = vld [vmem:[%s3226_s1 + $0x28] sm:$0xff] (!%p155_p10)  }
  0x15   : > { %2193 = vmatpush3.bf16.msra.mxu0 (!%p155_p10), %v2466_v6  ;;  %v2475_v15 = vld [vmem:[%s3226_s1 + $0x98] sm:$0xff] (!%p155_p10)   ;;  %v2479_v19 = vld [vmem:[%s3226_s1 + $0xa0] sm:$0xff] (!%p155_p10)   ;;  %v2483_v23 = vld [vmem:[%s3226_s1 + $0xa8] sm:$0xff] (!%p155_p10)  }
  0x16   : > { %2233 = vmatpush3.bf16.msra.mxu1 %v2467_v7  ;;  %2194 = vmatprep.subr.bf16.mxu0 %v2468_v8  ;;  %s179_s11 = scalar_select %p178_p11, %s2648_s15, 1  ;;  %v2484_v24 = vld [vmem:[%s3226_s1 + $0x70] sm:$0xff]   ;;  %v2488_v28 = vld [vmem:[%s3226_s1 + $0x78] sm:$0xff]   ;;  %v2498_v43 = vld [vmem:[%s3226_s1 + $0x140] sm:$0xff]  }
  0x17   : > { %2234 = vmatprep.subr.bf16.mxu1 %v2469_v9  ;;  %v2485_v25 = vld [vmem:[%s3226_s1 + $0xf0] sm:$0xff]   ;;  %v2489_v29 = vld [vmem:[%s3226_s1 + $0xf8] sm:$0xff]   ;;  %v2499_v48 = vld [vmem:[%s3226_s1 + $0x1c0] sm:$0xff]   ;;  %s3179_s15 = scalar_lea.sflag [#allocation4], %s175_s28 }
  0x18   : > { %v2486_v26 = vld [vmem:[%s3226_s1 + $0x30] sm:$0xff]   ;;  %s2402_s30 = smul.u32 288, %s179_s11  ;;  %v2490_v30 = vld [vmem:[%s3226_s1 + $0x38] sm:$0xff]   ;;  %vm2857_vm2 = vmor %vm240_vm0, %vm241_vm1  ;;  %s2584_s11 = scalar_lea.vmem %s2583_s18, 2048 }
  0x19   : > { %2195 = vmatpush3.bf16.msra.mxu0 %v2470_v10  ;;  %v2487_v27 = vld [vmem:[%s3226_s1 + $0xb0] sm:$0xff]   ;;  %v2491_v31 = vld [vmem:[%s3226_s1 + $0xb8] sm:$0xff]   ;;  %v2500_v57 = vld [vmem:[%s3226_s1 + $0x100] sm:$0xff]  }
  0x1a   : > { %2235 = vmatpush3.bf16.msra.mxu1 %v2471_v11  ;;  %2196 = vmatprep.subr.bf16.mxu0 %v2472_v12  ;;  %s2834_s21 = scalar_lea.vmem %s3225_s0, %s2402_s30  ;;  %v2502_v0 = vld [vmem:[%s3226_s1 + $0x148] sm:$0xff]   ;;  %s177_s30 = scalar_lea.vmem [#allocation3], %s2001_s29 }
  0x1b   : > { %2236 = vmatprep.subr.bf16.mxu1 %v2473_v13  ;;  %v189_v32 = vld [vmem:[%s2834_s21] sm:$0xf]  ;;  %v190_v33 = vld [vmem:[%s2834_s21 + $0x8] sm:$0xf]  ;;  %v2004_v35 = vld [vmem:[%s2834_s21 + $0x50] sm:$0xf] }
  0x1c   : > { %v2003_v34 = vld [vmem:[%s2834_s21 + $0x48] sm:$0xf]  ;;  %197 = vst [vmem:[#allocation2] sm:$0xf] %v189_v32  ;;  %198 = vst [vmem:[#allocation2 + $0x24] sm:$0xf] %v190_v33 }
  0x1d   : > { %2197 = vmatpush3.bf16.msra.mxu0 %v2474_v14  ;;  %216 = vst [vmem:[#allocation2 + $0x4] sm:$0xf] %v2003_v34  ;;  %v224_v36 = vld [vmem:[%s2834_s21] sm:$0xf]  ;;  %v225_v37 = vld [vmem:[%s2834_s21 + $0x4] sm:$0x1] }
  0x1e   : > { %2237 = vmatpush3.bf16.msra.mxu1 %v2475_v15  ;;  %2198 = vmatprep.subr.bf16.mxu0 %v2476_v16  ;;  %217 = vst [vmem:[#allocation2 + $0x28] sm:$0xf] %v2004_v35  ;;  %v226_v38 = vld [vmem:[%s2834_s21 + $0x8] sm:$0xf]  ;;  %v227_v39 = vld [vmem:[%s2834_s21 + $0xc] sm:$0x1] }
  0x1f   : > { %2238 = vmatprep.subr.bf16.mxu1 %v2477_v17  ;;  %v244_v40 = vshrl.u32 %v224_v36, 16  ;;  %v247_v41 = vshll.u32 %v224_v36, 16  ;;  %v253_v42 = vshll.u32 %v225_v37, 16  ;;  %v258_v44 = vshrl.u32 %v226_v38, 16  ;;  %v2011_v47 = vld [vmem:[%s2834_s21 + $0x90] sm:$0xf] }
  0x20   : > { %v261_v45 = vshll.u32 %v226_v38, 16  ;;  %v267_v46 = vshll.u32 %v227_v39, 16  ;;  %v2012_v51 = vld [vmem:[%s2834_s21 + $0x98] sm:$0xf]  ;;  %382 = vst [vmem:[#allocation2 + $0xc] sm:$0xf] %v2011_v47 }
  0x21   : > { %2199 = vmatpush3.bf16.msra.mxu0 %v2478_v18  ;;  %v246_v49 = vrot.slane %v244_v40, 4  ;;  %v249_v50 = vrot.slane %v247_v41, 5  ;;  %v255_v53 = vrot.slane %v253_v42, 5  ;;  %v260_v54 = vrot.slane %v258_v44, 4  ;;  %383 = vst [vmem:[#allocation2 + $0x30] sm:$0xf] %v2012_v51 }
  0x22   : > { %2239 = vmatpush3.bf16.msra.mxu1 %v2479_v19  ;;  %2200 = vmatprep.subr.bf16.mxu0 %v2480_v20  ;;  %v263_v55 = vrot.slane %v261_v45, 5  ;;  %v269_v59 = vrot.slane %v267_v46, 5  ;;  %v2504_v3 = vld [vmem:[%s3226_s1 + $0x108] sm:$0xff]   ;;  %v191_v4 = vld [vmem:[%s2834_s21 + $0x10] sm:$0xf]  ;;  %v2501_v16 = vld [vmem:[%s3226_s1 + $0x180] sm:$0xff]  }
  0x23   : > { %2240 = vmatprep.subr.bf16.mxu1 %v2481_v21  ;;  %v250_v56 = vor.u32 %v249_v50, %v246_v49  ;;  %v2492_v60 = vld [vmem:[#allocation2] ss:$36 sps:$4 sm:$0xff]   ;;  %v192_v5 = vld [vmem:[%s2834_s21 + $0x18] sm:$0xf]  ;;  %199 = vst [vmem:[#allocation2 + $0x48] sm:$0xf] %v191_v4 }
  0x24   : > { %v264_v58 = vor.u32 %v263_v55, %v260_v54  ;;  %v2005_v6 = vld [vmem:[%s2834_s21 + $0x58] sm:$0xf]  ;;  %v2006_v7 = vld [vmem:[%s2834_s21 + $0x60] sm:$0xf]  ;;  %200 = vst [vmem:[#allocation2 + $0x6c] sm:$0xf] %v192_v5 }
  0x25   : > { %2201 = vmatpush3.bf16.msra.mxu0 %v2482_v22  ;;  %v2494_v61 = vld [vmem:[#allocation2 + $0x4] ss:$36 sps:$4 sm:$0xff]   ;;  %v251_v62 = vrot.slane %v250_v56, 4  ;;  %218 = vst [vmem:[#allocation2 + $0x4c] sm:$0xf] %v2005_v6  ;;  %v2513_v40 = vld [vmem:[%s3226_s1 + $0x110] sm:$0xff]  }
  0x26   : > { %2241 = vmatpush3.bf16.msra.mxu1 %v2483_v23  ;;  %2202 = vmatprep.subr.bf16.mxu0 %v2484_v24  ;;  %v265_v63 = vrot.slane %v264_v58, 4  ;;  %219 = vst [vmem:[#allocation2 + $0x70] sm:$0xf] %v2006_v7  ;;  %v228_v8 = vld [vmem:[%s2834_s21 + $0x10] sm:$0xf]  ;;  %v2503_v21 = vld [vmem:[%s3226_s1 + $0x1c8] sm:$0xff]  }
  0x27   : > { %2242 = vmatprep.subr.bf16.mxu1 %v2485_v25  ;;  %1575 = vmatprep.mubr.bf16.mxu0 %v2494_v61  ;;  %v256_v1 = vsel %vm2857_vm2, %v251_v62, %v255_v53  ;;  %v229_v9 = vld [vmem:[%s2834_s21 + $0x14] sm:$0x1]  ;;  %v230_v10 = vld [vmem:[%s2834_s21 + $0x18] sm:$0xf]  ;;  %v231_v11 = vld [vmem:[%s2834_s21 + $0x1c] sm:$0x1] }
  0x28   : > { %v270_v2 = vsel %vm2857_vm2, %v265_v63, %v269_v59  ;;  %363 = vst [vmem:[#allocation2 + $0x8] sm:$0xf] %v256_v1  ;;  %v272_v12 = vshrl.u32 %v228_v8, 16  ;;  %v275_v13 = vshll.u32 %v228_v8, 16  ;;  %v281_v14 = vshll.u32 %v229_v9, 16  ;;  %v2511_v25 = vld [vmem:[%s3226_s1 + $0x150] sm:$0xff]  }
  0x29   : > { %2203 = vmatpush3.bf16.msra.mxu0 %v2486_v26  ;;  %364 = vst [vmem:[#allocation2 + $0x2c] sm:$0xf] %v270_v2  ;;  %v286_v15 = vshrl.u32 %v230_v10, 16  ;;  %v289_v17 = vshll.u32 %v230_v10, 16  ;;  %v295_v18 = vshll.u32 %v231_v11, 16  ;;  %v2505_v32 = vld [vmem:[%s3226_s1 + $0x188] sm:$0xff]  }
  0x2a   : > { %2243 = vmatpush3.bf16.msra.mxu1 %v2487_v27  ;;  %2204 = vmatprep.subr.bf16.mxu0 %v2488_v28  ;;  %v2013_v19 = vld [vmem:[%s2834_s21 + $0xa0] sm:$0xf]  ;;  %v2014_v20 = vld [vmem:[%s2834_s21 + $0xa8] sm:$0xf]  ;;  %v274_v22 = vrot.slane %v272_v12, 4  ;;  %v277_v23 = vrot.slane %v275_v13, 5 }
  0x2b   : > { %2244 = vmatprep.subr.bf16.mxu1 %v2489_v29  ;;  %v288_v24 = vrot.slane %v286_v15, 4  ;;  %384 = vst [vmem:[#allocation2 + $0x54] sm:$0xf] %v2013_v19  ;;  %385 = vst [vmem:[#allocation2 + $0x78] sm:$0xf] %v2014_v20  ;;  %v291_v28 = vrot.slane %v289_v17, 5 }
  0x2c   : > { %v2497_v27 = vld [vmem:[#allocation2 + $0xc] ss:$36 sps:$4 sm:$0xff]   ;;  %v278_v29 = vor.u32 %v277_v23, %v274_v22  ;;  %v2515_v44 = vld [vmem:[%s3226_s1 + $0x158] sm:$0xff]   ;;  %v194_v50 = vld [vmem:[%s2834_s21 + $0x28] sm:$0xf]  ;;  %s1900_s5 = sshll.u32 %s177_s30, 4  ;;  %s3175_s5 = int_to_ptr.vmem [resolvable:$true] %s1900_s5 }
  0x2d   : > { %2205 = vmatpush3.bf16.msra.mxu0 %v2490_v30  ;;  %v283_v30 = vrot.slane %v281_v14, 5  ;;  %1640 = vmatprep.mubr.bf16.mxu1 %v2497_v27  ;;  %v292_v33 = vor.u32 %v291_v28, %v288_v24  ;;  %v746_v34 = vld [vmem:[#allocation2 + $0x48] sm:$0xff]  ;;  %v2512_v42 = vld [vmem:[%s3226_s1 + $0x1d0] sm:$0xff]   ;;  %v2517_v46 = vld [vmem:[%s3226_s1 + $0x118] sm:$0xff]   ;;  %202 = vst [vmem:[#allocation2 + $0xb4] sm:$0xf] %v194_v50  ;;  %p2585_p1 = scmp.lt.s32.totalorder %s3175_s5, %s2583_s18 }
  0x2e   : > { %2245 = vmatpush3.bf16.msra.mxu1 %v2491_v31  ;;  %2270 = vmatprep.subr.bf16.mxu0 %v2498_v43  ;;  %v297_v31 = vrot.slane %v295_v18, 5  ;;  %v751_v35 = vld [vmem:[#allocation2 + $0x6c] sm:$0xff]  ;;  %v279_v37 = vrot.slane %v278_v29, 4  ;;  %v2516_v47 = vld [vmem:[%s3226_s1 + $0x1d8] sm:$0xff]   ;;  %v2007_v51 = vld [vmem:[%s2834_s21 + $0x68] sm:$0xf] }
  0x2f   : > { %2310 = vmatprep.subr.bf16.mxu1 %v2499_v48  ;;  %v2506_v36 = vld [vmem:[#allocation2 + $0x4c] ss:$36 sps:$4 sm:$0xff]   ;;  %v293_v38 = vrot.slane %v292_v33, 4  ;;  %v2085_v39 = vcombine.low %v746_v34, %v751_v35  ;;  %v193_v48 = vld [vmem:[%s2834_s21 + $0x20] sm:$0xf]  ;;  %v2518_v49 = vld [vmem:[%s3226_s1 + $0x198] sm:$0xff]  }
  0x30   : > { %1576 = vmatmul.mubr.bf16.vlgmr.msra.gmra.mrb[0].mxu0 %v2492_v60  ;;  %v2495_v26 = vld [vmem:[#allocation2 + $0x8] ss:$36 sps:$4 sm:$0xff]   ;;  %v284_v41 = vsel %vm2857_vm2, %v279_v37, %v283_v30  ;;  %v2514_v45 = vld [vmem:[%s3226_s1 + $0x190] sm:$0xff]   ;;  %201 = vst [vmem:[#allocation2 + $0x90] sm:$0xf] %v193_v48  ;;  %v2524_v1 = vld [vmem:[%s3226_s1 + $0x160] sm:$0xff]  }
  0x31   : > { %2271 = vmatpush3.bf16.msra.mxu0 %v2500_v57  ;;  %1641 = vmatmul.mubr.bf16.vlgmr.msra.gmra.mrb[0].mxu1 %v2495_v26  ;;  %v298_v43 = vsel %vm2857_vm2, %v293_v38, %v297_v31  ;;  %365 = vst [vmem:[#allocation2 + $0x50] sm:$0xf] %v284_v41  ;;  %v2008_v53 = vld [vmem:[%s2834_s21 + $0x70] sm:$0xf]  ;;  %220 = vst [vmem:[#allocation2 + $0x94] sm:$0xf] %v2007_v51 }
  0x32   : > { %2272 = vmatprep.subr.bf16.mxu0 %v2502_v0  ;;  %2311 = vmatpush3.bf16.msra.mxu1 %v2501_v16  ;;  %366 = vst [vmem:[#allocation2 + $0x74] sm:$0xf] %v298_v43  ;;  %221 = vst [vmem:[#allocation2 + $0xb8] sm:$0xf] %v2008_v53  ;;  %v232_v54 = vld [vmem:[%s2834_s21 + $0x20] sm:$0xf] }
  0x33   : > { %2312 = vmatprep.subr.bf16.mxu1 %v2503_v21  ;;  %1583 = vmatprep.mubr.bf16.mxu0 %v2506_v36  ;;  %v233_v55 = vld [vmem:[%s2834_s21 + $0x24] sm:$0x1]  ;;  %v234_v56 = vld [vmem:[%s2834_s21 + $0x28] sm:$0xf]  ;;  %v235_v57 = vld [vmem:[%s2834_s21 + $0x2c] sm:$0x1] }
  0x34   : > { %v300_v58 = vshrl.u32 %v232_v54, 16  ;;  %v303_v59 = vshll.u32 %v232_v54, 16  ;;  %v309_v60 = vshll.u32 %v233_v55, 16  ;;  %v314_v61 = vshrl.u32 %v234_v56, 16  ;;  %v2015_v0 = vld [vmem:[%s2834_s21 + $0xb0] sm:$0xf] }
  0x35   : > { %2273 = vmatpush3.bf16.msra.mxu0 %v2504_v3  ;;  %v317_v62 = vshll.u32 %v234_v56, 16  ;;  %v323_v63 = vshll.u32 %v235_v57, 16  ;;  %v2508_v2 = vld [vmem:[#allocation2 + $0x54] ss:$36 sps:$4 sm:$0xff]   ;;  %386 = vst [vmem:[#allocation2 + $0x9c] sm:$0xf] %v2015_v0 }
  0x36   : > { %2274 = vmatprep.subr.bf16.mxu0 %v2511_v25  ;;  %2313 = vmatpush3.bf16.msra.mxu1 %v2505_v32  ;;  %v302_v4 = vrot.slane %v300_v58, 4  ;;  %v305_v5 = vrot.slane %v303_v59, 5  ;;  %v311_v6 = vrot.slane %v309_v60, 5  ;;  %v316_v7 = vrot.slane %v314_v61, 4  ;;  %v2016_v9 = vld [vmem:[%s2834_s21 + $0xb8] sm:$0xf] }
  0x37   : > { %2314 = vmatprep.subr.bf16.mxu1 %v2512_v42  ;;  %v319_v8 = vrot.slane %v317_v62, 5  ;;  %1648 = vmatprep.mubr.bf16.mxu1 %v2508_v2  ;;  %v325_v10 = vrot.slane %v323_v63, 5  ;;  %387 = vst [vmem:[#allocation2 + $0xc0] sm:$0xf] %v2016_v9  ;;  %v2525_v11 = vld [vmem:[%s3226_s1 + $0x1e0] sm:$0xff]   ;;  %v2528_v24 = vld [vmem:[%s3226_s1 + $0x168] sm:$0xff]  }
  0x38   : > { %1584 = vmatmul.mubr.bf16.gmra.mrb[4].mxu0 %v2085_v39  ;;  %v306_v12 = vor.u32 %v305_v5, %v302_v4  ;;  %v756_v14 = vld [vmem:[#allocation2 + $0x90] sm:$0xff]  ;;  %v2526_v20 = vld [vmem:[%s3226_s1 + $0x120] sm:$0xff]   ;;  %v2529_v25 = vld [vmem:[%s3226_s1 + $0x1e8] sm:$0xff]   ;;  %s2578_s9 = scalar_lea.vmem %s3175_s5, 1024 }
  0x39   : > { %2275 = vmatpush3.bf16.msra.mxu0 %v2513_v40  ;;  %v2510_v3 = vld [vmem:[#allocation2 + $0x50] ss:$36 sps:$4 sm:$0xff]   ;;  %v320_v13 = vor.u32 %v319_v8, %v316_v7  ;;  %v2527_v21 = vld [vmem:[%s3226_s1 + $0x1a0] sm:$0xff]   ;;  %v2530_v26 = vld [vmem:[%s3226_s1 + $0x128] sm:$0xff]   ;;  %p2579_p12 = scmp.ne.s32.totalorder %s3175_s5, %s2578_s9  ;;  %p2586_p2 = scmp.lt.s32.totalorder %s2584_s11, %s2578_s9 }
  0x3a   : > { %2276 = vmatprep.subr.bf16.mxu0 %v2515_v44  ;;  %2315 = vmatpush3.bf16.msra.mxu1 %v2514_v45  ;;  %v761_v15 = vld [vmem:[#allocation2 + $0xb4] sm:$0xff]  ;;  %v307_v17 = vrot.slane %v306_v12, 4  ;;  %v2531_v27 = vld [vmem:[%s3226_s1 + $0x1a8] sm:$0xff]   ;;  %v195_v28 = vld [vmem:[%s2834_s21 + $0x30] sm:$0xf] }
  0x3b   : > { %2316 = vmatprep.subr.bf16.mxu1 %v2516_v47  ;;  %1649 = vmatmul.mubr.bf16.gmra.mrb[4].mxu1 %v2510_v3  ;;  %v2519_v16 = vld [vmem:[#allocation2 + $0x94] ss:$36 sps:$4 sm:$0xff]   ;;  %v321_v18 = vrot.slane %v320_v13, 4  ;;  %v2094_v19 = vcombine.low %v756_v14, %v761_v15  ;;  %203 = vst [vmem:[#allocation2 + $0xd8] sm:$0xf] %v195_v28  ;;  %p2580_p13 = pnand %p2579_p12, %p2721_p4  ;;  %p2587_p3 = por %p2586_p2, %p2585_p1 }
  0x3c   : > { %1591 = vmatprep.mubr.bf16.mxu0 %v2519_v16  ;;  %v312_v22 = vsel %vm2857_vm2, %v307_v17, %v311_v6  ;;  %v196_v29 = vld [vmem:[%s2834_s21 + $0x38] sm:$0xf]  ;;  %v2010_v31 = vld [vmem:[%s2834_s21 + $0x80] sm:$0xf]  ;;  %v236_v32 = vld [vmem:[%s2834_s21 + $0x30] sm:$0xf] }
  0x3d   : > { %2277 = vmatpush3.bf16.msra.mxu0 %v2517_v46  ;;  %v326_v23 = vsel %vm2857_vm2, %v321_v18, %v325_v10  ;;  %367 = vst [vmem:[#allocation2 + $0x98] sm:$0xf] %v312_v22  ;;  %v2009_v30 = vld [vmem:[%s2834_s21 + $0x78] sm:$0xf]  ;;  %204 = vst [vmem:[#allocation2 + $0xfc] sm:$0xf] %v196_v29  ;;  %p2581_p0 = pneg %p2580_p13 }
  0x3e   : > { %2278 = vmatprep.subr.bf16.mxu0 %v2524_v1  ;;  %2317 = vmatpush3.bf16.msra.mxu1 %v2518_v49  ;;  %368 = vst [vmem:[#allocation2 + $0xbc] sm:$0xf] %v326_v23  ;;  %222 = vst [vmem:[#allocation2 + $0xdc] sm:$0xf] %v2009_v30  ;;  %v237_v33 = vld [vmem:[%s2834_s21 + $0x34] sm:$0x1] }
  0x3f   : > { %2318 = vmatprep.subr.bf16.mxu1 %v2525_v11  ;;  %223 = vst [vmem:[#allocation2 + $0x100] sm:$0xf] %v2010_v31  ;;  %v238_v34 = vld [vmem:[%s2834_s21 + $0x38] sm:$0xf]  ;;  %v239_v35 = vld [vmem:[%s2834_s21 + $0x3c] sm:$0x1]  ;;  %p2588_p5 = pnand %p2587_p3, %p2581_p0 }
  0x40   : > { %1592 = vmatmul.mubr.bf16.gmra.mrb[8].mxu0 %v2094_v19  ;;  %v328_v36 = vshrl.u32 %v236_v32, 16  ;;  %v331_v37 = vshll.u32 %v236_v32, 16  ;;  %v337_v38 = vshll.u32 %v237_v33, 16  ;;  %v342_v39 = vshrl.u32 %v238_v34, 16  ;;  %v2017_v42 = vld [vmem:[%s2834_s21 + $0xc0] sm:$0xf] }
  0x41   : > { %2279 = vmatpush3.bf16.msra.mxu0 %v2526_v20  ;;  %v345_v40 = vshll.u32 %v238_v34, 16  ;;  %v351_v41 = vshll.u32 %v239_v35, 16  ;;  %v2018_v43 = vld [vmem:[%s2834_s21 + $0xc8] sm:$0xf]  ;;  %v2521_v44 = vld [vmem:[#allocation2 + $0x9c] ss:$36 sps:$4 sm:$0xff]  }
  0x42   : > { %2319 = vmatpush3.bf16.msra.mxu1 %v2527_v21  ;;  %2280 = vmatprep.subr.bf16.mxu0 %v2528_v24  ;;  %v330_v45 = vrot.slane %v328_v36, 4  ;;  %v333_v46 = vrot.slane %v331_v37, 5  ;;  %388 = vst [vmem:[#allocation2 + $0xe4] sm:$0xf] %v2017_v42  ;;  %389 = vst [vmem:[#allocation2 + $0x108] sm:$0xf] %v2018_v43 }
  0x43   : > { %2320 = vmatprep.subr.bf16.mxu1 %v2529_v25  ;;  %v344_v48 = vrot.slane %v342_v39, 4  ;;  %v347_v49 = vrot.slane %v345_v40, 5  ;;  %1656 = vmatprep.mubr.bf16.mxu1 %v2521_v44  ;;  %v339_v51 = vrot.slane %v337_v38, 5  ;;  %v2537_v53 = vld [vmem:[%s3226_s1 + $0x170] sm:$0xff]   ;;  %v353_v55 = vrot.slane %v351_v41, 5  ;;  %v2541_v3 = vld [vmem:[%s3226_s1 + $0x178] sm:$0xff]  }
  0x44   : > { %v334_v50 = vor.u32 %v333_v46, %v330_v45  ;;  %v2538_v56 = vld [vmem:[%s3226_s1 + $0x1f0] sm:$0xff]   ;;  %v2542_v4 = vld [vmem:[%s3226_s1 + $0x1f8] sm:$0xff]   ;;  %v2020_v8 = vld [vmem:[%s2834_s21 + $0xe0] sm:$0xf] }
  0x45   : > { %2281 = vmatpush3.bf16.msra.mxu0 %v2530_v26  ;;  %v2523_v47 = vld [vmem:[#allocation2 + $0x98] ss:$36 sps:$4 sm:$0xff]   ;;  %v348_v54 = vor.u32 %v347_v49, %v344_v48  ;;  %v2539_v63 = vld [vmem:[%s3226_s1 + $0x130] sm:$0xff]   ;;  %402 = vst [vmem:[#allocation2 + $0x34] sm:$0xf] %v2020_v8  ;;  %v3008_v21 = vld [vmem:[%s3226_s1 + $0x200] sm:$0xff]  }
  0x46   : > { %2321 = vmatpush3.bf16.msra.mxu1 %v2531_v27  ;;  %v766_v57 = vld [vmem:[#allocation2 + $0xd8] sm:$0xff]  ;;  %v335_v60 = vrot.slane %v334_v50, 4  ;;  %2282 = vmatprep.subr.bf16.mxu0 %v2537_v53  ;;  %v2540_v1 = vld [vmem:[%s3226_s1 + $0x1b0] sm:$0xff]   ;;  %v2043_v17 = vld [vmem:[%s2834_s21 + $0x8] sm:$0xf] }
  0x47   : > { %1657 = vmatmul.mubr.bf16.gmra.mrb[8].mxu1 %v2523_v47  ;;  %v771_v58 = vld [vmem:[#allocation2 + $0xfc] sm:$0xff]  ;;  %v349_v61 = vrot.slane %v348_v54, 4  ;;  %2322 = vmatprep.subr.bf16.mxu1 %v2538_v56  ;;  %v2019_v7 = vld [vmem:[%s2834_s21 + $0xd8] sm:$0xf]  ;;  %v2027_v9 = vld [vmem:[%s2834_s21 + $0x90] sm:$0xf] }
  0x48   : > { %v2532_v59 = vld [vmem:[#allocation2 + $0xdc] ss:$36 sps:$4 sm:$0xff]   ;;  %v2103_v62 = vcombine.low %v766_v57, %v771_v58  ;;  %v340_v0 = vsel %vm2857_vm2, %v335_v60, %v339_v51  ;;  %401 = vst [vmem:[#allocation2 + $0x10] sm:$0xf] %v2019_v7  ;;  %v2028_v10 = vld [vmem:[%s2834_s21 + $0x94] sm:$0x1] }
  0x49   : > { %1599 = vmatprep.mubr.bf16.mxu0 %v2532_v59  ;;  %v354_v2 = vsel %vm2857_vm2, %v349_v61, %v353_v55  ;;  %369 = vst [vmem:[#allocation2 + $0xe0] sm:$0xf] %v340_v0  ;;  %2283 = vmatpush3.bf16.msra.mxu0 %v2539_v63  ;;  %v2543_v5 = vld [vmem:[%s3226_s1 + $0x138] sm:$0xff]   ;;  %v426_v13 = vshrl.u32 %v2027_v9, 16  ;;  %v429_v14 = vshll.u32 %v2027_v9, 16  ;;  %v435_v15 = vshll.u32 %v2028_v10, 16 }
  0x4a   : > { %1600 = vmatmul.mubr.bf16.gmra.mrb[12].mxu0 %v2103_v62  ;;  %370 = vst [vmem:[#allocation2 + $0x104] sm:$0xf] %v354_v2  ;;  %2323 = vmatpush3.bf16.msra.mxu1 %v2540_v1  ;;  %v2544_v6 = vld [vmem:[%s3226_s1 + $0x1b8] sm:$0xff]   ;;  %v2044_v20 = vld [vmem:[%s2834_s21 + $0x10] sm:$0xf]  ;;  %v3030_v57 = vld [vmem:[%s3226_s1 + $0x208] sm:$0xff]  }
  0x4b   : > { %2284 = vmatprep.subr.bf16.mxu0 %v2541_v3  ;;  %2324 = vmatprep.subr.bf16.mxu1 %v2542_v4  ;;  %v2029_v11 = vld [vmem:[%s2834_s21 + $0x98] sm:$0xf]  ;;  %v2030_v12 = vld [vmem:[%s2834_s21 + $0x9c] sm:$0x1]  ;;  %565 = vst [vmem:[#allocation2 + $0x18] sm:$0xf] %v2043_v17 }
  0x4c   : > { %v440_v16 = vshrl.u32 %v2029_v11, 16  ;;  %v443_v18 = vshll.u32 %v2029_v11, 16  ;;  %v449_v19 = vshll.u32 %v2030_v12, 16  ;;  %v2534_v22 = vld [vmem:[#allocation2 + $0xe4] ss:$36 sps:$4 sm:$0xff]   ;;  %v428_v24 = vrot.slane %v426_v13, 4 }
  0x4d   : > { %2285 = vmatpush3.bf16.msra.mxu0 %v2543_v5  ;;  %566 = vst [vmem:[#allocation2 + $0x3c] sm:$0xf] %v2044_v20  ;;  %v431_v25 = vrot.slane %v429_v14, 5  ;;  %v2051_v28 = vld [vmem:[%s2834_s21 + $0x50] sm:$0xf]  ;;  %1664 = vmatprep.mubr.bf16.mxu1 %v2534_v22  ;;  %v437_v29 = vrot.slane %v435_v15, 5 }
  0x4e   : > { %2325 = vmatpush3.bf16.msra.mxu1 %v2544_v6  ;;  %v442_v26 = vrot.slane %v440_v16, 4  ;;  %v445_v27 = vrot.slane %v443_v18, 5  ;;  %2362 = vmatprep.subr.bf16.mxu0 %v3008_v21  ;;  %v451_v30 = vrot.slane %v449_v19, 5  ;;  %v2052_v31 = vld [vmem:[%s2834_s21 + $0x58] sm:$0xf]  ;;  %v3042_v8 = vld [vmem:[%s3226_s1 + $0x210] sm:$0xff]  }
  0x4f   : > { %2386 = vmatprep.subr.bf16.mxu1 %v3008_v21  ;;  %584 = vst [vmem:[#allocation2 + $0x1c] sm:$0xf] %v2051_v28  ;;  %v432_v32 = vor.u32 %v431_v25, %v428_v24  ;;  %585 = vst [vmem:[#allocation2 + $0x40] sm:$0xf] %v2052_v31  ;;  %v2021_v34 = vld [vmem:[%s2834_s21 + $0xe8] sm:$0xf] }
  0x50   : > { %v446_v33 = vor.u32 %v445_v27, %v442_v26  ;;  %v2022_v35 = vld [vmem:[%s2834_s21 + $0xf0] sm:$0xf]  ;;  %v2031_v36 = vld [vmem:[%s2834_s21 + $0xa0] sm:$0xf]  ;;  %403 = vst [vmem:[#allocation2 + $0x58] sm:$0xf] %v2021_v34 }
  0x51   : > { %v2536_v23 = vld [vmem:[#allocation2 + $0xe0] ss:$36 sps:$4 sm:$0xff]   ;;  %v433_v37 = vrot.slane %v432_v32, 4  ;;  %404 = vst [vmem:[#allocation2 + $0x7c] sm:$0xf] %v2022_v35  ;;  %v454_v42 = vshrl.u32 %v2031_v36, 16 }
  0x52   : > { %1665 = vmatmul.mubr.bf16.gmra.mrb[12].mxu1 %v2536_v23  ;;  %v447_v38 = vrot.slane %v446_v33, 4  ;;  %v2032_v39 = vld [vmem:[%s2834_s21 + $0xa4] sm:$0x1]  ;;  %v2033_v40 = vld [vmem:[%s2834_s21 + $0xa8] sm:$0xf]  ;;  %v457_v43 = vshll.u32 %v2031_v36, 16 }
  0x53   : > { %v2034_v41 = vld [vmem:[%s2834_s21 + $0xac] sm:$0x1]  ;;  %v463_v44 = vshll.u32 %v2032_v39, 16  ;;  %v468_v45 = vshrl.u32 %v2033_v40, 16  ;;  %v438_v46 = vsel %vm2857_vm2, %v433_v37, %v437_v29  ;;  %v471_v48 = vshll.u32 %v2033_v40, 16  ;;  %v3054_v24 = vld [vmem:[%s3226_s1 + $0x218] sm:$0xff]  }
  0x54   : > { %v452_v47 = vsel %vm2857_vm2, %v447_v38, %v451_v30  ;;  %v477_v49 = vshll.u32 %v2034_v41, 16  ;;  %v2045_v50 = vld [vmem:[%s2834_s21 + $0x18] sm:$0xf]  ;;  %v2046_v51 = vld [vmem:[%s2834_s21 + $0x20] sm:$0xf]  ;;  %v456_v53 = vrot.slane %v454_v42, 4 }
  0x55   : > { %545 = vst [vmem:[#allocation2 + $0x14] sm:$0xf] %v438_v46  ;;  %546 = vst [vmem:[#allocation2 + $0x38] sm:$0xf] %v452_v47  ;;  %v459_v54 = vrot.slane %v457_v43, 5  ;;  %v470_v55 = vrot.slane %v468_v45, 4 }
  0x56   : > { %567 = vst [vmem:[#allocation2 + $0x60] sm:$0xf] %v2045_v50  ;;  %568 = vst [vmem:[#allocation2 + $0x84] sm:$0xf] %v2046_v51  ;;  %v2053_v56 = vld [vmem:[%s2834_s21 + $0x60] sm:$0xf] }
  0x57   : > { %v465_v58 = vrot.slane %v463_v44, 5  ;;  %v473_v59 = vrot.slane %v471_v48, 5  ;;  %v2054_v60 = vld [vmem:[%s2834_s21 + $0x68] sm:$0xf]  ;;  %586 = vst [vmem:[#allocation2 + $0x64] sm:$0xf] %v2053_v56  ;;  %v460_v63 = vor.u32 %v459_v54, %v456_v53 }
  0x58   : > { %v2548_v61 = vld [vmem:[#allocation2 + $0x18] ss:$36 sps:$4 sm:$0xff]   ;;  %v479_v0 = vrot.slane %v477_v49, 5  ;;  %587 = vst [vmem:[#allocation2 + $0x88] sm:$0xf] %v2054_v60  ;;  %v3067_v39 = vld [vmem:[%s3226_s1 + $0x220] sm:$0xff]  }
  0x59   : > { %v2550_v62 = vld [vmem:[#allocation2 + $0x1c] ss:$36 sps:$4 sm:$0xff]   ;;  %v474_v1 = vor.u32 %v473_v59, %v470_v55  ;;  %v461_v2 = vrot.slane %v460_v63, 4  ;;  %v2023_v3 = vld [vmem:[%s2834_s21 + $0xf8] sm:$0xf]  ;;  %v3089_v60 = vld [vmem:[%s3226_s1 + $0x228] sm:$0xff]  }
  0x5a   : > { %1770 = vmatprep.mubr.bf16.mxu1 %v2550_v62  ;;  %v2024_v5 = vld [vmem:[%s2834_s21 + $0x100] sm:$0xf]  ;;  %405 = vst [vmem:[#allocation2 + $0xa0] sm:$0xf] %v2023_v3  ;;  %v2035_v6 = vld [vmem:[%s2834_s21 + $0xb0] sm:$0xf] }
  0x5b   : > { %1771 = vmatmul.mubr.bf16.vlgmr.msra.gmra.mrb[16].mxu1 %v2548_v61  ;;  %v475_v4 = vrot.slane %v474_v1, 4  ;;  %v466_v7 = vsel %vm2857_vm2, %v461_v2, %v465_v58  ;;  %406 = vst [vmem:[#allocation2 + $0xc4] sm:$0xf] %v2024_v5  ;;  %v2036_v9 = vld [vmem:[%s2834_s21 + $0xb4] sm:$0x1]  ;;  %v482_v14 = vshrl.u32 %v2035_v6, 16 }
  0x5c   : > { %2394 = vmatpush3.bf16.msra.mxu1 %v3008_v21  ;;  %v2037_v10 = vld [vmem:[%s2834_s21 + $0xb8] sm:$0xf]  ;;  %v2038_v11 = vld [vmem:[%s2834_s21 + $0xbc] sm:$0x1]  ;;  %v2545_v12 = vld [vmem:[#allocation2 + $0x10] ss:$36 sps:$4 sm:$0xff]  }
  0x5d   : > { %2387 = vmatprep.subr.bf16.mxu1 %v3030_v57  ;;  %v480_v13 = vsel %vm2857_vm2, %v475_v4, %v479_v0  ;;  %547 = vst [vmem:[#allocation2 + $0x5c] sm:$0xf] %v466_v7  ;;  %v485_v15 = vshll.u32 %v2035_v6, 16  ;;  %v2547_v16 = vld [vmem:[#allocation2 + $0x14] ss:$36 sps:$4 sm:$0xff]   ;;  %v491_v17 = vshll.u32 %v2036_v9, 16 }
  0x5e   : > { %548 = vst [vmem:[#allocation2 + $0x80] sm:$0xf] %v480_v13  ;;  %v496_v18 = vshrl.u32 %v2037_v10, 16  ;;  %v499_v19 = vshll.u32 %v2037_v10, 16  ;;  %v2557_v22 = vld [vmem:[#allocation2 + $0x60] ss:$36 sps:$4 sm:$0xff]   ;;  %1705 = vmatprep.mubr.bf16.mxu0 %v2547_v16 }
  0x5f   : > { %v2555_v20 = vld [vmem:[#allocation2 + $0x64] ss:$36 sps:$4 sm:$0xff]   ;;  %v484_v23 = vrot.slane %v482_v14, 4  ;;  %v487_v25 = vrot.slane %v485_v15, 5  ;;  %1706 = vmatmul.mubr.bf16.vlgmr.msra.gmra.mrb[16].mxu0 %v2545_v12  ;;  %v493_v29 = vrot.slane %v491_v17, 5  ;;  %v505_v30 = vshll.u32 %v2038_v11, 16 }
  0x60   : > { %2395 = vmatpush3.bf16.msra.mxu1 %v3030_v57  ;;  %v498_v26 = vrot.slane %v496_v18, 4  ;;  %v501_v27 = vrot.slane %v499_v19, 5  ;;  %v2047_v28 = vld [vmem:[%s2834_s21 + $0x28] sm:$0xf]  ;;  %1778 = vmatprep.mubr.bf16.mxu1 %v2555_v20  ;;  %v2048_v31 = vld [vmem:[%s2834_s21 + $0x30] sm:$0xf] }
  0x61   : > { %569 = vst [vmem:[#allocation2 + $0xa8] sm:$0xf] %v2047_v28  ;;  %v2055_v32 = vld [vmem:[%s2834_s21 + $0x70] sm:$0xf]  ;;  %2363 = vmatpush3.bf16.msra.mxu0 %v3008_v21  ;;  %2388 = vmatprep.subr.bf16.mxu1 %v3042_v8  ;;  %v488_v33 = vor.u32 %v487_v25, %v484_v23  ;;  %570 = vst [vmem:[#allocation2 + $0xcc] sm:$0xf] %v2048_v31 }
  0x62   : > { %v502_v34 = vor.u32 %v501_v27, %v498_v26  ;;  %v2056_v35 = vld [vmem:[%s2834_s21 + $0x78] sm:$0xf]  ;;  %588 = vst [vmem:[#allocation2 + $0xac] sm:$0xf] %v2055_v32  ;;  %2364 = vmatprep.subr.bf16.mxu0 %v3030_v57  ;;  %v507_v36 = vrot.slane %v505_v30, 5  ;;  %v3100_v10 = vld [vmem:[%s3226_s1 + $0x230] sm:$0xff]  }
  0x63   : > { %1779 = vmatmul.mubr.bf16.gmra.mrb[20].mxu1 %v2557_v22  ;;  %589 = vst [vmem:[#allocation2 + $0xd0] sm:$0xf] %v2056_v35  ;;  %v489_v21 = vrot.slane %v488_v33, 4  ;;  %v2025_v40 = vld [vmem:[%s2834_s21 + $0x108] sm:$0xf] }
  0x64   : > { %v748_v37 = vld [vmem:[#allocation2 + $0x58] sm:$0xff]  ;;  %2396 = vmatpush3.bf16.msra.mxu1 %v3042_v8  ;;  %v503_v38 = vrot.slane %v502_v34, 4  ;;  %v2026_v43 = vld [vmem:[%s2834_s21 + $0x110] sm:$0xf]  ;;  %407 = vst [vmem:[#allocation2 + $0xe8] sm:$0xf] %v2025_v40 }
  0x65   : > { %v753_v41 = vld [vmem:[#allocation2 + $0x7c] sm:$0xff]  ;;  %2389 = vmatprep.subr.bf16.mxu1 %v3054_v24  ;;  %2365 = vmatpush3.bf16.msra.mxu0 %v3030_v57  ;;  %v494_v45 = vsel %vm2857_vm2, %v489_v21, %v493_v29  ;;  %408 = vst [vmem:[#allocation2 + $0x10c] sm:$0xf] %v2026_v43  ;;  %v2040_v48 = vld [vmem:[%s2834_s21 + $0xc4] sm:$0x1] }
  0x66   : > { %v2553_v42 = vld [vmem:[#allocation2 + $0x5c] ss:$36 sps:$4 sm:$0xff]   ;;  %v2089_v44 = vcombine.low %v748_v37, %v753_v41  ;;  %v508_v46 = vsel %vm2857_vm2, %v503_v38, %v507_v36  ;;  %v2041_v49 = vld [vmem:[%s2834_s21 + $0xc8] sm:$0xf]  ;;  %2366 = vmatprep.subr.bf16.mxu0 %v3042_v8  ;;  %549 = vst [vmem:[#allocation2 + $0xa4] sm:$0xf] %v494_v45 }
  0x67   : > { %v2039_v47 = vld [vmem:[%s2834_s21 + $0xc0] sm:$0xf]  ;;  %1713 = vmatprep.mubr.bf16.mxu0 %v2553_v42  ;;  %550 = vst [vmem:[#allocation2 + $0xc8] sm:$0xf] %v508_v46  ;;  %v2042_v50 = vld [vmem:[%s2834_s21 + $0xcc] sm:$0x1] }
  0x68   : > { %v510_v51 = vshrl.u32 %v2039_v47, 16  ;;  %v513_v53 = vshll.u32 %v2039_v47, 16  ;;  %v519_v54 = vshll.u32 %v2040_v48, 16  ;;  %v524_v55 = vshrl.u32 %v2041_v49, 16  ;;  %2397 = vmatpush3.bf16.msra.mxu1 %v3054_v24  ;;  %v2049_v58 = vld [vmem:[%s2834_s21 + $0x38] sm:$0xf]  ;;  %1714 = vmatmul.mubr.bf16.gmra.mrb[20].mxu0 %v2089_v44 }
  0x69   : > { %v527_v56 = vshll.u32 %v2041_v49, 16  ;;  %v533_v57 = vshll.u32 %v2042_v50, 16  ;;  %v2050_v59 = vld [vmem:[%s2834_s21 + $0x40] sm:$0xf]  ;;  %2390 = vmatprep.subr.bf16.mxu1 %v3067_v39  ;;  %571 = vst [vmem:[#allocation2 + $0xf0] sm:$0xf] %v2049_v58  ;;  %2367 = vmatpush3.bf16.msra.mxu0 %v3042_v8 }
  0x6a   : > { %v512_v61 = vrot.slane %v510_v51, 4  ;;  %v515_v62 = vrot.slane %v513_v53, 5  ;;  %v526_v63 = vrot.slane %v524_v55, 4  ;;  %572 = vst [vmem:[#allocation2 + $0x114] sm:$0xf] %v2050_v59  ;;  %2368 = vmatprep.subr.bf16.mxu0 %v3054_v24  ;;  %v521_v4 = vrot.slane %v519_v54, 5 }
  0x6b   : > { %v2562_v0 = vld [vmem:[#allocation2 + $0xac] ss:$36 sps:$4 sm:$0xff]   ;;  %v529_v2 = vrot.slane %v527_v56, 5  ;;  %v535_v5 = vrot.slane %v533_v57, 5  ;;  %v2057_v6 = vld [vmem:[%s2834_s21 + $0x80] sm:$0xf] }
  0x6c   : > { %v2564_v1 = vld [vmem:[#allocation2 + $0xa8] ss:$36 sps:$4 sm:$0xff]   ;;  %v516_v3 = vor.u32 %v515_v62, %v512_v61  ;;  %1786 = vmatprep.mubr.bf16.mxu1 %v2562_v0  ;;  %2398 = vmatpush3.bf16.msra.mxu1 %v3067_v39  ;;  %590 = vst [vmem:[#allocation2 + $0xf4] sm:$0xf] %v2057_v6  ;;  %v2061_v20 = vld [vmem:[%s2834_s21 + $0x10] sm:$0xf] }
  0x6d   : > { %v2058_v7 = vld [vmem:[%s2834_s21 + $0x88] sm:$0xf]  ;;  %v530_v9 = vor.u32 %v529_v2, %v526_v63  ;;  %1787 = vmatmul.mubr.bf16.gmra.mrb[24].mxu1 %v2564_v1  ;;  %2391 = vmatprep.subr.bf16.mxu1 %v3089_v60  ;;  %v758_v12 = vld [vmem:[#allocation2 + $0xa0] sm:$0xff]  ;;  %v2060_v19 = vld [vmem:[%s2834_s21 + $0xc] sm:$0x1]  ;;  %v623_v29 = vshrl.u32 %v2061_v20, 16 }
  0x6e   : > { %591 = vst [vmem:[#allocation2 + $0x118] sm:$0xf] %v2058_v7  ;;  %v517_v8 = vrot.slane %v516_v3, 4  ;;  %v2059_v11 = vld [vmem:[%s2834_s21 + $0x8] sm:$0xf]  ;;  %2369 = vmatpush3.bf16.msra.mxu0 %v3054_v24  ;;  %v3116_v24 = vld [vmem:[%s3226_s1 + $0x238] sm:$0xff]  }
  0x6f   : > { %v763_v13 = vld [vmem:[#allocation2 + $0xc4] sm:$0xff]  ;;  %v531_v15 = vrot.slane %v530_v9, 4  ;;  %v609_v16 = vshrl.u32 %v2059_v11, 16  ;;  %2370 = vmatprep.subr.bf16.mxu0 %v3067_v39  ;;  %v2062_v22 = vld [vmem:[%s2834_s21 + $0x14] sm:$0x1]  ;;  %v612_v26 = vshll.u32 %v2059_v11, 16 }
  0x70   : > { %v2560_v14 = vld [vmem:[#allocation2 + $0xa4] ss:$36 sps:$4 sm:$0xff]   ;;  %v2098_v17 = vcombine.low %v758_v12, %v763_v13  ;;  %v522_v18 = vsel %vm2857_vm2, %v517_v8, %v521_v4  ;;  %2399 = vmatpush3.bf16.msra.mxu1 %v3089_v60  ;;  %v618_v27 = vshll.u32 %v2060_v19, 16  ;;  %v626_v30 = vshll.u32 %v2061_v20, 16  ;;  %v2068_v32 = vld [vmem:[%s2834_s21 + $0x2c] sm:$0x1] }
  0x71   : > { %1721 = vmatprep.mubr.bf16.mxu0 %v2560_v14  ;;  %v536_v23 = vsel %vm2857_vm2, %v531_v15, %v535_v5  ;;  %551 = vst [vmem:[#allocation2 + $0xec] sm:$0xf] %v522_v18  ;;  %v611_v25 = vrot.slane %v609_v16, 4  ;;  %v2067_v28 = vld [vmem:[%s2834_s21 + $0x28] sm:$0xf]  ;;  %2392 = vmatprep.subr.bf16.mxu1 %v3100_v10  ;;  %v632_v31 = vshll.u32 %v2062_v22, 16 }
  0x72   : > { %1722 = vmatmul.mubr.bf16.gmra.mrb[24].mxu0 %v2098_v17  ;;  %552 = vst [vmem:[#allocation2 + $0x110] sm:$0xf] %v536_v23  ;;  %v665_v33 = vshrl.u32 %v2067_v28, 16  ;;  %v614_v34 = vrot.slane %v612_v26, 5  ;;  %v620_v35 = vrot.slane %v618_v27, 5  ;;  %v625_v38 = vrot.slane %v623_v29, 4 }
  0x73   : > { %2371 = vmatpush3.bf16.msra.mxu0 %v3067_v39  ;;  %v2069_v36 = vld [vmem:[%s2834_s21 + $0x30] sm:$0xf]  ;;  %v2070_v37 = vld [vmem:[%s2834_s21 + $0x34] sm:$0x1]  ;;  %v628_v40 = vrot.slane %v626_v30, 5  ;;  %v634_v43 = vrot.slane %v632_v31, 5 }
  0x74   : > { %2372 = vmatprep.subr.bf16.mxu0 %v3089_v60  ;;  %v2571_v41 = vld [vmem:[#allocation2 + $0xf0] ss:$36 sps:$4 sm:$0xff]   ;;  %2400 = vmatpush3.bf16.msra.mxu1 %v3100_v10  ;;  %v615_v42 = vor.u32 %v614_v34, %v611_v25  ;;  %v667_v44 = vrot.slane %v665_v33, 4  ;;  %v668_v45 = vshll.u32 %v2067_v28, 16  ;;  %v674_v46 = vshll.u32 %v2068_v32, 16 }
  0x75   : > { %v2569_v21 = vld [vmem:[#allocation2 + $0xf4] ss:$36 sps:$4 sm:$0xff]   ;;  %2393 = vmatprep.subr.bf16.mxu1 %v3116_v24  ;;  %v629_v39 = vor.u32 %v628_v40, %v625_v38  ;;  %v679_v47 = vshrl.u32 %v2069_v36, 16  ;;  %v682_v48 = vshll.u32 %v2069_v36, 16  ;;  %v688_v53 = vshll.u32 %v2070_v37, 16 }
  0x76   : > { %1794 = vmatprep.mubr.bf16.mxu1 %v2569_v21  ;;  %v2063_v49 = vld [vmem:[%s2834_s21 + $0x18] sm:$0xf]  ;;  %v616_v50 = vrot.slane %v615_v42, 4  ;;  %v670_v51 = vrot.slane %v668_v45, 5  ;;  %v2064_v54 = vld [vmem:[%s2834_s21 + $0x1c] sm:$0x1] }
  0x77   : > { %2373 = vmatpush3.bf16.msra.mxu0 %v3089_v60  ;;  %1795 = vmatmul.mubr.bf16.gmra.mrb[28].mxu1 %v2571_v41  ;;  %v637_v55 = vshrl.u32 %v2063_v49, 16  ;;  %v630_v57 = vrot.slane %v629_v39, 4  ;;  %v676_v58 = vrot.slane %v674_v46, 5  ;;  %v681_v59 = vrot.slane %v679_v47, 4  ;;  %v2065_v2 = vld [vmem:[%s2834_s21 + $0x20] sm:$0xf] }
  0x78   : > { %v768_v56 = vld [vmem:[#allocation2 + $0xe8] sm:$0xff]  ;;  %2374 = vmatprep.subr.bf16.mxu0 %v3100_v10  ;;  %v684_v61 = vrot.slane %v682_v48, 5  ;;  %2401 = vmatpush3.bf16.msra.mxu1 %v3116_v24  ;;  %v621_v60 = vsel %vm2857_vm2, %v616_v50, %v620_v35  ;;  %v671_v0 = vor.u32 %v670_v51, %v667_v44  ;;  %v690_v1 = vrot.slane %v688_v53, 5  ;;  %v2066_v6 = vld [vmem:[%s2834_s21 + $0x24] sm:$0x1] }
  0x79   : > { %v773_v62 = vld [vmem:[#allocation2 + $0x10c] sm:$0xff]  ;;  %v635_v4 = vsel %vm2857_vm2, %v630_v57, %v634_v43  ;;  %728 = vst [vmem:[#allocation2 + $0x20] sm:$0xf] %v621_v60  ;;  %v639_v7 = vrot.slane %v637_v55, 4  ;;  %v2071_v9 = vld [vmem:[%s2834_s21 + $0x38] sm:$0xf] }
  0x7a   : > { %v2567_v63 = vld [vmem:[#allocation2 + $0xec] ss:$36 sps:$4 sm:$0xff]   ;;  %v2107_v3 = vcombine.low %v768_v56, %v773_v62  ;;  %v685_v5 = vor.u32 %v684_v61, %v681_v59  ;;  %729 = vst [vmem:[#allocation2 + $0x44] sm:$0xf] %v635_v4  ;;  %v672_v8 = vrot.slane %v671_v0, 4  ;;  %v640_v11 = vshll.u32 %v2063_v49, 16 }
  0x7b   : > { %1729 = vmatprep.mubr.bf16.mxu0 %v2567_v63  ;;  %2375 = vmatpush3.bf16.msra.mxu0 %v3100_v10  ;;  %v646_v12 = vshll.u32 %v2064_v54, 16  ;;  %v651_v13 = vshrl.u32 %v2065_v2, 16  ;;  %v2072_v14 = vld [vmem:[%s2834_s21 + $0x3c] sm:$0x1]  ;;  %v654_v16 = vshll.u32 %v2065_v2, 16  ;;  %v660_v17 = vshll.u32 %v2066_v6, 16 }
  0x7c   : > { %1730 = vmatmul.mubr.bf16.gmra.mrb[28].mxu0 %v2107_v3  ;;  %2376 = vmatprep.subr.bf16.mxu0 %v3116_v24  ;;  %v686_v15 = vrot.slane %v685_v5, 4  ;;  %v2073_v18 = vld [vmem:[%s2834_s21 + $0x40] sm:$0xf]  ;;  %v693_v19 = vshrl.u32 %v2071_v9, 16  ;;  %v677_v20 = vsel %vm2857_vm2, %v672_v8, %v676_v58  ;;  %v642_v22 = vrot.slane %v640_v11, 5 }
  0x7d   : > { %v653_v10 = vrot.slane %v651_v13, 4  ;;  %v2074_v23 = vld [vmem:[%s2834_s21 + $0x44] sm:$0x1]  ;;  %732 = vst [vmem:[#allocation2 + $0xb0] sm:$0xf] %v677_v20  ;;  %v648_v26 = vrot.slane %v646_v12, 5 }
  0x7e   : > { %v691_v25 = vsel %vm2857_vm2, %v686_v15, %v690_v1  ;;  %v656_v27 = vrot.slane %v654_v16, 5  ;;  %v695_v28 = vrot.slane %v693_v19, 4  ;;  %v643_v29 = vor.u32 %v642_v22, %v639_v7  ;;  %v2075_v62 = vld [vmem:[%s3227_s2] ss:$0 sm:$0xff] }
  0x7f   : > { %2377 = vmatpush3.bf16.msra.mxu0 %v3116_v24  ;;  %733 = vst [vmem:[#allocation2 + $0xd4] sm:$0xf] %v691_v25  ;;  %v696_v30 = vshll.u32 %v2071_v9, 16  ;;  %v702_v31 = vshll.u32 %v2072_v14, 16  ;;  %v707_v32 = vshrl.u32 %v2073_v18, 16  ;;  %v662_v34 = vrot.slane %v660_v17, 5 }
  0x80   : > { %v657_v33 = vor.u32 %v656_v27, %v653_v10  ;;  %v710_v35 = vshll.u32 %v2073_v18, 16  ;;  %v716_v36 = vshll.u32 %v2074_v23, 16  ;;  %v644_v37 = vrot.slane %v643_v29, 4 }
  0x81   : > { %v698_v21 = vrot.slane %v696_v30, 5  ;;  %v709_v38 = vrot.slane %v707_v32, 4  ;;  %v2574_v40 = vld [vmem:[#allocation2 + $0x20] ss:$36 sps:$4 sm:$0xff]   ;;  %v704_v24 = vrot.slane %v702_v31, 5 }
  0x82   : > { %v658_v41 = vrot.slane %v657_v33, 4  ;;  %v712_v42 = vrot.slane %v710_v35, 5  ;;  %v649_v43 = vsel %vm2857_vm2, %v644_v37, %v648_v26  ;;  %2378 = vmatprep.mubr.bf16.mxu0 %v2574_v40  ;;  %v718_v46 = vrot.slane %v716_v36, 5 }
  0x83   : > { %v699_v44 = vor.u32 %v698_v21, %v695_v28  ;;  %730 = vst [vmem:[#allocation2 + $0x68] sm:$0xf] %v649_v43 }
  0x84   : > { %v663_v45 = vsel %vm2857_vm2, %v658_v41, %v662_v34  ;;  %v713_v39 = vor.u32 %v712_v42, %v709_v38 }
  0x85   : > { %731 = vst [vmem:[#allocation2 + $0x8c] sm:$0xf] %v663_v45  ;;  %v700_v47 = vrot.slane %v699_v44, 4 }
  0x86   : > { %v2575_v48 = vld [vmem:[#allocation2 + $0xb0] ss:$36 sps:$4 sm:$0xff]   ;;  %v714_v49 = vrot.slane %v713_v39, 4 }
  0x87   : > { %v705_v50 = vsel %vm2857_vm2, %v700_v47, %v704_v24  ;;  %2382 = vmatprep.mubr.bf16.mxu1 %v2575_v48 }
  0x88   : > { %v719_v51 = vsel %vm2857_vm2, %v714_v49, %v718_v46  ;;  %734 = vst [vmem:[#allocation2 + $0xf8] sm:$0xf] %v705_v50 }
  0x89   : > { %735 = vst [vmem:[#allocation2 + $0x11c] sm:$0xf] %v719_v51 }
  0x8c   : > { %v2576_v53 = vld [vmem:[#allocation2 + $0x68] ss:$36 sps:$4 sm:$0xff]  }
  0x8d   : > { %2379 = vmatmul.mubr.bf16.vlgmr.msra.gmra.mrb[32].mxu0 %v2576_v53 }
  0x90   : > { %v2577_v54 = vld [vmem:[#allocation2 + $0xf8] ss:$36 sps:$4 sm:$0xff]  }
  0x91   : > { %2383 = vmatmul.mubr.bf16.vlgmr.msra.gmra.mrb[32].mxu1 %v2577_v54 }
 0x103   : > { %v2206_v55 = vpop.f32.mrb[0].mxu0 }
 0x104   : > { %v2207_v56 = vpop.f32.mrb[1].mxu0  ;;  %v2246_v63 = vpop.f32.mrb[0].mxu1 }
 0x105   : > { %v2208_v57 = vadd.f32 %v2207_v56, %v2206_v55  ;;  %v2209_v58 = vpop.f32.mrb[2].mxu0  ;;  %v2247_v52 = vpop.f32.mrb[1].mxu1 }
 0x106   : > { %v2210_v59 = vpop.f32.mrb[3].mxu0  ;;  %v2248_v0 = vadd.f32 %v2247_v52, %v2246_v63  ;;  %v2249_v1 = vpop.f32.mrb[2].mxu1 }
 0x107   : > { %v2211_v61 = vadd.f32 %v2210_v59, %v2209_v58  ;;  %v1578_v60 = vadd.f32 %v2208_v57, %v2075_v62  ;;  %v2250_v3 = vpop.f32.mrb[3].mxu1 }
 0x108   : > { %v2251_v6 = vadd.f32 %v2250_v3, %v2249_v1 }
 0x109   : > { %v1581_v2 = vadd.f32 %v2211_v61, %v2075_v62  ;;  %v3160_v5 = vadd.f32 %v2248_v0, %v1578_v60 }
 0x10b   : > { %v2212_v4 = vpop.f32.mrb[4].mxu0  ;;  %v3162_v11 = vadd.f32 %v2251_v6, %v1581_v2 }
 0x10c   : > { %v2213_v7 = vpop.f32.mrb[5].mxu0 }
 0x10d   : > { %v2214_v9 = vadd.f32 %v2213_v7, %v2212_v4  ;;  %v2215_v8 = vpop.f32.mrb[6].mxu0 }
 0x10e   : > { %v2216_v12 = vpop.f32.mrb[7].mxu0  ;;  %v2252_v14 = vpop.f32.mrb[4].mxu1 }
 0x10f   : > { %v2217_v13 = vadd.f32 %v2216_v12, %v2215_v8  ;;  %v1586_v15 = vadd.f32 %v2214_v9, %v2075_v62  ;;  %v2253_v16 = vpop.f32.mrb[5].mxu1 }
 0x110   : > { %v2254_v17 = vadd.f32 %v2253_v16, %v2252_v14  ;;  %v2255_v18 = vpop.f32.mrb[6].mxu1 }
 0x111   : > { %v1589_v19 = vadd.f32 %v2217_v13, %v2075_v62  ;;  %v2256_v20 = vpop.f32.mrb[7].mxu1 }
 0x112   : > { %v1651_v22 = vadd.f32 %v2254_v17, %v1586_v15  ;;  %v2257_v10 = vadd.f32 %v2256_v20, %v2255_v18 }
 0x113   : > { %v2218_v23 = vpop.f32.mrb[8].mxu0 }
 0x114   : > { %v2219_v25 = vpop.f32.mrb[9].mxu0  ;;  %v1654_v26 = vadd.f32 %v2257_v10, %v1589_v19 }
 0x115   : > { %v2220_v27 = vadd.f32 %v2219_v25, %v2218_v23  ;;  %v2221_v28 = vpop.f32.mrb[10].mxu0 }
 0x116   : > { %v2222_v29 = vpop.f32.mrb[11].mxu0 }
 0x117   : > { %v2223_v30 = vadd.f32 %v2222_v29, %v2221_v28  ;;  %v1594_v32 = vadd.f32 %v2220_v27, %v2075_v62 }
 0x119   : > { %v1597_v36 = vadd.f32 %v2223_v30, %v2075_v62 }
 0x11a   : > { %v2258_v31 = vpop.f32.mrb[8].mxu1 }
 0x11b   : > { %v2259_v33 = vpop.f32.mrb[9].mxu1 }
 0x11c   : > { %v2260_v34 = vadd.f32 %v2259_v33, %v2258_v31  ;;  %v2261_v35 = vpop.f32.mrb[10].mxu1 }
 0x11d   : > { %v2262_v37 = vpop.f32.mrb[11].mxu1  ;;  %v2224_v40 = vpop.f32.mrb[12].mxu0 }
 0x11e   : > { %v1659_v21 = vadd.f32 %v2260_v34, %v1594_v32  ;;  %v2263_v38 = vadd.f32 %v2262_v37, %v2261_v35  ;;  %v2225_v41 = vpop.f32.mrb[13].mxu0 }
 0x11f   : > { %v2226_v43 = vadd.f32 %v2225_v41, %v2224_v40  ;;  %v2227_v44 = vpop.f32.mrb[14].mxu0 }
 0x120   : > { %v1662_v42 = vadd.f32 %v2263_v38, %v1597_v36  ;;  %v2228_v24 = vpop.f32.mrb[15].mxu0 }
 0x121   : > { %v2229_v45 = vadd.f32 %v2228_v24, %v2227_v44  ;;  %v1602_v46 = vadd.f32 %v2226_v43, %v2075_v62 }
 0x123   : > { %v1605_v50 = vadd.f32 %v2229_v45, %v2075_v62 }
 0x125   : > { %v2264_v39 = vpop.f32.mrb[12].mxu1 }
 0x126   : > { %v2265_v47 = vpop.f32.mrb[13].mxu1 }
 0x127   : > { %v2266_v48 = vadd.f32 %v2265_v47, %v2264_v39  ;;  %v2267_v49 = vpop.f32.mrb[14].mxu1 }
 0x128   : > { %v2268_v51 = vpop.f32.mrb[15].mxu1 }
 0x129   : > { %v1667_v53 = vadd.f32 %v2266_v48, %v1602_v46  ;;  %v2269_v54 = vadd.f32 %v2268_v51, %v2267_v49 }
 0x12b   : > { %v1670_v55 = vadd.f32 %v2269_v54, %v1605_v50 }
 0x12e   : > { %v2326_v56 = vpop.f32.mrb[16].mxu1 }
 0x12f   : > { %v2327_v57 = vpop.f32.mrb[17].mxu1 }
 0x130   : > { %v2328_v58 = vadd.f32 %v2327_v57, %v2326_v56  ;;  %v2329_v59 = vpop.f32.mrb[18].mxu1 }
 0x131   : > { %v2330_v61 = vpop.f32.mrb[19].mxu1 }
 0x132   : > { %v2331_v63 = vadd.f32 %v2330_v61, %v2329_v59  ;;  %v2286_v60 = vpop.f32.mrb[16].mxu0 }
 0x133   : > { %v2287_v52 = vpop.f32.mrb[17].mxu0 }
 0x134   : > { %v2288_v0 = vadd.f32 %v2287_v52, %v2286_v60  ;;  %v2289_v1 = vpop.f32.mrb[18].mxu0 }
 0x135   : > { %v2290_v3 = vpop.f32.mrb[19].mxu0 }
 0x136   : > { %v2332_v2 = vpop.f32.mrb[20].mxu1  ;;  %v1708_v6 = vadd.f32 %v2288_v0, %v3160_v5  ;;  %v2291_v62 = vadd.f32 %v2290_v3, %v2289_v1 }
 0x137   : > { %v2333_v4 = vpop.f32.mrb[21].mxu1 }
 0x138   : > { %v2334_v7 = vadd.f32 %v2333_v4, %v2332_v2  ;;  %v2335_v9 = vpop.f32.mrb[22].mxu1  ;;  %v1711_v12 = vadd.f32 %v2291_v62, %v3162_v11  ;;  %v1773_v14 = vadd.f32 %v2328_v58, %v1708_v6 }
 0x139   : > { %v2336_v8 = vpop.f32.mrb[23].mxu1 }
 0x13a   : > { %v2337_v13 = vadd.f32 %v2336_v8, %v2335_v9  ;;  %v1776_v16 = vadd.f32 %v2331_v63, %v1711_v12 }
 0x13b   : > { %v2292_v15 = vpop.f32.mrb[20].mxu0 }
 0x13c   : > { %v2293_v17 = vpop.f32.mrb[21].mxu0 }
 0x13d   : > { %v2294_v18 = vadd.f32 %v2293_v17, %v2292_v15  ;;  %v2295_v19 = vpop.f32.mrb[22].mxu0 }
 0x13e   : > { %v2296_v20 = vpop.f32.mrb[23].mxu0 }
 0x13f   : > { %v1716_v10 = vadd.f32 %v2294_v18, %v1651_v22  ;;  %v2297_v23 = vadd.f32 %v2296_v20, %v2295_v19 }
 0x140   : > { %v2338_v25 = vpop.f32.mrb[24].mxu1 }
 0x141   : > { %v2339_v27 = vpop.f32.mrb[25].mxu1  ;;  %v1719_v28 = vadd.f32 %v2297_v23, %v1654_v26  ;;  %v1781_v30 = vadd.f32 %v2334_v7, %v1716_v10 }
 0x142   : > { %v2340_v5 = vadd.f32 %v2339_v27, %v2338_v25  ;;  %v2341_v29 = vpop.f32.mrb[26].mxu1 }
 0x143   : > { %v2342_v31 = vpop.f32.mrb[27].mxu1  ;;  %v1784_v11 = vadd.f32 %v2337_v13, %v1719_v28 }
 0x144   : > { %v2343_v33 = vadd.f32 %v2342_v31, %v2341_v29 }
 0x145   : > { %v2298_v32 = vpop.f32.mrb[24].mxu0 }
 0x146   : > { %v2299_v34 = vpop.f32.mrb[25].mxu0 }
 0x147   : > { %v2300_v35 = vadd.f32 %v2299_v34, %v2298_v32  ;;  %v2301_v36 = vpop.f32.mrb[26].mxu0 }
 0x148   : > { %v2302_v37 = vpop.f32.mrb[27].mxu0 }
 0x149   : > { %v1724_v38 = vadd.f32 %v2300_v35, %v1659_v21  ;;  %v2303_v40 = vadd.f32 %v2302_v37, %v2301_v36 }
 0x14a   : > { %v2344_v41 = vpop.f32.mrb[28].mxu1 }
 0x14b   : > { %v1727_v43 = vadd.f32 %v2303_v40, %v1662_v42  ;;  %v2345_v22 = vpop.f32.mrb[29].mxu1  ;;  %v1789_v44 = vadd.f32 %v2340_v5, %v1724_v38 }
 0x14c   : > { %v2346_v24 = vadd.f32 %v2345_v22, %v2344_v41  ;;  %v2347_v26 = vpop.f32.mrb[30].mxu1 }
 0x14d   : > { %v2348_v45 = vpop.f32.mrb[31].mxu1  ;;  %v1792_v39 = vadd.f32 %v2343_v33, %v1727_v43 }
 0x14e   : > { %v2349_v46 = vadd.f32 %v2348_v45, %v2347_v26 }
 0x14f   : > { %v2304_v47 = vpop.f32.mrb[28].mxu0 }
 0x150   : > { %v2305_v48 = vpop.f32.mrb[29].mxu0 }
 0x151   : > { %v2306_v49 = vadd.f32 %v2305_v48, %v2304_v47  ;;  %v2307_v50 = vpop.f32.mrb[30].mxu0 }
 0x152   : > { %v2308_v51 = vpop.f32.mrb[31].mxu0 }
 0x153   : > { %v1732_v54 = vadd.f32 %v2306_v49, %v1667_v53  ;;  %v2309_v56 = vadd.f32 %v2308_v51, %v2307_v50 }
 0x155   : > { %v1735_v21 = vadd.f32 %v2309_v56, %v1670_v55  ;;  %v1797_v57 = vadd.f32 %v2346_v24, %v1732_v54 }
 0x157   : > { %v1800_v58 = vadd.f32 %v2349_v46, %v1735_v21 }
 0x160   : > { %v2380_v42 = vpop.f32.mrb[32].mxu0 }
 0x161   : > { %v1846_v59 = vadd.f32 %v2380_v42, %v1781_v30  ;;  %v1837_v61 = vpop.f32.mrb[33].mxu0 }
 0x162   : > { %v1838_v63 = vadd.f32 %v1837_v61, %v1773_v14  ;;  %v2381_v60 = vpop.f32.mrb[34].mxu0 }
 0x163   : > { %v1870_v52 = vmax.f32 %v1846_v59, 0.0  ;;  %v1849_v0 = vadd.f32 %v2381_v60, %v1784_v11  ;;  %v1840_v1 = vpop.f32.mrb[35].mxu0 }
 0x164   : > { %v2384_v2 = vpop.f32.mrb[32].mxu1  ;;  %v1868_v3 = vmax.f32 %v1838_v63, 0.0  ;;  %v1841_v4 = vadd.f32 %v1840_v1, %v1776_v16 }
 0x165   : > { %1878 = vst [vmem:[%s177_s30 + $0x10] sm:$0xff] %v1870_v52  ;;  %v1862_v53 = vadd.f32 %v2384_v2, %v1797_v57  ;;  %v1853_v55 = vpop.f32.mrb[33].mxu1  ;;  %v1871_v6 = vmax.f32 %v1849_v0, 0.0 }
 0x166   : > { %1876 = vst [vmem:[%s177_s30] sm:$0xff] %v1868_v3  ;;  %v1854_v62 = vadd.f32 %v1853_v55, %v1789_v44  ;;  %v2385_v7 = vpop.f32.mrb[34].mxu1  ;;  %v1869_v9 = vmax.f32 %v1841_v4, 0.0 }
 0x167   : > { %v1874_v8 = vmax.f32 %v1862_v53, 0.0  ;;  %1879 = vst [vmem:[%s177_s30 + $0x18] sm:$0xff] %v1871_v6  ;;  %v1865_v12 = vadd.f32 %v2385_v7, %v1800_v58  ;;  %v1856_v13 = vpop.f32.mrb[35].mxu1 }
 0x168   : > { %v1872_v14 = vmax.f32 %v1854_v62, 0.0  ;;  %1877 = vst [vmem:[%s177_s30 + $0x8] sm:$0xff] %v1869_v9  ;;  %v1857_v15 = vadd.f32 %v1856_v13, %v1792_v39 }
 0x169   : > { %1882 = vst [vmem:[%s177_s30 + $0x30] sm:$0xff] %v1874_v8  ;;  %v1875_v16 = vmax.f32 %v1865_v12, 0.0 }
 0x16a   : > { %1880 = vst [vmem:[%s177_s30 + $0x20] sm:$0xff] %v1872_v14  ;;  %v1873_v17 = vmax.f32 %v1857_v15, 0.0 }
 0x16b   : > { %1883 = vst [vmem:[%s177_s30 + $0x38] sm:$0xff] %v1875_v16 }
 0x16c   : > { %1881 = vst [vmem:[%s177_s30 + $0x28] sm:$0xff] %v1873_v17 }
 0x16d   : > { %2591 = shalt.err (!%p2588_p5)
}
 0x16e   : > { %s2592_s19 = scalar_lea.hbm %s3173_s8, 1024  ;;  %s2596_s21 = scalar_lea.hbm %s3228_s3, 2048 }
 0x16f   : > { %p2593_p6 = scmp.ne.s32.totalorder %s3173_s8, %s2592_s19  ;;  %p2597_p10 = scmp.lt.u32.totalorder %s3173_s8, %s3228_s3 }
 0x170   : > { %p2598_p11 = scmp.lt.u32.totalorder %s2596_s21, %s2592_s19  ;;  %p2600_p13 = scmp.lt.u32.totalorder %s2592_s19, %s3173_s8 }
 0x171   : > { %p2594_p7 = pnand %p2593_p6, %p2721_p4 }
 0x172   : > { %p2599_p12 = por %p2598_p11, %p2597_p10 }
 0x173   : > { %p2595_p9 = pneg %p2594_p7 }
 0x174   : > { %p2601_p0 = por %p2600_p13, %p2599_p12 }
 0x176   : > { %p2602_p1 = pnand %p2601_p0, %p2595_p9 }
 0x178   : > { %2605 = shalt.err (!%p2602_p1)
}
 0x179   : > { %s2659_s29 = smov 128   ;;  %s2660_s30 = smov 8  }
 0x17a   : > { %2403 = dma.vmem_to_hbm [thread:$0]  (%p2721_p4), %s3175_s5, 1024, %s3173_s8, %s3179_s15, %s2659_s29, %s2659_s29, %s2660_s30  }
 0x17b PF: > { %p2409_p2 = scmp.ge.s32.totalorder %s2656_s17, 2  ;;  %s1915_s4 = sand.u32 1, %s2636_s12  }
 0x17c   : > { %s1916_s6 = scalar_lea.sflag [#allocation4], %s1915_s4 }
 0x17d   : > { %p2406_p3 = pnand %p2409_p2, %p2728_p8 }
 0x17f   : > { %2631 = dma.done.wait (!%p2406_p3), %s1916_s6, 1024  }
 0x180   : > { %2633 = vsyncadd (!%p2406_p3), %s1916_s6, 4294966272  ;;  %s16_s17 = sadd.s32 1, %s2656_s17   ;;  %s3233_s12 = smov %s2640_s13 }
 0x181   : > { %p13_p5 = scmp.ge.s32.totalorder %s16_s17, 4   ;;  %s3234_s13 = smov %s2644_s14 }
 0x182   : > { %s3235_s14 = smov %s2734_s25  ;;  %s3236_s15 = smov %s2652_s16 }
 0x183   : > { %s3237_s16 = smov %s3239_s20  ;;  %15 = sbr.rel (!%p13_p5) target bundleno = 4 (0x4), region = 73 }
 0x18a   :  { %1921 = vsyncpa [#allocation4], 1 }
 0x18b   :  { %1923 = vsyncpa [#allocation4 + $0x1], 1 }

// kernel: tpu_custom_call.1
= control target key start
LH: loop header
LB: loop body
LE: loop exit
PB: predicated region body
PF: predicated region fallthrough
CT: control target
= control target key end

     0   :  { %8 = vsyncpa [#allocation4], 0  ;;  %s3225_s0 = inlined_call_operand.vmem [shape: bf16[2,2,2,9,9,128], index: 0, kind: input, shape index: {}]   ;;  %s3226_s1 = inlined_call_operand.vmem [shape: bf16[1152,128], index: 1, kind: input, shape index: {}]   ;;  %s3227_s2 = inlined_call_operand.vmem [shape: f32[1,128], index: 2, kind: input, shape index: {}]   ;;  %s3228_s3 = inlined_call_operand.hbm [shape: f32[2,8,8,128], index: 3, kind: output, shape index: {}]  }
   0x1   :  { %10 = vsyncpa [#allocation4 + $0x1], 0  ;;  %s2681_s12 = smov 0   ;;  %s2683_s13 = smov 0  }
   0x2   :  { %s2685_s14 = smov 0   ;;  %s2687_s15 = smov 0  }
   0x3   :  { %s2689_s16 = smov 0   ;;  %s2691_s17 = smov 0  }
   0x4 LB: > { %s1996_s18 = sadd.s32 4294967295, %s2656_s17   ;;  %s1997_s19 = sadd.s32 4294967294, %s2656_s17   ;;  %s2656_s17 = sphi %s2691_s17, %s16_s17   ;;  %s2652_s16 = sphi %s2689_s16, %s3237_s16   ;;  %s2648_s15 = sphi %s2687_s15, %s3236_s15   ;;  %s2644_s14 = sphi %s2685_s14, %s3235_s14   ;;  %s2640_s13 = sphi %s2683_s13, %s3234_s13   ;;  %s2636_s12 = sphi %s2681_s12, %s3233_s12  }
   0x5   : > { %s28_s20 = sadd.s32 1, %s2652_s16  ;;  %s105_s21 = sadd.s32 1, %s2644_s14 }
   0x6   : > { %p30_p0 = scmp.ge.s32.totalorder %s28_s20, 2  ;;  %p115_p1 = scmp.ne.s32.totalorder %s2644_s14, %s2640_s13 }
   0x7   : > { %p116_p2 = scmp.eq.s32.totalorder %s1996_s18, 1  ;;  %p121_p3 = scmp.ne.s32.totalorder %s2640_s13, %s2636_s12 }
   0x8   : > { %s3239_s20 = smov (%p30_p0, %s28_s20), 0  ;;  %p122_p5 = scmp.eq.s32.totalorder %s1997_s19, 1 }
   0x9   : > { %p2721_p4 = por %p116_p2, %p115_p1  ;;  %s100_s23 = ssub.s32 %s2652_s16, %s3239_s20 }
   0xa   : > { %p2000_p6 = scmp.ge.s32.totalorder %s2656_s17, 1  ;;  %p103_p7 = scmp.eq.s32.totalorder %s100_s23, 0 }
   0xb   : > { %p2728_p8 = por %p122_p5, %p121_p3  ;;  %p154_p9 = scmp.lt.s32.totalorder %s2656_s17, 3 }
   0xc   : > { %s2734_s25 = scalar_select %p103_p7, %s2644_s14, %s105_s21  }
   0xd   : > { %p155_p10 = pnand %p2000_p6, %p154_p9 }
   0xe   : > { %v2460_v0 = vld [vmem:[%s3226_s1 + $0x40] sm:$0xff] (!%p155_p10)   ;;  %v2464_v4 = vld [vmem:[%s3226_s1 + $0x48] sm:$0xff] (!%p155_p10)   ;;  %v2468_v8 = vld [vmem:[%s3226_s1 + $0x50] sm:$0xff] (!%p155_p10)   ;;  %p178_p11 = scmp.lt.s32.totalorder (!%p155_p10), %s2648_s15, 1  ;;  %vm240_vm0 = vsmask.f32 (!%p155_p10), 3328 }
   0xf   : > { %158 = sbr.rel (%p155_p10) target bundleno = 379 (0x17b), region = 32  ;;  %v2461_v1 = vld [vmem:[%s3226_s1 + $0xc0] sm:$0xff] (!%p155_p10)   ;;  %2190 = vmatprep.subr.bf16.mxu0 (!%p155_p10), %v2460_v0  ;;  %v2465_v5 = vld [vmem:[%s3226_s1 + $0xc8] sm:$0xff] (!%p155_p10)   ;;  %v2469_v9 = vld [vmem:[%s3226_s1 + $0xd0] sm:$0xff] (!%p155_p10)   ;;  %vm241_vm1 = vsmask.f32 (!%p155_p10), 7440 }
  0x10   : > { %v2462_v2 = vld [vmem:[%s3226_s1] sm:$0xff] (!%p155_p10)   ;;  %2230 = vmatprep.subr.bf16.mxu1 (!%p155_p10), %v2461_v1  ;;  %v2466_v6 = vld [vmem:[%s3226_s1 + $0x8] sm:$0xff] (!%p155_p10)   ;;  %v2470_v10 = vld [vmem:[%s3226_s1 + $0x10] sm:$0xff] (!%p155_p10)   ;;  %s175_s28 = sand.u32 (!%p155_p10), 1, %s2640_s13   ;;  %s2189_s4 = sshll.u32 (!%p155_p10), %s2648_s15, 10 }
  0x11   : > { %v2463_v3 = vld [vmem:[%s3226_s1 + $0x80] sm:$0xff] (!%p155_p10)   ;;  %2191 = vmatpush3.bf16.msra.mxu0 (!%p155_p10), %v2462_v2  ;;  %v2467_v7 = vld [vmem:[%s3226_s1 + $0x88] sm:$0xff] (!%p155_p10)   ;;  %v2471_v11 = vld [vmem:[%s3226_s1 + $0x90] sm:$0xff] (!%p155_p10)   ;;  %s2001_s29 = sshll.u32 (!%p155_p10), %s175_s28, 6  ;;  %s3173_s8 = scalar_lea.hbm (!%p155_p10), %s3228_s3, %s2189_s4 }
  0x12   : > { %2231 = vmatpush3.bf16.msra.mxu1 (!%p155_p10), %v2463_v3  ;;  %2192 = vmatprep.subr.bf16.mxu0 (!%p155_p10), %v2464_v4  ;;  %v2472_v12 = vld [vmem:[%s3226_s1 + $0x58] sm:$0xff] (!%p155_p10)   ;;  %v2476_v16 = vld [vmem:[%s3226_s1 + $0x60] sm:$0xff] (!%p155_p10)   ;;  %v2480_v20 = vld [vmem:[%s3226_s1 + $0x68] sm:$0xff] (!%p155_p10)   ;;  %s2658_s10 = smov (!%p155_p10), [#allocation3]  }
  0x13   : > { %2232 = vmatprep.subr.bf16.mxu1 (!%p155_p10), %v2465_v5  ;;  %v2473_v13 = vld [vmem:[%s3226_s1 + $0xd8] sm:$0xff] (!%p155_p10)   ;;  %v2477_v17 = vld [vmem:[%s3226_s1 + $0xe0] sm:$0xff] (!%p155_p10)   ;;  %v2481_v21 = vld [vmem:[%s3226_s1 + $0xe8] sm:$0xff] (!%p155_p10)   ;;  %s2582_s18 = sshll.u32 (!%p155_p10), %s2658_s10, 4  ;;  %s2583_s18 = int_to_ptr.vmem [resolvable:$false] %s2582_s18 }
  0x14   : > { %v2474_v14 = vld [vmem:[%s3226_s1 + $0x18] sm:$0xff] (!%p155_p10)   ;;  %v2478_v18 = vld [vmem:[%s3226_s1 + $0x20] sm:$0xff] (!%p155_p10)   ;;  %v2482_v22 = vld [vmem:[%s3226_s1 + $0x28] sm:$0xff] (!%p155_p10)  }
  0x15   : > { %2193 = vmatpush3.bf16.msra.mxu0 (!%p155_p10), %v2466_v6  ;;  %v2475_v15 = vld [vmem:[%s3226_s1 + $0x98] sm:$0xff] (!%p155_p10)   ;;  %v2479_v19 = vld [vmem:[%s3226_s1 + $0xa0] sm:$0xff] (!%p155_p10)   ;;  %v2483_v23 = vld [vmem:[%s3226_s1 + $0xa8] sm:$0xff] (!%p155_p10)  }
  0x16   : > { %2233 = vmatpush3.bf16.msra.mxu1 %v2467_v7  ;;  %2194 = vmatprep.subr.bf16.mxu0 %v2468_v8  ;;  %s179_s11 = scalar_select %p178_p11, %s2648_s15, 1  ;;  %v2484_v24 = vld [vmem:[%s3226_s1 + $0x70] sm:$0xff]   ;;  %v2488_v28 = vld [vmem:[%s3226_s1 + $0x78] sm:$0xff]   ;;  %v2498_v43 = vld [vmem:[%s3226_s1 + $0x140] sm:$0xff]  }
  0x17   : > { %2234 = vmatprep.subr.bf16.mxu1 %v2469_v9  ;;  %v2485_v25 = vld [vmem:[%s3226_s1 + $0xf0] sm:$0xff]   ;;  %v2489_v29 = vld [vmem:[%s3226_s1 + $0xf8] sm:$0xff]   ;;  %v2499_v48 = vld [vmem:[%s3226_s1 + $0x1c0] sm:$0xff]   ;;  %s3179_s15 = scalar_lea.sflag [#allocation4], %s175_s28 }
  0x18   : > { %v2486_v26 = vld [vmem:[%s3226_s1 + $0x30] sm:$0xff]   ;;  %s2402_s30 = smul.u32 288, %s179_s11  ;;  %v2490_v30 = vld [vmem:[%s3226_s1 + $0x38] sm:$0xff]   ;;  %vm2857_vm2 = vmor %vm240_vm0, %vm241_vm1  ;;  %s2584_s11 = scalar_lea.vmem %s2583_s18, 2048 }
  0x19   : > { %2195 = vmatpush3.bf16.msra.mxu0 %v2470_v10  ;;  %v2487_v27 = vld [vmem:[%s3226_s1 + $0xb0] sm:$0xff]   ;;  %v2491_v31 = vld [vmem:[%s3226_s1 + $0xb8] sm:$0xff]   ;;  %v2500_v57 = vld [vmem:[%s3226_s1 + $0x100] sm:$0xff]  }
  0x1a   : > { %2235 = vmatpush3.bf16.msra.mxu1 %v2471_v11  ;;  %2196 = vmatprep.subr.bf16.mxu0 %v2472_v12  ;;  %s2834_s21 = scalar_lea.vmem %s3225_s0, %s2402_s30  ;;  %v2502_v0 = vld [vmem:[%s3226_s1 + $0x148] sm:$0xff]   ;;  %s177_s30 = scalar_lea.vmem [#allocation3], %s2001_s29 }
  0x1b   : > { %2236 = vmatprep.subr.bf16.mxu1 %v2473_v13  ;;  %v189_v32 = vld [vmem:[%s2834_s21] sm:$0xf]  ;;  %v190_v33 = vld [vmem:[%s2834_s21 + $0x8] sm:$0xf]  ;;  %v2004_v35 = vld [vmem:[%s2834_s21 + $0x50] sm:$0xf] }
  0x1c   : > { %v2003_v34 = vld [vmem:[%s2834_s21 + $0x48] sm:$0xf]  ;;  %197 = vst [vmem:[#allocation2] sm:$0xf] %v189_v32  ;;  %198 = vst [vmem:[#allocation2 + $0x24] sm:$0xf] %v190_v33 }
  0x1d   : > { %2197 = vmatpush3.bf16.msra.mxu0 %v2474_v14  ;;  %216 = vst [vmem:[#allocation2 + $0x4] sm:$0xf] %v2003_v34  ;;  %v224_v36 = vld [vmem:[%s2834_s21] sm:$0xf]  ;;  %v225_v37 = vld [vmem:[%s2834_s21 + $0x4] sm:$0x1] }
  0x1e   : > { %2237 = vmatpush3.bf16.msra.mxu1 %v2475_v15  ;;  %2198 = vmatprep.subr.bf16.mxu0 %v2476_v16  ;;  %217 = vst [vmem:[#allocation2 + $0x28] sm:$0xf] %v2004_v35  ;;  %v226_v38 = vld [vmem:[%s2834_s21 + $0x8] sm:$0xf]  ;;  %v227_v39 = vld [vmem:[%s2834_s21 + $0xc] sm:$0x1] }
  0x1f   : > { %2238 = vmatprep.subr.bf16.mxu1 %v2477_v17  ;;  %v244_v40 = vshrl.u32 %v224_v36, 16  ;;  %v247_v41 = vshll.u32 %v224_v36, 16  ;;  %v253_v42 = vshll.u32 %v225_v37, 16  ;;  %v258_v44 = vshrl.u32 %v226_v38, 16  ;;  %v2011_v47 = vld [vmem:[%s2834_s21 + $0x90] sm:$0xf] }
  0x20   : > { %v261_v45 = vshll.u32 %v226_v38, 16  ;;  %v267_v46 = vshll.u32 %v227_v39, 16  ;;  %v2012_v51 = vld [vmem:[%s2834_s21 + $0x98] sm:$0xf]  ;;  %382 = vst [vmem:[#allocation2 + $0xc] sm:$0xf] %v2011_v47 }
  0x21   : > { %2199 = vmatpush3.bf16.msra.mxu0 %v2478_v18  ;;  %v246_v49 = vrot.slane %v244_v40, 4  ;;  %v249_v50 = vrot.slane %v247_v41, 5  ;;  %v255_v53 = vrot.slane %v253_v42, 5  ;;  %v260_v54 = vrot.slane %v258_v44, 4  ;;  %383 = vst [vmem:[#allocation2 + $0x30] sm:$0xf] %v2012_v51 }
  0x22   : > { %2239 = vmatpush3.bf16.msra.mxu1 %v2479_v19  ;;  %2200 = vmatprep.subr.bf16.mxu0 %v2480_v20  ;;  %v263_v55 = vrot.slane %v261_v45, 5  ;;  %v269_v59 = vrot.slane %v267_v46, 5  ;;  %v2504_v3 = vld [vmem:[%s3226_s1 + $0x108] sm:$0xff]   ;;  %v191_v4 = vld [vmem:[%s2834_s21 + $0x10] sm:$0xf]  ;;  %v2501_v16 = vld [vmem:[%s3226_s1 + $0x180] sm:$0xff]  }
  0x23   : > { %2240 = vmatprep.subr.bf16.mxu1 %v2481_v21  ;;  %v250_v56 = vor.u32 %v249_v50, %v246_v49  ;;  %v2492_v60 = vld [vmem:[#allocation2] ss:$36 sps:$4 sm:$0xff]   ;;  %v192_v5 = vld [vmem:[%s2834_s21 + $0x18] sm:$0xf]  ;;  %199 = vst [vmem:[#allocation2 + $0x48] sm:$0xf] %v191_v4 }
  0x24   : > { %v264_v58 = vor.u32 %v263_v55, %v260_v54  ;;  %v2005_v6 = vld [vmem:[%s2834_s21 + $0x58] sm:$0xf]  ;;  %v2006_v7 = vld [vmem:[%s2834_s21 + $0x60] sm:$0xf]  ;;  %200 = vst [vmem:[#allocation2 + $0x6c] sm:$0xf] %v192_v5 }
  0x25   : > { %2201 = vmatpush3.bf16.msra.mxu0 %v2482_v22  ;;  %v2494_v61 = vld [vmem:[#allocation2 + $0x4] ss:$36 sps:$4 sm:$0xff]   ;;  %v251_v62 = vrot.slane %v250_v56, 4  ;;  %218 = vst [vmem:[#allocation2 + $0x4c] sm:$0xf] %v2005_v6  ;;  %v2513_v40 = vld [vmem:[%s3226_s1 + $0x110] sm:$0xff]  }
  0x26   : > { %2241 = vmatpush3.bf16.msra.mxu1 %v2483_v23  ;;  %2202 = vmatprep.subr.bf16.mxu0 %v2484_v24  ;;  %v265_v63 = vrot.slane %v264_v58, 4  ;;  %219 = vst [vmem:[#allocation2 + $0x70] sm:$0xf] %v2006_v7  ;;  %v228_v8 = vld [vmem:[%s2834_s21 + $0x10] sm:$0xf]  ;;  %v2503_v21 = vld [vmem:[%s3226_s1 + $0x1c8] sm:$0xff]  }
  0x27   : > { %2242 = vmatprep.subr.bf16.mxu1 %v2485_v25  ;;  %1575 = vmatprep.mubr.bf16.mxu0 %v2494_v61  ;;  %v256_v1 = vsel %vm2857_vm2, %v251_v62, %v255_v53  ;;  %v229_v9 = vld [vmem:[%s2834_s21 + $0x14] sm:$0x1]  ;;  %v230_v10 = vld [vmem:[%s2834_s21 + $0x18] sm:$0xf]  ;;  %v231_v11 = vld [vmem:[%s2834_s21 + $0x1c] sm:$0x1] }
  0x28   : > { %v270_v2 = vsel %vm2857_vm2, %v265_v63, %v269_v59  ;;  %363 = vst [vmem:[#allocation2 + $0x8] sm:$0xf] %v256_v1  ;;  %v272_v12 = vshrl.u32 %v228_v8, 16  ;;  %v275_v13 = vshll.u32 %v228_v8, 16  ;;  %v281_v14 = vshll.u32 %v229_v9, 16  ;;  %v2511_v25 = vld [vmem:[%s3226_s1 + $0x150] sm:$0xff]  }
  0x29   : > { %2203 = vmatpush3.bf16.msra.mxu0 %v2486_v26  ;;  %364 = vst [vmem:[#allocation2 + $0x2c] sm:$0xf] %v270_v2  ;;  %v286_v15 = vshrl.u32 %v230_v10, 16  ;;  %v289_v17 = vshll.u32 %v230_v10, 16  ;;  %v295_v18 = vshll.u32 %v231_v11, 16  ;;  %v2505_v32 = vld [vmem:[%s3226_s1 + $0x188] sm:$0xff]  }
  0x2a   : > { %2243 = vmatpush3.bf16.msra.mxu1 %v2487_v27  ;;  %2204 = vmatprep.subr.bf16.mxu0 %v2488_v28  ;;  %v2013_v19 = vld [vmem:[%s2834_s21 + $0xa0] sm:$0xf]  ;;  %v2014_v20 = vld [vmem:[%s2834_s21 + $0xa8] sm:$0xf]  ;;  %v274_v22 = vrot.slane %v272_v12, 4  ;;  %v277_v23 = vrot.slane %v275_v13, 5 }
  0x2b   : > { %2244 = vmatprep.subr.bf16.mxu1 %v2489_v29  ;;  %v288_v24 = vrot.slane %v286_v15, 4  ;;  %384 = vst [vmem:[#allocation2 + $0x54] sm:$0xf] %v2013_v19  ;;  %385 = vst [vmem:[#allocation2 + $0x78] sm:$0xf] %v2014_v20  ;;  %v291_v28 = vrot.slane %v289_v17, 5 }
  0x2c   : > { %v2497_v27 = vld [vmem:[#allocation2 + $0xc] ss:$36 sps:$4 sm:$0xff]   ;;  %v278_v29 = vor.u32 %v277_v23, %v274_v22  ;;  %v2515_v44 = vld [vmem:[%s3226_s1 + $0x158] sm:$0xff]   ;;  %v194_v50 = vld [vmem:[%s2834_s21 + $0x28] sm:$0xf]  ;;  %s1900_s5 = sshll.u32 %s177_s30, 4  ;;  %s3175_s5 = int_to_ptr.vmem [resolvable:$true] %s1900_s5 }
  0x2d   : > { %2205 = vmatpush3.bf16.msra.mxu0 %v2490_v30  ;;  %v283_v30 = vrot.slane %v281_v14, 5  ;;  %1640 = vmatprep.mubr.bf16.mxu1 %v2497_v27  ;;  %v292_v33 = vor.u32 %v291_v28, %v288_v24  ;;  %v746_v34 = vld [vmem:[#allocation2 + $0x48] sm:$0xff]  ;;  %v2512_v42 = vld [vmem:[%s3226_s1 + $0x1d0] sm:$0xff]   ;;  %v2517_v46 = vld [vmem:[%s3226_s1 + $0x118] sm:$0xff]   ;;  %202 = vst [vmem:[#allocation2 + $0xb4] sm:$0xf] %v194_v50  ;;  %p2585_p1 = scmp.lt.s32.totalorder %s3175_s5, %s2583_s18 }
  0x2e   : > { %2245 = vmatpush3.bf16.msra.mxu1 %v2491_v31  ;;  %2270 = vmatprep.subr.bf16.mxu0 %v2498_v43  ;;  %v297_v31 = vrot.slane %v295_v18, 5  ;;  %v751_v35 = vld [vmem:[#allocation2 + $0x6c] sm:$0xff]  ;;  %v279_v37 = vrot.slane %v278_v29, 4  ;;  %v2516_v47 = vld [vmem:[%s3226_s1 + $0x1d8] sm:$0xff]   ;;  %v2007_v51 = vld [vmem:[%s2834_s21 + $0x68] sm:$0xf] }
  0x2f   : > { %2310 = vmatprep.subr.bf16.mxu1 %v2499_v48  ;;  %v2506_v36 = vld [vmem:[#allocation2 + $0x4c] ss:$36 sps:$4 sm:$0xff]   ;;  %v293_v38 = vrot.slane %v292_v33, 4  ;;  %v2085_v39 = vcombine.low %v746_v34, %v751_v35  ;;  %v193_v48 = vld [vmem:[%s2834_s21 + $0x20] sm:$0xf]  ;;  %v2518_v49 = vld [vmem:[%s3226_s1 + $0x198] sm:$0xff]  }
  0x30   : > { %1576 = vmatmul.mubr.bf16.vlgmr.msra.gmra.mrb[0].mxu0 %v2492_v60  ;;  %v2495_v26 = vld [vmem:[#allocation2 + $0x8] ss:$36 sps:$4 sm:$0xff]   ;;  %v284_v41 = vsel %vm2857_vm2, %v279_v37, %v283_v30  ;;  %v2514_v45 = vld [vmem:[%s3226_s1 + $0x190] sm:$0xff]   ;;  %201 = vst [vmem:[#allocation2 + $0x90] sm:$0xf] %v193_v48  ;;  %v2524_v1 = vld [vmem:[%s3226_s1 + $0x160] sm:$0xff]  }
  0x31   : > { %2271 = vmatpush3.bf16.msra.mxu0 %v2500_v57  ;;  %1641 = vmatmul.mubr.bf16.vlgmr.msra.gmra.mrb[0].mxu1 %v2495_v26  ;;  %v298_v43 = vsel %vm2857_vm2, %v293_v38, %v297_v31  ;;  %365 = vst [vmem:[#allocation2 + $0x50] sm:$0xf] %v284_v41  ;;  %v2008_v53 = vld [vmem:[%s2834_s21 + $0x70] sm:$0xf]  ;;  %220 = vst [vmem:[#allocation2 + $0x94] sm:$0xf] %v2007_v51 }
  0x32   : > { %2272 = vmatprep.subr.bf16.mxu0 %v2502_v0  ;;  %2311 = vmatpush3.bf16.msra.mxu1 %v2501_v16  ;;  %366 = vst [vmem:[#allocation2 + $0x74] sm:$0xf] %v298_v43  ;;  %221 = vst [vmem:[#allocation2 + $0xb8] sm:$0xf] %v2008_v53  ;;  %v232_v54 = vld [vmem:[%s2834_s21 + $0x20] sm:$0xf] }
  0x33   : > { %2312 = vmatprep.subr.bf16.mxu1 %v2503_v21  ;;  %1583 = vmatprep.mubr.bf16.mxu0 %v2506_v36  ;;  %v233_v55 = vld [vmem:[%s2834_s21 + $0x24] sm:$0x1]  ;;  %v234_v56 = vld [vmem:[%s2834_s21 + $0x28] sm:$0xf]  ;;  %v235_v57 = vld [vmem:[%s2834_s21 + $0x2c] sm:$0x1] }
  0x34   : > { %v300_v58 = vshrl.u32 %v232_v54, 16  ;;  %v303_v59 = vshll.u32 %v232_v54, 16  ;;  %v309_v60 = vshll.u32 %v233_v55, 16  ;;  %v314_v61 = vshrl.u32 %v234_v56, 16  ;;  %v2015_v0 = vld [vmem:[%s2834_s21 + $0xb0] sm:$0xf] }
  0x35   : > { %2273 = vmatpush3.bf16.msra.mxu0 %v2504_v3  ;;  %v317_v62 = vshll.u32 %v234_v56, 16  ;;  %v323_v63 = vshll.u32 %v235_v57, 16  ;;  %v2508_v2 = vld [vmem:[#allocation2 + $0x54] ss:$36 sps:$4 sm:$0xff]   ;;  %386 = vst [vmem:[#allocation2 + $0x9c] sm:$0xf] %v2015_v0 }
  0x36   : > { %2274 = vmatprep.subr.bf16.mxu0 %v2511_v25  ;;  %2313 = vmatpush3.bf16.msra.mxu1 %v2505_v32  ;;  %v302_v4 = vrot.slane %v300_v58, 4  ;;  %v305_v5 = vrot.slane %v303_v59, 5  ;;  %v311_v6 = vrot.slane %v309_v60, 5  ;;  %v316_v7 = vrot.slane %v314_v61, 4  ;;  %v2016_v9 = vld [vmem:[%s2834_s21 + $0xb8] sm:$0xf] }
  0x37   : > { %2314 = vmatprep.subr.bf16.mxu1 %v2512_v42  ;;  %v319_v8 = vrot.slane %v317_v62, 5  ;;  %1648 = vmatprep.mubr.bf16.mxu1 %v2508_v2  ;;  %v325_v10 = vrot.slane %v323_v63, 5  ;;  %387 = vst [vmem:[#allocation2 + $0xc0] sm:$0xf] %v2016_v9  ;;  %v2525_v11 = vld [vmem:[%s3226_s1 + $0x1e0] sm:$0xff]   ;;  %v2528_v24 = vld [vmem:[%s3226_s1 + $0x168] sm:$0xff]  }
  0x38   : > { %1584 = vmatmul.mubr.bf16.gmra.mrb[4].mxu0 %v2085_v39  ;;  %v306_v12 = vor.u32 %v305_v5, %v302_v4  ;;  %v756_v14 = vld [vmem:[#allocation2 + $0x90] sm:$0xff]  ;;  %v2526_v20 = vld [vmem:[%s3226_s1 + $0x120] sm:$0xff]   ;;  %v2529_v25 = vld [vmem:[%s3226_s1 + $0x1e8] sm:$0xff]   ;;  %s2578_s9 = scalar_lea.vmem %s3175_s5, 1024 }
  0x39   : > { %2275 = vmatpush3.bf16.msra.mxu0 %v2513_v40  ;;  %v2510_v3 = vld [vmem:[#allocation2 + $0x50] ss:$36 sps:$4 sm:$0xff]   ;;  %v320_v13 = vor.u32 %v319_v8, %v316_v7  ;;  %v2527_v21 = vld [vmem:[%s3226_s1 + $0x1a0] sm:$0xff]   ;;  %v2530_v26 = vld [vmem:[%s3226_s1 + $0x128] sm:$0xff]   ;;  %p2579_p12 = scmp.ne.s32.totalorder %s3175_s5, %s2578_s9  ;;  %p2586_p2 = scmp.lt.s32.totalorder %s2584_s11, %s2578_s9 }
  0x3a   : > { %2276 = vmatprep.subr.bf16.mxu0 %v2515_v44  ;;  %2315 = vmatpush3.bf16.msra.mxu1 %v2514_v45  ;;  %v761_v15 = vld [vmem:[#allocation2 + $0xb4] sm:$0xff]  ;;  %v307_v17 = vrot.slane %v306_v12, 4  ;;  %v2531_v27 = vld [vmem:[%s3226_s1 + $0x1a8] sm:$0xff]   ;;  %v195_v28 = vld [vmem:[%s2834_s21 + $0x30] sm:$0xf] }
  0x3b   : > { %2316 = vmatprep.subr.bf16.mxu1 %v2516_v47  ;;  %1649 = vmatmul.mubr.bf16.gmra.mrb[4].mxu1 %v2510_v3  ;;  %v2519_v16 = vld [vmem:[#allocation2 + $0x94] ss:$36 sps:$4 sm:$0xff]   ;;  %v321_v18 = vrot.slane %v320_v13, 4  ;;  %v2094_v19 = vcombine.low %v756_v14, %v761_v15  ;;  %203 = vst [vmem:[#allocation2 + $0xd8] sm:$0xf] %v195_v28  ;;  %p2580_p13 = pnand %p2579_p12, %p2721_p4  ;;  %p2587_p3 = por %p2586_p2, %p2585_p1 }
  0x3c   : > { %1591 = vmatprep.mubr.bf16.mxu0 %v2519_v16  ;;  %v312_v22 = vsel %vm2857_vm2, %v307_v17, %v311_v6  ;;  %v196_v29 = vld [vmem:[%s2834_s21 + $0x38] sm:$0xf]  ;;  %v2010_v31 = vld [vmem:[%s2834_s21 + $0x80] sm:$0xf]  ;;  %v236_v32 = vld [vmem:[%s2834_s21 + $0x30] sm:$0xf] }
  0x3d   : > { %2277 = vmatpush3.bf16.msra.mxu0 %v2517_v46  ;;  %v326_v23 = vsel %vm2857_vm2, %v321_v18, %v325_v10  ;;  %367 = vst [vmem:[#allocation2 + $0x98] sm:$0xf] %v312_v22  ;;  %v2009_v30 = vld [vmem:[%s2834_s21 + $0x78] sm:$0xf]  ;;  %204 = vst [vmem:[#allocation2 + $0xfc] sm:$0xf] %v196_v29  ;;  %p2581_p0 = pneg %p2580_p13 }
  0x3e   : > { %2278 = vmatprep.subr.bf16.mxu0 %v2524_v1  ;;  %2317 = vmatpush3.bf16.msra.mxu1 %v2518_v49  ;;  %368 = vst [vmem:[#allocation2 + $0xbc] sm:$0xf] %v326_v23  ;;  %222 = vst [vmem:[#allocation2 + $0xdc] sm:$0xf] %v2009_v30  ;;  %v237_v33 = vld [vmem:[%s2834_s21 + $0x34] sm:$0x1] }
  0x3f   : > { %2318 = vmatprep.subr.bf16.mxu1 %v2525_v11  ;;  %223 = vst [vmem:[#allocation2 + $0x100] sm:$0xf] %v2010_v31  ;;  %v238_v34 = vld [vmem:[%s2834_s21 + $0x38] sm:$0xf]  ;;  %v239_v35 = vld [vmem:[%s2834_s21 + $0x3c] sm:$0x1]  ;;  %p2588_p5 = pnand %p2587_p3, %p2581_p0 }
  0x40   : > { %1592 = vmatmul.mubr.bf16.gmra.mrb[8].mxu0 %v2094_v19  ;;  %v328_v36 = vshrl.u32 %v236_v32, 16  ;;  %v331_v37 = vshll.u32 %v236_v32, 16  ;;  %v337_v38 = vshll.u32 %v237_v33, 16  ;;  %v342_v39 = vshrl.u32 %v238_v34, 16  ;;  %v2017_v42 = vld [vmem:[%s2834_s21 + $0xc0] sm:$0xf] }
  0x41   : > { %2279 = vmatpush3.bf16.msra.mxu0 %v2526_v20  ;;  %v345_v40 = vshll.u32 %v238_v34, 16  ;;  %v351_v41 = vshll.u32 %v239_v35, 16  ;;  %v2018_v43 = vld [vmem:[%s2834_s21 + $0xc8] sm:$0xf]  ;;  %v2521_v44 = vld [vmem:[#allocation2 + $0x9c] ss:$36 sps:$4 sm:$0xff]  }
  0x42   : > { %2319 = vmatpush3.bf16.msra.mxu1 %v2527_v21  ;;  %2280 = vmatprep.subr.bf16.mxu0 %v2528_v24  ;;  %v330_v45 = vrot.slane %v328_v36, 4  ;;  %v333_v46 = vrot.slane %v331_v37, 5  ;;  %388 = vst [vmem:[#allocation2 + $0xe4] sm:$0xf] %v2017_v42  ;;  %389 = vst [vmem:[#allocation2 + $0x108] sm:$0xf] %v2018_v43 }
  0x43   : > { %2320 = vmatprep.subr.bf16.mxu1 %v2529_v25  ;;  %v344_v48 = vrot.slane %v342_v39, 4  ;;  %v347_v49 = vrot.slane %v345_v40, 5  ;;  %1656 = vmatprep.mubr.bf16.mxu1 %v2521_v44  ;;  %v339_v51 = vrot.slane %v337_v38, 5  ;;  %v2537_v53 = vld [vmem:[%s3226_s1 + $0x170] sm:$0xff]   ;;  %v353_v55 = vrot.slane %v351_v41, 5  ;;  %v2541_v3 = vld [vmem:[%s3226_s1 + $0x178] sm:$0xff]  }
  0x44   : > { %v334_v50 = vor.u32 %v333_v46, %v330_v45  ;;  %v2538_v56 = vld [vmem:[%s3226_s1 + $0x1f0] sm:$0xff]   ;;  %v2542_v4 = vld [vmem:[%s3226_s1 + $0x1f8] sm:$0xff]   ;;  %v2020_v8 = vld [vmem:[%s2834_s21 + $0xe0] sm:$0xf] }
  0x45   : > { %2281 = vmatpush3.bf16.msra.mxu0 %v2530_v26  ;;  %v2523_v47 = vld [vmem:[#allocation2 + $0x98] ss:$36 sps:$4 sm:$0xff]   ;;  %v348_v54 = vor.u32 %v347_v49, %v344_v48  ;;  %v2539_v63 = vld [vmem:[%s3226_s1 + $0x130] sm:$0xff]   ;;  %402 = vst [vmem:[#allocation2 + $0x34] sm:$0xf] %v2020_v8  ;;  %v3008_v21 = vld [vmem:[%s3226_s1 + $0x200] sm:$0xff]  }
  0x46   : > { %2321 = vmatpush3.bf16.msra.mxu1 %v2531_v27  ;;  %v766_v57 = vld [vmem:[#allocation2 + $0xd8] sm:$0xff]  ;;  %v335_v60 = vrot.slane %v334_v50, 4  ;;  %2282 = vmatprep.subr.bf16.mxu0 %v2537_v53  ;;  %v2540_v1 = vld [vmem:[%s3226_s1 + $0x1b0] sm:$0xff]   ;;  %v2043_v17 = vld [vmem:[%s2834_s21 + $0x8] sm:$0xf] }
  0x47   : > { %1657 = vmatmul.mubr.bf16.gmra.mrb[8].mxu1 %v2523_v47  ;;  %v771_v58 = vld [vmem:[#allocation2 + $0xfc] sm:$0xff]  ;;  %v349_v61 = vrot.slane %v348_v54, 4  ;;  %2322 = vmatprep.subr.bf16.mxu1 %v2538_v56  ;;  %v2019_v7 = vld [vmem:[%s2834_s21 + $0xd8] sm:$0xf]  ;;  %v2027_v9 = vld [vmem:[%s2834_s21 + $0x90] sm:$0xf] }
  0x48   : > { %v2532_v59 = vld [vmem:[#allocation2 + $0xdc] ss:$36 sps:$4 sm:$0xff]   ;;  %v2103_v62 = vcombine.low %v766_v57, %v771_v58  ;;  %v340_v0 = vsel %vm2857_vm2, %v335_v60, %v339_v51  ;;  %401 = vst [vmem:[#allocation2 + $0x10] sm:$0xf] %v2019_v7  ;;  %v2028_v10 = vld [vmem:[%s2834_s21 + $0x94] sm:$0x1] }
  0x49   : > { %1599 = vmatprep.mubr.bf16.mxu0 %v2532_v59  ;;  %v354_v2 = vsel %vm2857_vm2, %v349_v61, %v353_v55  ;;  %369 = vst [vmem:[#allocation2 + $0xe0] sm:$0xf] %v340_v0  ;;  %2283 = vmatpush3.bf16.msra.mxu0 %v2539_v63  ;;  %v2543_v5 = vld [vmem:[%s3226_s1 + $0x138] sm:$0xff]   ;;  %v426_v13 = vshrl.u32 %v2027_v9, 16  ;;  %v429_v14 = vshll.u32 %v2027_v9, 16  ;;  %v435_v15 = vshll.u32 %v2028_v10, 16 }
  0x4a   : > { %1600 = vmatmul.mubr.bf16.gmra.mrb[12].mxu0 %v2103_v62  ;;  %370 = vst [vmem:[#allocation2 + $0x104] sm:$0xf] %v354_v2  ;;  %2323 = vmatpush3.bf16.msra.mxu1 %v2540_v1  ;;  %v2544_v6 = vld [vmem:[%s3226_s1 + $0x1b8] sm:$0xff]   ;;  %v2044_v20 = vld [vmem:[%s2834_s21 + $0x10] sm:$0xf]  ;;  %v3030_v57 = vld [vmem:[%s3226_s1 + $0x208] sm:$0xff]  }
  0x4b   : > { %2284 = vmatprep.subr.bf16.mxu0 %v2541_v3  ;;  %2324 = vmatprep.subr.bf16.mxu1 %v2542_v4  ;;  %v2029_v11 = vld [vmem:[%s2834_s21 + $0x98] sm:$0xf]  ;;  %v2030_v12 = vld [vmem:[%s2834_s21 + $0x9c] sm:$0x1]  ;;  %565 = vst [vmem:[#allocation2 + $0x18] sm:$0xf] %v2043_v17 }
  0x4c   : > { %v440_v16 = vshrl.u32 %v2029_v11, 16  ;;  %v443_v18 = vshll.u32 %v2029_v11, 16  ;;  %v449_v19 = vshll.u32 %v2030_v12, 16  ;;  %v2534_v22 = vld [vmem:[#allocation2 + $0xe4] ss:$36 sps:$4 sm:$0xff]   ;;  %v428_v24 = vrot.slane %v426_v13, 4 }
  0x4d   : > { %2285 = vmatpush3.bf16.msra.mxu0 %v2543_v5  ;;  %566 = vst [vmem:[#allocation2 + $0x3c] sm:$0xf] %v2044_v20  ;;  %v431_v25 = vrot.slane %v429_v14, 5  ;;  %v2051_v28 = vld [vmem:[%s2834_s21 + $0x50] sm:$0xf]  ;;  %1664 = vmatprep.mubr.bf16.mxu1 %v2534_v22  ;;  %v437_v29 = vrot.slane %v435_v15, 5 }
  0x4e   : > { %2325 = vmatpush3.bf16.msra.mxu1 %v2544_v6  ;;  %v442_v26 = vrot.slane %v440_v16, 4  ;;  %v445_v27 = vrot.slane %v443_v18, 5  ;;  %2362 = vmatprep.subr.bf16.mxu0 %v3008_v21  ;;  %v451_v30 = vrot.slane %v449_v19, 5  ;;  %v2052_v31 = vld [vmem:[%s2834_s21 + $0x58] sm:$0xf]  ;;  %v3042_v8 = vld [vmem:[%s3226_s1 + $0x210] sm:$0xff]  }
  0x4f   : > { %2386 = vmatprep.subr.bf16.mxu1 %v3008_v21  ;;  %584 = vst [vmem:[#allocation2 + $0x1c] sm:$0xf] %v2051_v28  ;;  %v432_v32 = vor.u32 %v431_v25, %v428_v24  ;;  %585 = vst [vmem:[#allocation2 + $0x40] sm:$0xf] %v2052_v31  ;;  %v2021_v34 = vld [vmem:[%s2834_s21 + $0xe8] sm:$0xf] }
  0x50   : > { %v446_v33 = vor.u32 %v445_v27, %v442_v26  ;;  %v2022_v35 = vld [vmem:[%s2834_s21 + $0xf0] sm:$0xf]  ;;  %v2031_v36 = vld [vmem:[%s2834_s21 + $0xa0] sm:$0xf]  ;;  %403 = vst [vmem:[#allocation2 + $0x58] sm:$0xf] %v2021_v34 }
  0x51   : > { %v2536_v23 = vld [vmem:[#allocation2 + $0xe0] ss:$36 sps:$4 sm:$0xff]   ;;  %v433_v37 = vrot.slane %v432_v32, 4  ;;  %404 = vst [vmem:[#allocation2 + $0x7c] sm:$0xf] %v2022_v35  ;;  %v454_v42 = vshrl.u32 %v2031_v36, 16 }
  0x52   : > { %1665 = vmatmul.mubr.bf16.gmra.mrb[12].mxu1 %v2536_v23  ;;  %v447_v38 = vrot.slane %v446_v33, 4  ;;  %v2032_v39 = vld [vmem:[%s2834_s21 + $0xa4] sm:$0x1]  ;;  %v2033_v40 = vld [vmem:[%s2834_s21 + $0xa8] sm:$0xf]  ;;  %v457_v43 = vshll.u32 %v2031_v36, 16 }
  0x53   : > { %v2034_v41 = vld [vmem:[%s2834_s21 + $0xac] sm:$0x1]  ;;  %v463_v44 = vshll.u32 %v2032_v39, 16  ;;  %v468_v45 = vshrl.u32 %v2033_v40, 16  ;;  %v438_v46 = vsel %vm2857_vm2, %v433_v37, %v437_v29  ;;  %v471_v48 = vshll.u32 %v2033_v40, 16  ;;  %v3054_v24 = vld [vmem:[%s3226_s1 + $0x218] sm:$0xff]  }
  0x54   : > { %v452_v47 = vsel %vm2857_vm2, %v447_v38, %v451_v30  ;;  %v477_v49 = vshll.u32 %v2034_v41, 16  ;;  %v2045_v50 = vld [vmem:[%s2834_s21 + $0x18] sm:$0xf]  ;;  %v2046_v51 = vld [vmem:[%s2834_s21 + $0x20] sm:$0xf]  ;;  %v456_v53 = vrot.slane %v454_v42, 4 }
  0x55   : > { %545 = vst [vmem:[#allocation2 + $0x14] sm:$0xf] %v438_v46  ;;  %546 = vst [vmem:[#allocation2 + $0x38] sm:$0xf] %v452_v47  ;;  %v459_v54 = vrot.slane %v457_v43, 5  ;;  %v470_v55 = vrot.slane %v468_v45, 4 }
  0x56   : > { %567 = vst [vmem:[#allocation2 + $0x60] sm:$0xf] %v2045_v50  ;;  %568 = vst [vmem:[#allocation2 + $0x84] sm:$0xf] %v2046_v51  ;;  %v2053_v56 = vld [vmem:[%s2834_s21 + $0x60] sm:$0xf] }
  0x57   : > { %v465_v58 = vrot.slane %v463_v44, 5  ;;  %v473_v59 = vrot.slane %v471_v48, 5  ;;  %v2054_v60 = vld [vmem:[%s2834_s21 + $0x68] sm:$0xf]  ;;  %586 = vst [vmem:[#allocation2 + $0x64] sm:$0xf] %v2053_v56  ;;  %v460_v63 = vor.u32 %v459_v54, %v456_v53 }
  0x58   : > { %v2548_v61 = vld [vmem:[#allocation2 + $0x18] ss:$36 sps:$4 sm:$0xff]   ;;  %v479_v0 = vrot.slane %v477_v49, 5  ;;  %587 = vst [vmem:[#allocation2 + $0x88] sm:$0xf] %v2054_v60  ;;  %v3067_v39 = vld [vmem:[%s3226_s1 + $0x220] sm:$0xff]  }
  0x59   : > { %v2550_v62 = vld [vmem:[#allocation2 + $0x1c] ss:$36 sps:$4 sm:$0xff]   ;;  %v474_v1 = vor.u32 %v473_v59, %v470_v55  ;;  %v461_v2 = vrot.slane %v460_v63, 4  ;;  %v2023_v3 = vld [vmem:[%s2834_s21 + $0xf8] sm:$0xf]  ;;  %v3089_v60 = vld [vmem:[%s3226_s1 + $0x228] sm:$0xff]  }
  0x5a   : > { %1770 = vmatprep.mubr.bf16.mxu1 %v2550_v62  ;;  %v2024_v5 = vld [vmem:[%s2834_s21 + $0x100] sm:$0xf]  ;;  %405 = vst [vmem:[#allocation2 + $0xa0] sm:$0xf] %v2023_v3  ;;  %v2035_v6 = vld [vmem:[%s2834_s21 + $0xb0] sm:$0xf] }
  0x5b   : > { %1771 = vmatmul.mubr.bf16.vlgmr.msra.gmra.mrb[16].mxu1 %v2548_v61  ;;  %v475_v4 = vrot.slane %v474_v1, 4  ;;  %v466_v7 = vsel %vm2857_vm2, %v461_v2, %v465_v58  ;;  %406 = vst [vmem:[#allocation2 + $0xc4] sm:$0xf] %v2024_v5  ;;  %v2036_v9 = vld [vmem:[%s2834_s21 + $0xb4] sm:$0x1]  ;;  %v482_v14 = vshrl.u32 %v2035_v6, 16 }
  0x5c   : > { %2394 = vmatpush3.bf16.msra.mxu1 %v3008_v21  ;;  %v2037_v10 = vld [vmem:[%s2834_s21 + $0xb8] sm:$0xf]  ;;  %v2038_v11 = vld [vmem:[%s2834_s21 + $0xbc] sm:$0x1]  ;;  %v2545_v12 = vld [vmem:[#allocation2 + $0x10] ss:$36 sps:$4 sm:$0xff]  }
  0x5d   : > { %2387 = vmatprep.subr.bf16.mxu1 %v3030_v57  ;;  %v480_v13 = vsel %vm2857_vm2, %v475_v4, %v479_v0  ;;  %547 = vst [vmem:[#allocation2 + $0x5c] sm:$0xf] %v466_v7  ;;  %v485_v15 = vshll.u32 %v2035_v6, 16  ;;  %v2547_v16 = vld [vmem:[#allocation2 + $0x14] ss:$36 sps:$4 sm:$0xff]   ;;  %v491_v17 = vshll.u32 %v2036_v9, 16 }
  0x5e   : > { %548 = vst [vmem:[#allocation2 + $0x80] sm:$0xf] %v480_v13  ;;  %v496_v18 = vshrl.u32 %v2037_v10, 16  ;;  %v499_v19 = vshll.u32 %v2037_v10, 16  ;;  %v2557_v22 = vld [vmem:[#allocation2 + $0x60] ss:$36 sps:$4 sm:$0xff]   ;;  %1705 = vmatprep.mubr.bf16.mxu0 %v2547_v16 }
  0x5f   : > { %v2555_v20 = vld [vmem:[#allocation2 + $0x64] ss:$36 sps:$4 sm:$0xff]   ;;  %v484_v23 = vrot.slane %v482_v14, 4  ;;  %v487_v25 = vrot.slane %v485_v15, 5  ;;  %1706 = vmatmul.mubr.bf16.vlgmr.msra.gmra.mrb[16].mxu0 %v2545_v12  ;;  %v493_v29 = vrot.slane %v491_v17, 5  ;;  %v505_v30 = vshll.u32 %v2038_v11, 16 }
  0x60   : > { %2395 = vmatpush3.bf16.msra.mxu1 %v3030_v57  ;;  %v498_v26 = vrot.slane %v496_v18, 4  ;;  %v501_v27 = vrot.slane %v499_v19, 5  ;;  %v2047_v28 = vld [vmem:[%s2834_s21 + $0x28] sm:$0xf]  ;;  %1778 = vmatprep.mubr.bf16.mxu1 %v2555_v20  ;;  %v2048_v31 = vld [vmem:[%s2834_s21 + $0x30] sm:$0xf] }
  0x61   : > { %569 = vst [vmem:[#allocation2 + $0xa8] sm:$0xf] %v2047_v28  ;;  %v2055_v32 = vld [vmem:[%s2834_s21 + $0x70] sm:$0xf]  ;;  %2363 = vmatpush3.bf16.msra.mxu0 %v3008_v21  ;;  %2388 = vmatprep.subr.bf16.mxu1 %v3042_v8  ;;  %v488_v33 = vor.u32 %v487_v25, %v484_v23  ;;  %570 = vst [vmem:[#allocation2 + $0xcc] sm:$0xf] %v2048_v31 }
  0x62   : > { %v502_v34 = vor.u32 %v501_v27, %v498_v26  ;;  %v2056_v35 = vld [vmem:[%s2834_s21 + $0x78] sm:$0xf]  ;;  %588 = vst [vmem:[#allocation2 + $0xac] sm:$0xf] %v2055_v32  ;;  %2364 = vmatprep.subr.bf16.mxu0 %v3030_v57  ;;  %v507_v36 = vrot.slane %v505_v30, 5  ;;  %v3100_v10 = vld [vmem:[%s3226_s1 + $0x230] sm:$0xff]  }
  0x63   : > { %1779 = vmatmul.mubr.bf16.gmra.mrb[20].mxu1 %v2557_v22  ;;  %589 = vst [vmem:[#allocation2 + $0xd0] sm:$0xf] %v2056_v35  ;;  %v489_v21 = vrot.slane %v488_v33, 4  ;;  %v2025_v40 = vld [vmem:[%s2834_s21 + $0x108] sm:$0xf] }
  0x64   : > { %v748_v37 = vld [vmem:[#allocation2 + $0x58] sm:$0xff]  ;;  %2396 = vmatpush3.bf16.msra.mxu1 %v3042_v8  ;;  %v503_v38 = vrot.slane %v502_v34, 4  ;;  %v2026_v43 = vld [vmem:[%s2834_s21 + $0x110] sm:$0xf]  ;;  %407 = vst [vmem:[#allocation2 + $0xe8] sm:$0xf] %v2025_v40 }
  0x65   : > { %v753_v41 = vld [vmem:[#allocation2 + $0x7c] sm:$0xff]  ;;  %2389 = vmatprep.subr.bf16.mxu1 %v3054_v24  ;;  %2365 = vmatpush3.bf16.msra.mxu0 %v3030_v57  ;;  %v494_v45 = vsel %vm2857_vm2, %v489_v21, %v493_v29  ;;  %408 = vst [vmem:[#allocation2 + $0x10c] sm:$0xf] %v2026_v43  ;;  %v2040_v48 = vld [vmem:[%s2834_s21 + $0xc4] sm:$0x1] }
  0x66   : > { %v2553_v42 = vld [vmem:[#allocation2 + $0x5c] ss:$36 sps:$4 sm:$0xff]   ;;  %v2089_v44 = vcombine.low %v748_v37, %v753_v41  ;;  %v508_v46 = vsel %vm2857_vm2, %v503_v38, %v507_v36  ;;  %v2041_v49 = vld [vmem:[%s2834_s21 + $0xc8] sm:$0xf]  ;;  %2366 = vmatprep.subr.bf16.mxu0 %v3042_v8  ;;  %549 = vst [vmem:[#allocation2 + $0xa4] sm:$0xf] %v494_v45 }
  0x67   : > { %v2039_v47 = vld [vmem:[%s2834_s21 + $0xc0] sm:$0xf]  ;;  %1713 = vmatprep.mubr.bf16.mxu0 %v2553_v42  ;;  %550 = vst [vmem:[#allocation2 + $0xc8] sm:$0xf] %v508_v46  ;;  %v2042_v50 = vld [vmem:[%s2834_s21 + $0xcc] sm:$0x1] }
  0x68   : > { %v510_v51 = vshrl.u32 %v2039_v47, 16  ;;  %v513_v53 = vshll.u32 %v2039_v47, 16  ;;  %v519_v54 = vshll.u32 %v2040_v48, 16  ;;  %v524_v55 = vshrl.u32 %v2041_v49, 16  ;;  %2397 = vmatpush3.bf16.msra.mxu1 %v3054_v24  ;;  %v2049_v58 = vld [vmem:[%s2834_s21 + $0x38] sm:$0xf]  ;;  %1714 = vmatmul.mubr.bf16.gmra.mrb[20].mxu0 %v2089_v44 }
  0x69   : > { %v527_v56 = vshll.u32 %v2041_v49, 16  ;;  %v533_v57 = vshll.u32 %v2042_v50, 16  ;;  %v2050_v59 = vld [vmem:[%s2834_s21 + $0x40] sm:$0xf]  ;;  %2390 = vmatprep.subr.bf16.mxu1 %v3067_v39  ;;  %571 = vst [vmem:[#allocation2 + $0xf0] sm:$0xf] %v2049_v58  ;;  %2367 = vmatpush3.bf16.msra.mxu0 %v3042_v8 }
  0x6a   : > { %v512_v61 = vrot.slane %v510_v51, 4  ;;  %v515_v62 = vrot.slane %v513_v53, 5  ;;  %v526_v63 = vrot.slane %v524_v55, 4  ;;  %572 = vst [vmem:[#allocation2 + $0x114] sm:$0xf] %v2050_v59  ;;  %2368 = vmatprep.subr.bf16.mxu0 %v3054_v24  ;;  %v521_v4 = vrot.slane %v519_v54, 5 }
  0x6b   : > { %v2562_v0 = vld [vmem:[#allocation2 + $0xac] ss:$36 sps:$4 sm:$0xff]   ;;  %v529_v2 = vrot.slane %v527_v56, 5  ;;  %v535_v5 = vrot.slane %v533_v57, 5  ;;  %v2057_v6 = vld [vmem:[%s2834_s21 + $0x80] sm:$0xf] }
  0x6c   : > { %v2564_v1 = vld [vmem:[#allocation2 + $0xa8] ss:$36 sps:$4 sm:$0xff]   ;;  %v516_v3 = vor.u32 %v515_v62, %v512_v61  ;;  %1786 = vmatprep.mubr.bf16.mxu1 %v2562_v0  ;;  %2398 = vmatpush3.bf16.msra.mxu1 %v3067_v39  ;;  %590 = vst [vmem:[#allocation2 + $0xf4] sm:$0xf] %v2057_v6  ;;  %v2061_v20 = vld [vmem:[%s2834_s21 + $0x10] sm:$0xf] }
  0x6d   : > { %v2058_v7 = vld [vmem:[%s2834_s21 + $0x88] sm:$0xf]  ;;  %v530_v9 = vor.u32 %v529_v2, %v526_v63  ;;  %1787 = vmatmul.mubr.bf16.gmra.mrb[24].mxu1 %v2564_v1  ;;  %2391 = vmatprep.subr.bf16.mxu1 %v3089_v60  ;;  %v758_v12 = vld [vmem:[#allocation2 + $0xa0] sm:$0xff]  ;;  %v2060_v19 = vld [vmem:[%s2834_s21 + $0xc] sm:$0x1]  ;;  %v623_v29 = vshrl.u32 %v2061_v20, 16 }
  0x6e   : > { %591 = vst [vmem:[#allocation2 + $0x118] sm:$0xf] %v2058_v7  ;;  %v517_v8 = vrot.slane %v516_v3, 4  ;;  %v2059_v11 = vld [vmem:[%s2834_s21 + $0x8] sm:$0xf]  ;;  %2369 = vmatpush3.bf16.msra.mxu0 %v3054_v24  ;;  %v3116_v24 = vld [vmem:[%s3226_s1 + $0x238] sm:$0xff]  }
  0x6f   : > { %v763_v13 = vld [vmem:[#allocation2 + $0xc4] sm:$0xff]  ;;  %v531_v15 = vrot.slane %v530_v9, 4  ;;  %v609_v16 = vshrl.u32 %v2059_v11, 16  ;;  %2370 = vmatprep.subr.bf16.mxu0 %v3067_v39  ;;  %v2062_v22 = vld [vmem:[%s2834_s21 + $0x14] sm:$0x1]  ;;  %v612_v26 = vshll.u32 %v2059_v11, 16 }
  0x70   : > { %v2560_v14 = vld [vmem:[#allocation2 + $0xa4] ss:$36 sps:$4 sm:$0xff]   ;;  %v2098_v17 = vcombine.low %v758_v12, %v763_v13  ;;  %v522_v18 = vsel %vm2857_vm2, %v517_v8, %v521_v4  ;;  %2399 = vmatpush3.bf16.msra.mxu1 %v3089_v60  ;;  %v618_v27 = vshll.u32 %v2060_v19, 16  ;;  %v626_v30 = vshll.u32 %v2061_v20, 16  ;;  %v2068_v32 = vld [vmem:[%s2834_s21 + $0x2c] sm:$0x1] }
  0x71   : > { %1721 = vmatprep.mubr.bf16.mxu0 %v2560_v14  ;;  %v536_v23 = vsel %vm2857_vm2, %v531_v15, %v535_v5  ;;  %551 = vst [vmem:[#allocation2 + $0xec] sm:$0xf] %v522_v18  ;;  %v611_v25 = vrot.slane %v609_v16, 4  ;;  %v2067_v28 = vld [vmem:[%s2834_s21 + $0x28] sm:$0xf]  ;;  %2392 = vmatprep.subr.bf16.mxu1 %v3100_v10  ;;  %v632_v31 = vshll.u32 %v2062_v22, 16 }
  0x72   : > { %1722 = vmatmul.mubr.bf16.gmra.mrb[24].mxu0 %v2098_v17  ;;  %552 = vst [vmem:[#allocation2 + $0x110] sm:$0xf] %v536_v23  ;;  %v665_v33 = vshrl.u32 %v2067_v28, 16  ;;  %v614_v34 = vrot.slane %v612_v26, 5  ;;  %v620_v35 = vrot.slane %v618_v27, 5  ;;  %v625_v38 = vrot.slane %v623_v29, 4 }
  0x73   : > { %2371 = vmatpush3.bf16.msra.mxu0 %v3067_v39  ;;  %v2069_v36 = vld [vmem:[%s2834_s21 + $0x30] sm:$0xf]  ;;  %v2070_v37 = vld [vmem:[%s2834_s21 + $0x34] sm:$0x1]  ;;  %v628_v40 = vrot.slane %v626_v30, 5  ;;  %v634_v43 = vrot.slane %v632_v31, 5 }
  0x74   : > { %2372 = vmatprep.subr.bf16.mxu0 %v3089_v60  ;;  %v2571_v41 = vld [vmem:[#allocation2 + $0xf0] ss:$36 sps:$4 sm:$0xff]   ;;  %2400 = vmatpush3.bf16.msra.mxu1 %v3100_v10  ;;  %v615_v42 = vor.u32 %v614_v34, %v611_v25  ;;  %v667_v44 = vrot.slane %v665_v33, 4  ;;  %v668_v45 = vshll.u32 %v2067_v28, 16  ;;  %v674_v46 = vshll.u32 %v2068_v32, 16 }
  0x75   : > { %v2569_v21 = vld [vmem:[#allocation2 + $0xf4] ss:$36 sps:$4 sm:$0xff]   ;;  %2393 = vmatprep.subr.bf16.mxu1 %v3116_v24  ;;  %v629_v39 = vor.u32 %v628_v40, %v625_v38  ;;  %v679_v47 = vshrl.u32 %v2069_v36, 16  ;;  %v682_v48 = vshll.u32 %v2069_v36, 16  ;;  %v688_v53 = vshll.u32 %v2070_v37, 16 }
  0x76   : > { %1794 = vmatprep.mubr.bf16.mxu1 %v2569_v21  ;;  %v2063_v49 = vld [vmem:[%s2834_s21 + $0x18] sm:$0xf]  ;;  %v616_v50 = vrot.slane %v615_v42, 4  ;;  %v670_v51 = vrot.slane %v668_v45, 5  ;;  %v2064_v54 = vld [vmem:[%s2834_s21 + $0x1c] sm:$0x1] }
  0x77   : > { %2373 = vmatpush3.bf16.msra.mxu0 %v3089_v60  ;;  %1795 = vmatmul.mubr.bf16.gmra.mrb[28].mxu1 %v2571_v41  ;;  %v637_v55 = vshrl.u32 %v2063_v49, 16  ;;  %v630_v57 = vrot.slane %v629_v39, 4  ;;  %v676_v58 = vrot.slane %v674_v46, 5  ;;  %v681_v59 = vrot.slane %v679_v47, 4  ;;  %v2065_v2 = vld [vmem:[%s2834_s21 + $0x20] sm:$0xf] }
  0x78   : > { %v768_v56 = vld [vmem:[#allocation2 + $0xe8] sm:$0xff]  ;;  %2374 = vmatprep.subr.bf16.mxu0 %v3100_v10  ;;  %v684_v61 = vrot.slane %v682_v48, 5  ;;  %2401 = vmatpush3.bf16.msra.mxu1 %v3116_v24  ;;  %v621_v60 = vsel %vm2857_vm2, %v616_v50, %v620_v35  ;;  %v671_v0 = vor.u32 %v670_v51, %v667_v44  ;;  %v690_v1 = vrot.slane %v688_v53, 5  ;;  %v2066_v6 = vld [vmem:[%s2834_s21 + $0x24] sm:$0x1] }
  0x79   : > { %v773_v62 = vld [vmem:[#allocation2 + $0x10c] sm:$0xff]  ;;  %v635_v4 = vsel %vm2857_vm2, %v630_v57, %v634_v43  ;;  %728 = vst [vmem:[#allocation2 + $0x20] sm:$0xf] %v621_v60  ;;  %v639_v7 = vrot.slane %v637_v55, 4  ;;  %v2071_v9 = vld [vmem:[%s2834_s21 + $0x38] sm:$0xf] }
  0x7a   : > { %v2567_v63 = vld [vmem:[#allocation2 + $0xec] ss:$36 sps:$4 sm:$0xff]   ;;  %v2107_v3 = vcombine.low %v768_v56, %v773_v62  ;;  %v685_v5 = vor.u32 %v684_v61, %v681_v59  ;;  %729 = vst [vmem:[#allocation2 + $0x44] sm:$0xf] %v635_v4  ;;  %v672_v8 = vrot.slane %v671_v0, 4  ;;  %v640_v11 = vshll.u32 %v2063_v49, 16 }
  0x7b   : > { %1729 = vmatprep.mubr.bf16.mxu0 %v2567_v63  ;;  %2375 = vmatpush3.bf16.msra.mxu0 %v3100_v10  ;;  %v646_v12 = vshll.u32 %v2064_v54, 16  ;;  %v651_v13 = vshrl.u32 %v2065_v2, 16  ;;  %v2072_v14 = vld [vmem:[%s2834_s21 + $0x3c] sm:$0x1]  ;;  %v654_v16 = vshll.u32 %v2065_v2, 16  ;;  %v660_v17 = vshll.u32 %v2066_v6, 16 }
  0x7c   : > { %1730 = vmatmul.mubr.bf16.gmra.mrb[28].mxu0 %v2107_v3  ;;  %2376 = vmatprep.subr.bf16.mxu0 %v3116_v24  ;;  %v686_v15 = vrot.slane %v685_v5, 4  ;;  %v2073_v18 = vld [vmem:[%s2834_s21 + $0x40] sm:$0xf]  ;;  %v693_v19 = vshrl.u32 %v2071_v9, 16  ;;  %v677_v20 = vsel %vm2857_vm2, %v672_v8, %v676_v58  ;;  %v642_v22 = vrot.slane %v640_v11, 5 }
  0x7d   : > { %v653_v10 = vrot.slane %v651_v13, 4  ;;  %v2074_v23 = vld [vmem:[%s2834_s21 + $0x44] sm:$0x1]  ;;  %732 = vst [vmem:[#allocation2 + $0xb0] sm:$0xf] %v677_v20  ;;  %v648_v26 = vrot.slane %v646_v12, 5 }
  0x7e   : > { %v691_v25 = vsel %vm2857_vm2, %v686_v15, %v690_v1  ;;  %v656_v27 = vrot.slane %v654_v16, 5  ;;  %v695_v28 = vrot.slane %v693_v19, 4  ;;  %v643_v29 = vor.u32 %v642_v22, %v639_v7  ;;  %v2075_v62 = vld [vmem:[%s3227_s2] ss:$0 sm:$0xff] }
  0x7f   : > { %2377 = vmatpush3.bf16.msra.mxu0 %v3116_v24  ;;  %733 = vst [vmem:[#allocation2 + $0xd4] sm:$0xf] %v691_v25  ;;  %v696_v30 = vshll.u32 %v2071_v9, 16  ;;  %v702_v31 = vshll.u32 %v2072_v14, 16  ;;  %v707_v32 = vshrl.u32 %v2073_v18, 16  ;;  %v662_v34 = vrot.slane %v660_v17, 5 }
  0x80   : > { %v657_v33 = vor.u32 %v656_v27, %v653_v10  ;;  %v710_v35 = vshll.u32 %v2073_v18, 16  ;;  %v716_v36 = vshll.u32 %v2074_v23, 16  ;;  %v644_v37 = vrot.slane %v643_v29, 4 }
  0x81   : > { %v698_v21 = vrot.slane %v696_v30, 5  ;;  %v709_v38 = vrot.slane %v707_v32, 4  ;;  %v2574_v40 = vld [vmem:[#allocation2 + $0x20] ss:$36 sps:$4 sm:$0xff]   ;;  %v704_v24 = vrot.slane %v702_v31, 5 }
  0x82   : > { %v658_v41 = vrot.slane %v657_v33, 4  ;;  %v712_v42 = vrot.slane %v710_v35, 5  ;;  %v649_v43 = vsel %vm2857_vm2, %v644_v37, %v648_v26  ;;  %2378 = vmatprep.mubr.bf16.mxu0 %v2574_v40  ;;  %v718_v46 = vrot.slane %v716_v36, 5 }
  0x83   : > { %v699_v44 = vor.u32 %v698_v21, %v695_v28  ;;  %730 = vst [vmem:[#allocation2 + $0x68] sm:$0xf] %v649_v43 }
  0x84   : > { %v663_v45 = vsel %vm2857_vm2, %v658_v41, %v662_v34  ;;  %v713_v39 = vor.u32 %v712_v42, %v709_v38 }
  0x85   : > { %731 = vst [vmem:[#allocation2 + $0x8c] sm:$0xf] %v663_v45  ;;  %v700_v47 = vrot.slane %v699_v44, 4 }
  0x86   : > { %v2575_v48 = vld [vmem:[#allocation2 + $0xb0] ss:$36 sps:$4 sm:$0xff]   ;;  %v714_v49 = vrot.slane %v713_v39, 4 }
  0x87   : > { %v705_v50 = vsel %vm2857_vm2, %v700_v47, %v704_v24  ;;  %2382 = vmatprep.mubr.bf16.mxu1 %v2575_v48 }
  0x88   : > { %v719_v51 = vsel %vm2857_vm2, %v714_v49, %v718_v46  ;;  %734 = vst [vmem:[#allocation2 + $0xf8] sm:$0xf] %v705_v50 }
  0x89   : > { %735 = vst [vmem:[#allocation2 + $0x11c] sm:$0xf] %v719_v51 }
  0x8c   : > { %v2576_v53 = vld [vmem:[#allocation2 + $0x68] ss:$36 sps:$4 sm:$0xff]  }
  0x8d   : > { %2379 = vmatmul.mubr.bf16.vlgmr.msra.gmra.mrb[32].mxu0 %v2576_v53 }
  0x90   : > { %v2577_v54 = vld [vmem:[#allocation2 + $0xf8] ss:$36 sps:$4 sm:$0xff]  }
  0x91   : > { %2383 = vmatmul.mubr.bf16.vlgmr.msra.gmra.mrb[32].mxu1 %v2577_v54 }
 0x103   : > { %v2206_v55 = vpop.f32.mrb[0].mxu0 }
 0x104   : > { %v2207_v56 = vpop.f32.mrb[1].mxu0  ;;  %v2246_v63 = vpop.f32.mrb[0].mxu1 }
 0x105   : > { %v2208_v57 = vadd.f32 %v2207_v56, %v2206_v55  ;;  %v2209_v58 = vpop.f32.mrb[2].mxu0  ;;  %v2247_v52 = vpop.f32.mrb[1].mxu1 }
 0x106   : > { %v2210_v59 = vpop.f32.mrb[3].mxu0  ;;  %v2248_v0 = vadd.f32 %v2247_v52, %v2246_v63  ;;  %v2249_v1 = vpop.f32.mrb[2].mxu1 }
 0x107   : > { %v2211_v61 = vadd.f32 %v2210_v59, %v2209_v58  ;;  %v1578_v60 = vadd.f32 %v2208_v57, %v2075_v62  ;;  %v2250_v3 = vpop.f32.mrb[3].mxu1 }
 0x108   : > { %v2251_v6 = vadd.f32 %v2250_v3, %v2249_v1 }
 0x109   : > { %v1581_v2 = vadd.f32 %v2211_v61, %v2075_v62  ;;  %v3160_v5 = vadd.f32 %v2248_v0, %v1578_v60 }
 0x10b   : > { %v2212_v4 = vpop.f32.mrb[4].mxu0  ;;  %v3162_v11 = vadd.f32 %v2251_v6, %v1581_v2 }
 0x10c   : > { %v2213_v7 = vpop.f32.mrb[5].mxu0 }
 0x10d   : > { %v2214_v9 = vadd.f32 %v2213_v7, %v2212_v4  ;;  %v2215_v8 = vpop.f32.mrb[6].mxu0 }
 0x10e   : > { %v2216_v12 = vpop.f32.mrb[7].mxu0  ;;  %v2252_v14 = vpop.f32.mrb[4].mxu1 }
 0x10f   : > { %v2217_v13 = vadd.f32 %v2216_v12, %v2215_v8  ;;  %v1586_v15 = vadd.f32 %v2214_v9, %v2075_v62  ;;  %v2253_v16 = vpop.f32.mrb[5].mxu1 }
 0x110   : > { %v2254_v17 = vadd.f32 %v2253_v16, %v2252_v14  ;;  %v2255_v18 = vpop.f32.mrb[6].mxu1 }
 0x111   : > { %v1589_v19 = vadd.f32 %v2217_v13, %v2075_v62  ;;  %v2256_v20 = vpop.f32.mrb[7].mxu1 }
 0x112   : > { %v1651_v22 = vadd.f32 %v2254_v17, %v1586_v15  ;;  %v2257_v10 = vadd.f32 %v2256_v20, %v2255_v18 }
 0x113   : > { %v2218_v23 = vpop.f32.mrb[8].mxu0 }
 0x114   : > { %v2219_v25 = vpop.f32.mrb[9].mxu0  ;;  %v1654_v26 = vadd.f32 %v2257_v10, %v1589_v19 }
 0x115   : > { %v2220_v27 = vadd.f32 %v2219_v25, %v2218_v23  ;;  %v2221_v28 = vpop.f32.mrb[10].mxu0 }
 0x116   : > { %v2222_v29 = vpop.f32.mrb[11].mxu0 }
 0x117   : > { %v2223_v30 = vadd.f32 %v2222_v29, %v2221_v28  ;;  %v1594_v32 = vadd.f32 %v2220_v27, %v2075_v62 }
 0x119   : > { %v1597_v36 = vadd.f32 %v2223_v30, %v2075_v62 }
 0x11a   : > { %v2258_v31 = vpop.f32.mrb[8].mxu1 }
 0x11b   : > { %v2259_v33 = vpop.f32.mrb[9].mxu1 }
 0x11c   : > { %v2260_v34 = vadd.f32 %v2259_v33, %v2258_v31  ;;  %v2261_v35 = vpop.f32.mrb[10].mxu1 }
 0x11d   : > { %v2262_v37 = vpop.f32.mrb[11].mxu1  ;;  %v2224_v40 = vpop.f32.mrb[12].mxu0 }
 0x11e   : > { %v1659_v21 = vadd.f32 %v2260_v34, %v1594_v32  ;;  %v2263_v38 = vadd.f32 %v2262_v37, %v2261_v35  ;;  %v2225_v41 = vpop.f32.mrb[13].mxu0 }
 0x11f   : > { %v2226_v43 = vadd.f32 %v2225_v41, %v2224_v40  ;;  %v2227_v44 = vpop.f32.mrb[14].mxu0 }
 0x120   : > { %v1662_v42 = vadd.f32 %v2263_v38, %v1597_v36  ;;  %v2228_v24 = vpop.f32.mrb[15].mxu0 }
 0x121   : > { %v2229_v45 = vadd.f32 %v2228_v24, %v2227_v44  ;;  %v1602_v46 = vadd.f32 %v2226_v43, %v2075_v62 }
 0x123   : > { %v1605_v50 = vadd.f32 %v2229_v45, %v2075_v62 }
 0x125   : > { %v2264_v39 = vpop.f32.mrb[12].mxu1 }
 0x126   : > { %v2265_v47 = vpop.f32.mrb[13].mxu1 }
 0x127   : > { %v2266_v48 = vadd.f32 %v2265_v47, %v2264_v39  ;;  %v2267_v49 = vpop.f32.mrb[14].mxu1 }
 0x128   : > { %v2268_v51 = vpop.f32.mrb[15].mxu1 }
 0x129   : > { %v1667_v53 = vadd.f32 %v2266_v48, %v1602_v46  ;;  %v2269_v54 = vadd.f32 %v2268_v51, %v2267_v49 }
 0x12b   : > { %v1670_v55 = vadd.f32 %v2269_v54, %v1605_v50 }
 0x12e   : > { %v2326_v56 = vpop.f32.mrb[16].mxu1 }
 0x12f   : > { %v2327_v57 = vpop.f32.mrb[17].mxu1 }
 0x130   : > { %v2328_v58 = vadd.f32 %v2327_v57, %v2326_v56  ;;  %v2329_v59 = vpop.f32.mrb[18].mxu1 }
 0x131   : > { %v2330_v61 = vpop.f32.mrb[19].mxu1 }
 0x132   : > { %v2331_v63 = vadd.f32 %v2330_v61, %v2329_v59  ;;  %v2286_v60 = vpop.f32.mrb[16].mxu0 }
 0x133   : > { %v2287_v52 = vpop.f32.mrb[17].mxu0 }
 0x134   : > { %v2288_v0 = vadd.f32 %v2287_v52, %v2286_v60  ;;  %v2289_v1 = vpop.f32.mrb[18].mxu0 }
 0x135   : > { %v2290_v3 = vpop.f32.mrb[19].mxu0 }
 0x136   : > { %v2332_v2 = vpop.f32.mrb[20].mxu1  ;;  %v1708_v6 = vadd.f32 %v2288_v0, %v3160_v5  ;;  %v2291_v62 = vadd.f32 %v2290_v3, %v2289_v1 }
 0x137   : > { %v2333_v4 = vpop.f32.mrb[21].mxu1 }
 0x138   : > { %v2334_v7 = vadd.f32 %v2333_v4, %v2332_v2  ;;  %v2335_v9 = vpop.f32.mrb[22].mxu1  ;;  %v1711_v12 = vadd.f32 %v2291_v62, %v3162_v11  ;;  %v1773_v14 = vadd.f32 %v2328_v58, %v1708_v6 }
 0x139   : > { %v2336_v8 = vpop.f32.mrb[23].mxu1 }
 0x13a   : > { %v2337_v13 = vadd.f32 %v2336_v8, %v2335_v9  ;;  %v1776_v16 = vadd.f32 %v2331_v63, %v1711_v12 }
 0x13b   : > { %v2292_v15 = vpop.f32.mrb[20].mxu0 }
 0x13c   : > { %v2293_v17 = vpop.f32.mrb[21].mxu0 }
 0x13d   : > { %v2294_v18 = vadd.f32 %v2293_v17, %v2292_v15  ;;  %v2295_v19 = vpop.f32.mrb[22].mxu0 }
 0x13e   : > { %v2296_v20 = vpop.f32.mrb[23].mxu0 }
 0x13f   : > { %v1716_v10 = vadd.f32 %v2294_v18, %v1651_v22  ;;  %v2297_v23 = vadd.f32 %v2296_v20, %v2295_v19 }
 0x140   : > { %v2338_v25 = vpop.f32.mrb[24].mxu1 }
 0x141   : > { %v2339_v27 = vpop.f32.mrb[25].mxu1  ;;  %v1719_v28 = vadd.f32 %v2297_v23, %v1654_v26  ;;  %v1781_v30 = vadd.f32 %v2334_v7, %v1716_v10 }
 0x142   : > { %v2340_v5 = vadd.f32 %v2339_v27, %v2338_v25  ;;  %v2341_v29 = vpop.f32.mrb[26].mxu1 }
 0x143   : > { %v2342_v31 = vpop.f32.mrb[27].mxu1  ;;  %v1784_v11 = vadd.f32 %v2337_v13, %v1719_v28 }
 0x144   : > { %v2343_v33 = vadd.f32 %v2342_v31, %v2341_v29 }
 0x145   : > { %v2298_v32 = vpop.f32.mrb[24].mxu0 }
 0x146   : > { %v2299_v34 = vpop.f32.mrb[25].mxu0 }
 0x147   : > { %v2300_v35 = vadd.f32 %v2299_v34, %v2298_v32  ;;  %v2301_v36 = vpop.f32.mrb[26].mxu0 }
 0x148   : > { %v2302_v37 = vpop.f32.mrb[27].mxu0 }
 0x149   : > { %v1724_v38 = vadd.f32 %v2300_v35, %v1659_v21  ;;  %v2303_v40 = vadd.f32 %v2302_v37, %v2301_v36 }
 0x14a   : > { %v2344_v41 = vpop.f32.mrb[28].mxu1 }
 0x14b   : > { %v1727_v43 = vadd.f32 %v2303_v40, %v1662_v42  ;;  %v2345_v22 = vpop.f32.mrb[29].mxu1  ;;  %v1789_v44 = vadd.f32 %v2340_v5, %v1724_v38 }
 0x14c   : > { %v2346_v24 = vadd.f32 %v2345_v22, %v2344_v41  ;;  %v2347_v26 = vpop.f32.mrb[30].mxu1 }
 0x14d   : > { %v2348_v45 = vpop.f32.mrb[31].mxu1  ;;  %v1792_v39 = vadd.f32 %v2343_v33, %v1727_v43 }
 0x14e   : > { %v2349_v46 = vadd.f32 %v2348_v45, %v2347_v26 }
 0x14f   : > { %v2304_v47 = vpop.f32.mrb[28].mxu0 }
 0x150   : > { %v2305_v48 = vpop.f32.mrb[29].mxu0 }
 0x151   : > { %v2306_v49 = vadd.f32 %v2305_v48, %v2304_v47  ;;  %v2307_v50 = vpop.f32.mrb[30].mxu0 }
 0x152   : > { %v2308_v51 = vpop.f32.mrb[31].mxu0 }
 0x153   : > { %v1732_v54 = vadd.f32 %v2306_v49, %v1667_v53  ;;  %v2309_v56 = vadd.f32 %v2308_v51, %v2307_v50 }
 0x155   : > { %v1735_v21 = vadd.f32 %v2309_v56, %v1670_v55  ;;  %v1797_v57 = vadd.f32 %v2346_v24, %v1732_v54 }
 0x157   : > { %v1800_v58 = vadd.f32 %v2349_v46, %v1735_v21 }
 0x160   : > { %v2380_v42 = vpop.f32.mrb[32].mxu0 }
 0x161   : > { %v1846_v59 = vadd.f32 %v2380_v42, %v1781_v30  ;;  %v1837_v61 = vpop.f32.mrb[33].mxu0 }
 0x162   : > { %v1838_v63 = vadd.f32 %v1837_v61, %v1773_v14  ;;  %v2381_v60 = vpop.f32.mrb[34].mxu0 }
 0x163   : > { %v1870_v52 = vmax.f32 %v1846_v59, 0.0  ;;  %v1849_v0 = vadd.f32 %v2381_v60, %v1784_v11  ;;  %v1840_v1 = vpop.f32.mrb[35].mxu0 }
 0x164   : > { %v2384_v2 = vpop.f32.mrb[32].mxu1  ;;  %v1868_v3 = vmax.f32 %v1838_v63, 0.0  ;;  %v1841_v4 = vadd.f32 %v1840_v1, %v1776_v16 }
 0x165   : > { %1878 = vst [vmem:[%s177_s30 + $0x10] sm:$0xff] %v1870_v52  ;;  %v1862_v53 = vadd.f32 %v2384_v2, %v1797_v57  ;;  %v1853_v55 = vpop.f32.mrb[33].mxu1  ;;  %v1871_v6 = vmax.f32 %v1849_v0, 0.0 }
 0x166   : > { %1876 = vst [vmem:[%s177_s30] sm:$0xff] %v1868_v3  ;;  %v1854_v62 = vadd.f32 %v1853_v55, %v1789_v44  ;;  %v2385_v7 = vpop.f32.mrb[34].mxu1  ;;  %v1869_v9 = vmax.f32 %v1841_v4, 0.0 }
 0x167   : > { %v1874_v8 = vmax.f32 %v1862_v53, 0.0  ;;  %1879 = vst [vmem:[%s177_s30 + $0x18] sm:$0xff] %v1871_v6  ;;  %v1865_v12 = vadd.f32 %v2385_v7, %v1800_v58  ;;  %v1856_v13 = vpop.f32.mrb[35].mxu1 }
 0x168   : > { %v1872_v14 = vmax.f32 %v1854_v62, 0.0  ;;  %1877 = vst [vmem:[%s177_s30 + $0x8] sm:$0xff] %v1869_v9  ;;  %v1857_v15 = vadd.f32 %v1856_v13, %v1792_v39 }
 0x169   : > { %1882 = vst [vmem:[%s177_s30 + $0x30] sm:$0xff] %v1874_v8  ;;  %v1875_v16 = vmax.f32 %v1865_v12, 0.0 }
 0x16a   : > { %1880 = vst [vmem:[%s177_s30 + $0x20] sm:$0xff] %v1872_v14  ;;  %v1873_v17 = vmax.f32 %v1857_v15, 0.0 }
 0x16b   : > { %1883 = vst [vmem:[%s177_s30 + $0x38] sm:$0xff] %v1875_v16 }
 0x16c   : > { %1881 = vst [vmem:[%s177_s30 + $0x28] sm:$0xff] %v1873_v17 }
 0x16d   : > { %2591 = shalt.err (!%p2588_p5)
}
 0x16e   : > { %s2592_s19 = scalar_lea.hbm %s3173_s8, 1024  ;;  %s2596_s21 = scalar_lea.hbm %s3228_s3, 2048 }
 0x16f   : > { %p2593_p6 = scmp.ne.s32.totalorder %s3173_s8, %s2592_s19  ;;  %p2597_p10 = scmp.lt.u32.totalorder %s3173_s8, %s3228_s3 }
 0x170   : > { %p2598_p11 = scmp.lt.u32.totalorder %s2596_s21, %s2592_s19  ;;  %p2600_p13 = scmp.lt.u32.totalorder %s2592_s19, %s3173_s8 }
 0x171   : > { %p2594_p7 = pnand %p2593_p6, %p2721_p4 }
 0x172   : > { %p2599_p12 = por %p2598_p11, %p2597_p10 }
 0x173   : > { %p2595_p9 = pneg %p2594_p7 }
 0x174   : > { %p2601_p0 = por %p2600_p13, %p2599_p12 }
 0x176   : > { %p2602_p1 = pnand %p2601_p0, %p2595_p9 }
 0x178   : > { %2605 = shalt.err (!%p2602_p1)
}
 0x179   : > { %s2659_s29 = smov 128   ;;  %s2660_s30 = smov 8  }
 0x17a   : > { %2403 = dma.vmem_to_hbm [thread:$0]  (%p2721_p4), %s3175_s5, 1024, %s3173_s8, %s3179_s15, %s2659_s29, %s2659_s29, %s2660_s30  }
 0x17b PF: > { %p2409_p2 = scmp.ge.s32.totalorder %s2656_s17, 2  ;;  %s1915_s4 = sand.u32 1, %s2636_s12  }
 0x17c   : > { %s1916_s6 = scalar_lea.sflag [#allocation4], %s1915_s4 }
 0x17d   : > { %p2406_p3 = pnand %p2409_p2, %p2728_p8 }
 0x17f   : > { %2631 = dma.done.wait (!%p2406_p3), %s1916_s6, 1024  }
 0x180   : > { %2633 = vsyncadd (!%p2406_p3), %s1916_s6, 4294966272  ;;  %s16_s17 = sadd.s32 1, %s2656_s17   ;;  %s3233_s12 = smov %s2640_s13 }
 0x181   : > { %p13_p5 = scmp.ge.s32.totalorder %s16_s17, 4   ;;  %s3234_s13 = smov %s2644_s14 }
 0x182   : > { %s3235_s14 = smov %s2734_s25  ;;  %s3236_s15 = smov %s2652_s16 }
 0x183   : > { %s3237_s16 = smov %s3239_s20  ;;  %15 = sbr.rel (!%p13_p5) target bundleno = 4 (0x4), region = 73 }
 0x18a   :  { %1921 = vsyncpa [#allocation4], 1 }
 0x18b   :  { %1923 = vsyncpa [#allocation4 + $0x1], 1 }

</bundles_post_ra>
